<compile_context>
chip_gen: v5e
topology: v5e:2x2
jax: 0.10.0
libtpu: 0.0.40
codegen_flags: <defaults>
</compile_context>

<pallas_src>
import functools

import jax
import jax.numpy as jnp
import numpy as np
from jax import lax
from jax.experimental import pallas as pl
from jax.experimental.pallas import tpu as pltpu


def _avg_iter_kernel(scal_ref, nrow_ref, x_ref, uwt_ref, ub_ref, wt_ref,
                     out_ref, *, tol, max_alpha, max_iter):
    """One batch-tile of the NEMON averaged fixed-point iteration.

    scal_ref : SMEM f32[1]            -> [limiting_alpha]
    nrow_ref : SMEM i32[1]            -> [number of valid (unpadded) rows]
    x_ref    : VMEM f32[TB, in_dim]
    uwt_ref  : VMEM bf16[in_dim, D]   (U.weight pre-transposed, bf16 MXU feed)
    ub_ref   : VMEM f32[1, D]
    wt_ref   : VMEM bf16[D, D]        (W pre-transposed, bf16 MXU feed)
    out_ref  : VMEM f32[TB, D]
    """
    limiting_alpha = scal_ref[0]
    n_valid = nrow_ref[0]

    uwt = uwt_ref[...]
    wt = wt_ref[...]
    ub = ub_ref[...]

    TB, D = out_ref.shape

    # Padded rows (last tile of a ragged batch) get bias = 0, so they stay
    # exactly 0 through the whole iteration and contribute nothing to the
    # convergence norms or the adaptive-alpha schedule.
    row_ids = lax.broadcasted_iota(jnp.int32, (TB, 1), 0) + pl.program_id(0) * TB
    valid = (row_ids < n_valid).astype(jnp.float32)

    # bias = linear_module.bias(x) = x @ U_w.T + U_b  (bf16 MXU, f32 accumulate)
    bias = (jnp.dot(x_ref[...].astype(jnp.bfloat16), uwt,
                    preferred_element_type=jnp.float32) + ub) * valid

    z0 = jnp.zeros((TB, D), dtype=jnp.float32)
    z0_bf = jnp.zeros((TB, D), dtype=jnp.bfloat16)
    tol_f = jnp.float32(tol)

    def cond(carry):
        _z, _zbf, num, den, _alpha, it = carry
        # err > tol  <=>  num > tol * den   (divide-free)
        return jnp.logical_and(num > tol_f * den, it < max_iter)

    def body(carry):
        z, z_bf, num, den, alpha, it = carry

        # ------------------------- iteration A ---------------------------
        znA_pre = jnp.maximum(
            jnp.dot(z_bf, wt, preferred_element_type=jnp.float32) + bias, 0.0)
        dA = znA_pre - z                       # zn = z + alpha*d
        znA = z + alpha * dA
        znA_bf = znA.astype(jnp.bfloat16)      # fused cast feeds B's matmul

        # Norms of A — B's matmul below does not depend on these, so the XLU
        # reduce + sqrt + vector->scalar sync hide under B's MXU push.
        numA = alpha * jnp.sqrt(jnp.sum(dA * dA))          # == ||znA - z||
        denA = jnp.float32(1e-6) + jnp.sqrt(jnp.sum(znA * znA))
        # errA/err_prev > 0.9  <=>  numA*den > 0.9*num*denA   (all positive)
        alphaB = jnp.where(numA * den > 0.9 * num * denA,
                           jnp.maximum(alpha / 1.75, limiting_alpha), alpha)
        itA = it + 1

        # ------------- iteration B (speculative, maskable) ---------------
        znB_pre = jnp.maximum(
            jnp.dot(znA_bf, wt, preferred_element_type=jnp.float32) + bias, 0.0)
        dB = znB_pre - znA
        predB = jnp.logical_and(numA > tol_f * denA, itA < max_iter)
        scaleB = jnp.where(predB, alphaB, jnp.float32(0.0))
        znB = znA + scaleB * dB                # == znA exactly when not committed
        znB_bf = znB.astype(jnp.bfloat16)

        numB = alphaB * jnp.sqrt(jnp.sum(dB * dB))
        denB = jnp.float32(1e-6) + jnp.sqrt(jnp.sum(znB * znB))
        alphaC = jnp.where(numB * denA > 0.9 * numA * denB,
                           jnp.maximum(alphaB / 1.75, limiting_alpha), alphaB)

        num_new = jnp.where(predB, numB, numA)
        den_new = jnp.where(predB, denB, denA)
        alpha_new = jnp.where(predB, alphaC, alphaB)
        it_new = itA + predB.astype(jnp.int32)
        return znB, znB_bf, num_new, den_new, alpha_new, it_new

    init = (z0, z0_bf, jnp.float32(100.0), jnp.float32(1.0),
            jnp.float32(max_alpha), jnp.int32(0))
    _z, z_bf, _num, _den, _alpha, _it = lax.while_loop(cond, body, init)

    # final: zn = relu(linear_module(x, z)) = relu(z @ W.T + bias)
    out_ref[...] = jnp.maximum(
        jnp.dot(z_bf, wt, preferred_element_type=jnp.float32) + bias, 0.0)


def get_max_optimal_alpha(W, max_alpha):
    """linear_module.get_max_optimal_alpha(): NEMON-style, from the inf-norm
    matrix measure mu_inf(W) = max_i (W_ii + sum_{j!=i} |W_ij|)."""
    diag = jnp.diag(W)
    mu = jnp.max(diag + jnp.sum(jnp.abs(W), axis=1) - jnp.abs(diag))
    alpha = 1.0 / (1.0 + 1e-6 - jnp.minimum(mu, 0.999))
    return jnp.clip(alpha, 1e-3, max_alpha).astype(jnp.float32)


def prepare_weights(U_w, U_b, W, max_alpha):
    """One-time host-side prep: transpose + bf16 cast of the MXU-fed weights."""
    limiting_alpha = get_max_optimal_alpha(W, max_alpha)
    uwt_bf = jnp.asarray(U_w).T.astype(jnp.bfloat16)          # [in, out]
    wt_bf = jnp.asarray(W).T.astype(jnp.bfloat16)             # [out, out]
    ub = jnp.asarray(U_b, jnp.float32).reshape(1, -1)          # [1, out]
    return uwt_bf, ub, wt_bf, limiting_alpha


def average_iteration_forward(x, uwt_bf, ub, wt_bf, limiting_alpha, *,
                              max_alpha=0.5, tol=1e-3, max_iter=75,
                              tile_b=256):
    B, in_dim = x.shape
    out_dim = wt_bf.shape[1]

    nt = pl.cdiv(B, tile_b)
    Bp = nt * tile_b
    if Bp != B:
        # Padded rows are masked inside the kernel (zero bias -> they stay 0
        # and do not influence the convergence norms / alpha schedule).
        x = jnp.pad(x, ((0, Bp - B), (0, 0)))

    scal = limiting_alpha.astype(jnp.float32).reshape(1)
    nrow = jnp.asarray([B], dtype=jnp.int32)

    kernel = functools.partial(_avg_iter_kernel, tol=float(tol),
                               max_alpha=float(max_alpha),
                               max_iter=int(max_iter))
    out = pl.pallas_call(
        kernel,
        out_shape=jax.ShapeDtypeStruct((Bp, out_dim), jnp.float32),
        grid=(nt,),
        in_specs=[
            pl.BlockSpec(memory_space=pltpu.MemorySpace.SMEM),    # limiting_alpha
            pl.BlockSpec(memory_space=pltpu.MemorySpace.SMEM),    # n valid rows
            pl.BlockSpec((tile_b, in_dim), lambda i: (i, 0)),     # x tile
            pl.BlockSpec((in_dim, out_dim), lambda i: (0, 0)),    # U_w.T (resident)
            pl.BlockSpec((1, out_dim), lambda i: (0, 0)),         # U_b   (resident)
            pl.BlockSpec((out_dim, out_dim), lambda i: (0, 0)),   # W.T   (resident)
        ],
        out_specs=pl.BlockSpec((tile_b, out_dim), lambda i: (i, 0)),
        compiler_params=pltpu.CompilerParams(
            dimension_semantics=("parallel",),                    # both v7x TCs
            vmem_limit_bytes=32 * 1024 * 1024),
    )(scal, nrow, x, uwt_bf, ub, wt_bf)
    return out[:B]


# ----------------------------- reference -----------------------------------
def _bf16(a):
    """Emulate the kernel's bf16 rounding of MXU operands."""
    return np.asarray(jnp.asarray(a, dtype=jnp.bfloat16).astype(jnp.float32))


def reference_forward_np(x, U_w, U_b, W, limiting_alpha, max_alpha, tol,
                         max_iter, tile_b):
    """NumPy transcription of the PyTorch while-loop, per batch tile, with the
    same bf16-rounded MXU operands / d-form averaging as the kernel."""
    x = np.asarray(x, np.float32)
    U_b = np.asarray(U_b, np.float32)
    uwt_b = _bf16(np.asarray(U_w, np.float32).T)
    wt_b = _bf16(np.asarray(W, np.float32).T)

    outs = []
    for t0 in range(0, x.shape[0], tile_b):
        xt = x[t0:t0 + tile_b]
        bias = _bf16(xt) @ uwt_b + U_b
        z = np.zeros((xt.shape[0], W.shape[0]), np.float32)
        num, den = 100.0, 1.0
        alpha = float(max_alpha)
        it = 0
        while num > tol * den and it < max_iter:
            zn_pre = np.maximum(_bf16(z) @ wt_b + bias, 0.0)
            d = zn_pre - z
            zn = z + alpha * d
            num_new = alpha * np.sqrt(np.sum(d * d))
            den_new = 1e-6 + np.sqrt(np.sum(zn * zn))
            if num_new * den > 0.9 * num * den_new:
                alpha = max(alpha / 1.75, float(limiting_alpha))
            num, den = num_new, den_new
            z = zn
            it += 1
        outs.append(np.maximum(_bf16(z) @ wt_b + bias, 0.0))
    return np.concatenate(outs, axis=0)


if __name__ == "__main__":
    # 512 rows = 2 tiles of 256 (even tile count -> both v7x TensorCores busy;
    # 256-row LHS fills the 256-row MXU on v6e/v7x). Feature dims stay small.
    B, IN_DIM, OUT_DIM = 512, 128, 128
    TILE_B = 256
    MAX_ALPHA, TOL, MAX_ITER = 0.5, 1e-3, 75

    key = jax.random.PRNGKey(0)
    kx, ku, kb, kw = jax.random.split(key, 4)

    x = jax.random.normal(kx, (B, IN_DIM), dtype=jnp.float32)
    U_w = jax.random.normal(ku, (OUT_DIM, IN_DIM), dtype=jnp.float32) / np.sqrt(IN_DIM)
    U_b = 0.1 * jax.random.normal(kb, (OUT_DIM,), dtype=jnp.float32)
    W_raw = jax.random.normal(kw, (OUT_DIM, OUT_DIM), dtype=jnp.float32)
    # Scale W so the iteration map is contractive (max abs row-sum <= 0.5).
    W = 0.5 * W_raw / jnp.max(jnp.sum(jnp.abs(W_raw), axis=1))

    uwt_bf, ub, wt_bf, limiting_alpha = prepare_weights(U_w, U_b, W, MAX_ALPHA)

    # --- exact-multiple batch ---
    out = average_iteration_forward(
        x, uwt_bf, ub, wt_bf, limiting_alpha,
        max_alpha=MAX_ALPHA, tol=TOL, max_iter=MAX_ITER, tile_b=TILE_B)
    out = jax.block_until_ready(out)
    ref = reference_forward_np(x, U_w, U_b, W, float(limiting_alpha),
                               MAX_ALPHA, TOL, MAX_ITER, TILE_B)
    np.testing.assert_allclose(np.asarray(out), ref, rtol=2e-2, atol=2e-2)

    # --- ragged batch (exercises the padded-row masking path) ---
    Br = 300
    out_r = average_iteration_forward(
        x[:Br], uwt_bf, ub, wt_bf, limiting_alpha,
        max_alpha=MAX_ALPHA, tol=TOL, max_iter=MAX_ITER, tile_b=TILE_B)
    out_r = jax.block_until_ready(out_r)
    ref_r = reference_forward_np(x[:Br], U_w, U_b, W, float(limiting_alpha),
                                 MAX_ALPHA, TOL, MAX_ITER, TILE_B)
    np.testing.assert_allclose(np.asarray(out_r), ref_r, rtol=2e-2, atol=2e-2)

    # TODO(synk): the custom autograd Backward (implicit fixed-point gradient)
    # and host-side Meter/SplittingMethodStats timing stats are not expressible
    # in a forward Pallas kernel.
    print("KERNEL_OK")
</pallas_src>

<mosaic_0001>
module attributes {stable_mosaic.version = 11 : i64} {
  func.func @_avg_iter_kernel(%arg0: i32, %arg1: memref<1xf32, #tpu.memory_space<smem>>, %arg2: memref<1xi32, #tpu.memory_space<smem>>, %arg3: memref<256x128xf32, #tpu.memory_space<vmem>>, %arg4: memref<128x128xbf16, #tpu.memory_space<vmem>>, %arg5: memref<1x128xf32, #tpu.memory_space<vmem>>, %arg6: memref<128x128xbf16, #tpu.memory_space<vmem>>, %arg7: memref<256x128xf32, #tpu.memory_space<vmem>>) attributes {dimension_semantics = [#tpu.dimension_semantics<parallel>], iteration_bounds = array<i64: 2>, scalar_prefetch = 0 : i64, scratch_operands = 0 : i64, tpu.core_type = #tpu.core_type<tc>, window_params = [{transform_indices = @transform_0, window_bounds = array<i64: 1>}, {transform_indices = @transform_1, window_bounds = array<i64: 1>}, {transform_indices = @transform_2, window_bounds = array<i64: 256, 128>}, {pipeline_mode = #tpu.pipeline_mode<synchronous>, transform_indices = @transform_3, window_bounds = array<i64: 128, 128>}, {pipeline_mode = #tpu.pipeline_mode<synchronous>, transform_indices = @transform_4, window_bounds = array<i64: 1, 128>}, {pipeline_mode = #tpu.pipeline_mode<synchronous>, transform_indices = @transform_5, window_bounds = array<i64: 128, 128>}, {transform_indices = @transform_6, window_bounds = array<i64: 256, 128>}]} {
    %c0 = arith.constant 0 : index
    %0 = memref.load %arg1[%c0] : memref<1xf32, #tpu.memory_space<smem>>
    %c0_0 = arith.constant 0 : index
    %1 = memref.load %arg2[%c0_0] : memref<1xi32, #tpu.memory_space<smem>>
    %c0_1 = arith.constant 0 : index
    %c0_2 = arith.constant 0 : index
    %2 = vector.load %arg4[%c0_1, %c0_2] : memref<128x128xbf16, #tpu.memory_space<vmem>>, vector<128x128xbf16>
    %c0_3 = arith.constant 0 : index
    %c0_4 = arith.constant 0 : index
    %3 = vector.load %arg6[%c0_3, %c0_4] : memref<128x128xbf16, #tpu.memory_space<vmem>>, vector<128x128xbf16>
    %c0_5 = arith.constant 0 : index
    %c0_6 = arith.constant 0 : index
    %4 = vector.load %arg5[%c0_5, %c0_6] : memref<1x128xf32, #tpu.memory_space<vmem>>, vector<1x128xf32>
    %5 = tpu.iota {dimensions = array<i32: 0>} : vector<256x1xi32>
    %c256_i32 = arith.constant 256 : i32
    %6 = arith.muli %arg0, %c256_i32 : i32
    %7 = vector.broadcast %6 : i32 to vector<256x1xi32>
    %8 = arith.addi %5, %7 : vector<256x1xi32>
    %9 = vector.broadcast %1 : i32 to vector<256x1xi32>
    %10 = arith.cmpi slt, %8, %9 : vector<256x1xi32>
    %11 = arith.extui %10 : vector<256x1xi1> to vector<256x1xi32>
    %12 = arith.sitofp %11 : vector<256x1xi32> to vector<256x1xf32>
    %c0_7 = arith.constant 0 : index
    %c0_8 = arith.constant 0 : index
    %13 = vector.load %arg3[%c0_7, %c0_8] : memref<256x128xf32, #tpu.memory_space<vmem>>, vector<256x128xf32>
    %14 = arith.truncf %13 : vector<256x128xf32> to vector<256x128xbf16>
    %cst = arith.constant dense<0.000000e+00> : vector<256x128xf32>
    %15 = tpu.matmul %14, %2, %cst {dimension_numbers = #tpu.dot_dimension_numbers<[1], [0], [0], [1], [0, 0, 1, 1], [], []>} : vector<256x128xbf16>, vector<128x128xbf16>, vector<256x128xf32> -> vector<256x128xf32>
    %16 = vector.broadcast %4 : vector<1x128xf32> to vector<256x128xf32>
    %17 = arith.addf %15, %16 : vector<256x128xf32>
    %18 = vector.broadcast %12 : vector<256x1xf32> to vector<256x128xf32>
    %19 = arith.mulf %17, %18 : vector<256x128xf32>
    %cst_9 = arith.constant 0.000000e+00 : f32
    %20 = vector.broadcast %cst_9 : f32 to vector<256x128xf32>
    %cst_10 = arith.constant 0.000000e+00 : bf16
    %21 = vector.broadcast %cst_10 : bf16 to vector<256x128xbf16>
    %cst_11 = arith.constant 1.000000e-03 : f32
    %cst_12 = arith.constant 1.000000e-03 : f32
    %cst_13 = arith.constant 1.000000e+02 : f32
    %cst_14 = arith.constant 1.000000e+00 : f32
    %cst_15 = arith.constant 5.000000e-01 : f32
    %c0_i32 = arith.constant 0 : i32
    %22:6 = scf.while (%arg8 = %20, %arg9 = %21, %arg10 = %cst_13, %arg11 = %cst_14, %arg12 = %cst_15, %arg13 = %c0_i32) : (vector<256x128xf32>, vector<256x128xbf16>, f32, f32, f32, i32) -> (vector<256x128xf32>, vector<256x128xbf16>, f32, f32, f32, i32) {
      %28 = arith.mulf %cst_11, %arg11 : f32
      %29 = arith.cmpf ogt, %arg10, %28 : f32
      %c75_i32 = arith.constant 75 : i32
      %30 = arith.cmpi slt, %arg13, %c75_i32 : i32
      %31 = arith.andi %29, %30 : i1
      scf.condition(%31) %arg8, %arg9, %arg10, %arg11, %arg12, %arg13 : vector<256x128xf32>, vector<256x128xbf16>, f32, f32, f32, i32
    } do {
    ^bb0(%arg8: vector<256x128xf32>, %arg9: vector<256x128xbf16>, %arg10: f32, %arg11: f32, %arg12: f32, %arg13: i32):
      %cst_20 = arith.constant dense<0.000000e+00> : vector<256x128xf32>
      %28 = tpu.matmul %arg9, %3, %cst_20 {dimension_numbers = #tpu.dot_dimension_numbers<[1], [0], [0], [1], [0, 0, 1, 1], [], []>} : vector<256x128xbf16>, vector<128x128xbf16>, vector<256x128xf32> -> vector<256x128xf32>
      %29 = arith.addf %28, %19 : vector<256x128xf32>
      %cst_21 = arith.constant 0.000000e+00 : f32
      %30 = vector.broadcast %cst_21 : f32 to vector<256x128xf32>
      %31 = arith.maximumf %29, %30 : vector<256x128xf32>
      %32 = arith.subf %31, %arg8 : vector<256x128xf32>
      %33 = vector.broadcast %arg12 : f32 to vector<256x128xf32>
      %34 = arith.mulf %33, %32 : vector<256x128xf32>
      %35 = arith.addf %arg8, %34 : vector<256x128xf32>
      %36 = arith.truncf %35 : vector<256x128xf32> to vector<256x128xbf16>
      %37 = arith.mulf %32, %32 : vector<256x128xf32>
      %38 = vector.shape_cast %37 : vector<256x128xf32> to vector<1x256x128xf32>
      %cst_22 = arith.constant dense<0.000000e+00> : vector<1xf32>
      %39 = vector.multi_reduction <add>, %38, %cst_22 [1, 2] : vector<1x256x128xf32> to vector<1xf32>
      %40 = vector.shape_cast %39 : vector<1xf32> to vector<1x1x1xf32>
      %41 = vector.extract %40[0, 0, 0] : f32 from vector<1x1x1xf32>
      %42 = math.sqrt %41 : f32
      %43 = arith.mulf %arg12, %42 : f32
      %44 = arith.mulf %35, %35 : vector<256x128xf32>
      %45 = vector.shape_cast %44 : vector<256x128xf32> to vector<1x256x128xf32>
      %cst_23 = arith.constant dense<0.000000e+00> : vector<1xf32>
      %46 = vector.multi_reduction <add>, %45, %cst_23 [1, 2] : vector<1x256x128xf32> to vector<1xf32>
      %47 = vector.shape_cast %46 : vector<1xf32> to vector<1x1x1xf32>
      %48 = vector.extract %47[0, 0, 0] : f32 from vector<1x1x1xf32>
      %49 = math.sqrt %48 : f32
      %cst_24 = arith.constant 9.99999997E-7 : f32
      %50 = arith.addf %cst_24, %49 : f32
      %51 = arith.mulf %43, %arg11 : f32
      %cst_25 = arith.constant 0.899999976 : f32
      %52 = arith.mulf %cst_25, %arg10 : f32
      %53 = arith.mulf %52, %50 : f32
      %54 = arith.cmpf ogt, %51, %53 : f32
      %cst_26 = arith.constant 1.750000e+00 : f32
      %55 = arith.divf %arg12, %cst_26 : f32
      %56 = arith.maximumf %55, %0 : f32
      %57 = arith.select %54, %56, %arg12 : f32
      %c1_i32 = arith.constant 1 : i32
      %58 = arith.addi %arg13, %c1_i32 : i32
      %cst_27 = arith.constant dense<0.000000e+00> : vector<256x128xf32>
      %59 = tpu.matmul %36, %3, %cst_27 {dimension_numbers = #tpu.dot_dimension_numbers<[1], [0], [0], [1], [0, 0, 1, 1], [], []>} : vector<256x128xbf16>, vector<128x128xbf16>, vector<256x128xf32> -> vector<256x128xf32>
      %60 = arith.addf %59, %19 : vector<256x128xf32>
      %cst_28 = arith.constant 0.000000e+00 : f32
      %61 = vector.broadcast %cst_28 : f32 to vector<256x128xf32>
      %62 = arith.maximumf %60, %61 : vector<256x128xf32>
      %63 = arith.subf %62, %35 : vector<256x128xf32>
      %64 = arith.mulf %cst_12, %50 : f32
      %65 = arith.cmpf ogt, %43, %64 : f32
      %c75_i32 = arith.constant 75 : i32
      %66 = arith.cmpi slt, %58, %c75_i32 : i32
      %67 = arith.andi %65, %66 : i1
      %cst_29 = arith.constant 0.000000e+00 : f32
      %68 = arith.select %67, %57, %cst_29 : f32
      %69 = vector.broadcast %68 : f32 to vector<256x128xf32>
      %70 = arith.mulf %69, %63 : vector<256x128xf32>
      %71 = arith.addf %35, %70 : vector<256x128xf32>
      %72 = arith.truncf %71 : vector<256x128xf32> to vector<256x128xbf16>
      %73 = arith.mulf %63, %63 : vector<256x128xf32>
      %74 = vector.shape_cast %73 : vector<256x128xf32> to vector<1x256x128xf32>
      %cst_30 = arith.constant dense<0.000000e+00> : vector<1xf32>
      %75 = vector.multi_reduction <add>, %74, %cst_30 [1, 2] : vector<1x256x128xf32> to vector<1xf32>
      %76 = vector.shape_cast %75 : vector<1xf32> to vector<1x1x1xf32>
      %77 = vector.extract %76[0, 0, 0] : f32 from vector<1x1x1xf32>
      %78 = math.sqrt %77 : f32
      %79 = arith.mulf %57, %78 : f32
      %80 = arith.mulf %71, %71 : vector<256x128xf32>
      %81 = vector.shape_cast %80 : vector<256x128xf32> to vector<1x256x128xf32>
      %cst_31 = arith.constant dense<0.000000e+00> : vector<1xf32>
      %82 = vector.multi_reduction <add>, %81, %cst_31 [1, 2] : vector<1x256x128xf32> to vector<1xf32>
      %83 = vector.shape_cast %82 : vector<1xf32> to vector<1x1x1xf32>
      %84 = vector.extract %83[0, 0, 0] : f32 from vector<1x1x1xf32>
      %85 = math.sqrt %84 : f32
      %cst_32 = arith.constant 9.99999997E-7 : f32
      %86 = arith.addf %cst_32, %85 : f32
      %87 = arith.mulf %79, %50 : f32
      %cst_33 = arith.constant 0.899999976 : f32
      %88 = arith.mulf %cst_33, %43 : f32
      %89 = arith.mulf %88, %86 : f32
      %90 = arith.cmpf ogt, %87, %89 : f32
      %cst_34 = arith.constant 1.750000e+00 : f32
      %91 = arith.divf %57, %cst_34 : f32
      %92 = arith.maximumf %91, %0 : f32
      %93 = arith.select %90, %92, %57 : f32
      %94 = arith.select %67, %79, %43 : f32
      %95 = arith.select %67, %86, %50 : f32
      %96 = arith.select %67, %93, %57 : f32
      %97 = arith.extui %67 : i1 to i32
      %98 = arith.addi %58, %97 : i32
      scf.yield %71, %72, %94, %95, %96, %98 : vector<256x128xf32>, vector<256x128xbf16>, f32, f32, f32, i32
    }
    %cst_16 = arith.constant dense<0.000000e+00> : vector<256x128xf32>
    %23 = tpu.matmul %22#1, %3, %cst_16 {dimension_numbers = #tpu.dot_dimension_numbers<[1], [0], [0], [1], [0, 0, 1, 1], [], []>} : vector<256x128xbf16>, vector<128x128xbf16>, vector<256x128xf32> -> vector<256x128xf32>
    %24 = arith.addf %23, %19 : vector<256x128xf32>
    %cst_17 = arith.constant 0.000000e+00 : f32
    %25 = vector.broadcast %cst_17 : f32 to vector<256x128xf32>
    %26 = arith.maximumf %24, %25 : vector<256x128xf32>
    %c0_18 = arith.constant 0 : index
    %c0_19 = arith.constant 0 : index
    %27 = vector.load %arg7[%c0_18, %c0_19] : memref<256x128xf32, #tpu.memory_space<vmem>>, vector<256x128xf32>
    tpu.vector_store %arg7[%c0_18, %c0_19], %26 {strides = array<i32>} : memref<256x128xf32, #tpu.memory_space<vmem>>, vector<256x128xf32>,
    return
  }
  func.func @transform_0(%arg0: i32) -> i32 {
    %c0_i32 = arith.constant 0 : i32
    %c0_i32_0 = arith.constant 0 : i32
    return %c0_i32 : i32
  }
  func.func @transform_1(%arg0: i32) -> i32 {
    %c0_i32 = arith.constant 0 : i32
    %c0_i32_0 = arith.constant 0 : i32
    return %c0_i32 : i32
  }
  func.func @transform_2(%arg0: i32) -> (i32, i32) {
    %c0_i32 = arith.constant 0 : i32
    %c0_i32_0 = arith.constant 0 : i32
    return %arg0, %c0_i32 : i32, i32
  }
  func.func @transform_3(%arg0: i32) -> (i32, i32) {
    %c0_i32 = arith.constant 0 : i32
    %c0_i32_0 = arith.constant 0 : i32
    %c0_i32_1 = arith.constant 0 : i32
    return %c0_i32, %c0_i32_0 : i32, i32
  }
  func.func @transform_4(%arg0: i32) -> (i32, i32) {
    %c0_i32 = arith.constant 0 : i32
    %c0_i32_0 = arith.constant 0 : i32
    %c0_i32_1 = arith.constant 0 : i32
    return %c0_i32, %c0_i32_0 : i32, i32
  }
  func.func @transform_5(%arg0: i32) -> (i32, i32) {
    %c0_i32 = arith.constant 0 : i32
    %c0_i32_0 = arith.constant 0 : i32
    %c0_i32_1 = arith.constant 0 : i32
    return %c0_i32, %c0_i32_0 : i32, i32
  }
  func.func @transform_6(%arg0: i32) -> (i32, i32) {
    %c0_i32 = arith.constant 0 : i32
    %c0_i32_0 = arith.constant 0 : i32
    return %arg0, %c0_i32 : i32, i32
  }
}

</mosaic_0001>

<bundles_post_ra>
// kernel: tpu_custom_call.1
= control target key start
LH: loop header
LB: loop body
LE: loop exit
PB: predicated region body
PF: predicated region fallthrough
CT: control target
= control target key end

     0   :  { %s6348_s0 = inlined_call_operand.<no memory space> [shape: f32[1], index: 0, kind: input, shape index: {}]   ;;  %s6349_s1 = inlined_call_operand.<no memory space> [shape: s32[1], index: 1, kind: input, shape index: {}]   ;;  %s6350_s2 = inlined_call_operand.hbm [shape: f32[512,128], index: 2, kind: input, shape index: {}]   ;;  %s6351_s3 = inlined_call_operand.hbm [shape: bf16[128,128], index: 3, kind: input, shape index: {}]   ;;  %s6352_s4 = inlined_call_operand.vmem [shape: f32[1,128], index: 4, kind: input, shape index: {}]   ;;  %s6353_s5 = inlined_call_operand.hbm [shape: bf16[128,128], index: 5, kind: input, shape index: {}]   ;;  %s6354_s6 = inlined_call_operand.hbm [shape: f32[512,128], index: 6, kind: output, shape index: {}]  }
   0x1   :  { %6464 = sst [smem:[#allocation144_spill]] %s6350_s2 }
   0x2   :  { %6465 = sst [smem:[#allocation145_spill]] %s6351_s3 }
   0x3   :  { %11 = sst [smem:[#allocation2]] %s6348_s0 }
   0x4   :  { %12 = sst [smem:[#allocation3]] %s6349_s1 }
   0x5   :  { %13 = vsyncpa [#allocation5], 0 }
   0x6   :  { %15 = vsyncpa [#allocation5 + $0x1], 0 }
   0x7   :  { %16 = vsyncpa [#allocation8], 0 }
   0x8   :  { %17 = vsyncpa [#allocation6], 0 }
   0x9   :  { %19 = vsyncpa [#allocation6 + $0x1], 0  ;;  %s4084_s25 = smov 0   ;;  %s4086_s26 = smov 0  }
   0xa   :  { %s4088_s27 = smov 0   ;;  %s4090_s28 = smov 0  }
   0xb LB: > { %s4105_s0 = sadd.s32 4294967295, %s3759_s28   ;;  %s2437_s1 = sadd.s32 4294967294, %s3759_s28   ;;  %s3759_s28 = sphi %s4090_s28, %s6947_s28   ;;  %s3755_s27 = sphi %s4088_s27, %s6946_s27   ;;  %s3751_s26 = sphi %s4086_s26, %s6945_s26   ;;  %s3747_s25 = sphi %s4084_s25, %s6944_s25  }
   0xc   : > { %p87_p0 = scmp.ne.s32.totalorder %s3751_s26, %s3747_s25  ;;  %p88_p1 = scmp.eq.s32.totalorder %s4105_s0, 0 }
   0xd   : > { %p174_p2 = scmp.eq.s32.totalorder %s4105_s0, 1  ;;  %p180_p3 = scmp.eq.s32.totalorder %s2437_s1, 1 }
   0xe   : > { %p4114_p4 = por %p88_p1, %p87_p0  ;;  %p2438_p5 = scmp.ge.s32.totalorder %s3759_s28, 1 }
   0xf   : > { %p4119_p6 = por %p180_p3, %p87_p0  ;;  %p187_p7 = scmp.lt.s32.totalorder %s3759_s28, 3 }
  0x10   : > { %s6468_s3 = sld [smem:[#allocation145_spill]]  ;;  %s4033_s11 = smov [#allocation7]  }
  0x11   : > { %p4127_p8 = pnand %p2438_p5, %p187_p7  ;;  %s206_s12 = sshll.u32 %s4033_s11, 4  ;;  %s207_s12 = int_to_ptr.vmem [resolvable:$true] %s206_s12 }
  0x12   : > { %s221_s15 = sshll.u32 %s6353_s5, 4  ;;  %s4034_s16 = smov 64   ;;  %s222_s15 = int_to_ptr.hbm [resolvable:$true] %s221_s15 }
  0x13   : > { %p2709_p9 = pneg %p4127_p8  ;;  %s4035_s17 = smov 4  }
  0x14   : > { %s4036_s18 = smov [#allocation9]   ;;  %s4140_s20 = sadd.s32 1, %s3759_s28  }
  0x15   : > { %p2710_p10 = pnand %p2709_p9, %p88_p1  ;;  %s223_s19 = sshll.u32 %s4036_s18, 4  ;;  %s224_s19 = int_to_ptr.vmem [resolvable:$true] %s223_s19 }
  0x16   : > { %s204_s9 = sshll.u32 %s6468_s3, 4  ;;  %s74_s21 = sadd.s32 1, %s3755_s27  ;;  %s205_s9 = int_to_ptr.hbm [resolvable:$true] %s204_s9 }
  0x17   : > { %2712 = dma.hbm_to_vmem [thread:$0]  (!%p2710_p10), %s205_s9, 1024, %s207_s12, [#allocation8], %s4034_s16, %s4034_s16, %s4035_s17  }
  0x18   : > { %2715 = dma.hbm_to_vmem [thread:$0]  (!%p2710_p10), %s222_s15, 1024, %s224_s19, [#allocation8], %s4034_s16, %s4034_s16, %s4035_s17  }
  0x19   : > { %s71_s22 = ssub.s32 %s3759_s28, %s4140_s20  ;;  %p81_p12 = scmp.ne.s32.totalorder %s3755_s27, %s3751_s26 }
  0x1a   : > { %p72_p13 = scmp.eq.s32.totalorder %s71_s22, 0  ;;  %p82_p0 = scmp.eq.s32.totalorder %s3759_s28, 0 }
  0x1b   : > { %p4150_p3 = por %p174_p2, %p81_p12  ;;  %p2726_p5 = scmp.lt.s32.totalorder %s3759_s28, 2 }
  0x1c   : > { %s4156_s24 = scalar_select %p72_p13, %s3755_s27, %s74_s21  }
  0x1d   : > { %p83_p7 = por %p82_p0, %p81_p12  ;;  %s237_s1 = sand.u32 1, %s3755_s27  }
  0x1e   : > { %s2442_s7 = sshll.u32 %s237_s1, 8  ;;  %s2589_s8 = sshll.u32 %s3759_s28, 8 }
  0x1f   : > { %s6471_s2 = sld [smem:[#allocation144_spill]]  ;;  %s241_s13 = scalar_lea.vmem [#allocation4], %s2442_s7 }
  0x20   : > { %s249_s14 = sshll.u32 %s241_s13, 4  ;;  %p4163_p2 = pnand %p2726_p5, %p83_p7  ;;  %s250_s14 = int_to_ptr.vmem [resolvable:$true] %s249_s14 }
  0x21   : > { %s238_s17 = scalar_lea.sflag [#allocation5], %s237_s1 }
  0x22   : > { %p3391_p10 = pneg %p4163_p2 }
  0x25   : > { %s246_s12 = scalar_lea.hbm %s6471_s2, %s2589_s8  ;;  %s3394_s7 = scalar_lea.hbm %s6471_s2, 512 }
  0x26   : > { %s247_s15 = sshll.u32 %s246_s12, 4  ;;  %s248_s15 = int_to_ptr.hbm [resolvable:$true] %s247_s15 }
  0x27   : > { %s3387_s18 = sshra.s32 %s248_s15, 4  ;;  %s3388_s18 = int_to_ptr.hbm [resolvable:$true] %s3387_s18 }
  0x28   : > { %s3389_s19 = scalar_lea.hbm %s3388_s18, 256  ;;  %p3395_p0 = scmp.lt.s32.totalorder %s3388_s18, %s6471_s2 }
  0x29   : > { %p3390_p9 = scmp.ne.s32.totalorder %s3388_s18, %s3389_s19  ;;  %p3396_p5 = scmp.lt.s32.totalorder %s3394_s7, %s3389_s19 }
  0x2b   : > { %p3392_p12 = pnand %p3391_p10, %p3390_p9  ;;  %p3397_p7 = por %p3396_p5, %p3395_p0 }
  0x2d   : > { %p3393_p13 = pneg %p3392_p12 }
  0x2f   : > { %p3398_p11 = pnand %p3397_p7, %p3393_p13 }
  0x31   : > { %3401 = shalt.err (!%p3398_p11)
}
  0x32   : > { %s4037_s1 = smov 128   ;;  %s4038_s11 = smov 8  }
  0x33   : > { %2719 = dma.hbm_to_vmem [thread:$0]  (!%p4163_p2), %s248_s15, 4096, %s250_s14, %s238_s17, %s4037_s1, %s4037_s1, %s4038_s11  }
  0x34   : > { %261 = sbr.rel (%p4127_p8) target bundleno = 1557 (0x615), region = 44 }
  0x39   : > { %s4180_s12 = sand.u32 1, %s3751_s26  }
  0x3a   : > { %s2446_s13 = sshll.u32 %s4180_s12, 8  ;;  %s264_s18 = scalar_lea.sflag [#allocation5], %s4180_s12 }
  0x3b   : > { %s4186_s19 = scalar_lea.vmem [#allocation4], %s2446_s13 }
  0x3c   : > { %3734 = dma.done.wait (%p4114_p4), %s264_s18, 4096  }
  0x3d   : > { %3736 = vsyncadd (%p4114_p4), %s264_s18, 4294963200 }
  0x3e   : > { %3738 = dma.done.wait (%p88_p1), [#allocation8], 2048  }
  0x3f   : > { %3740 = vsyncadd (%p88_p1), [#allocation8], 4294965248  ;;  %s4196_s10 = sld [smem:[#allocation2]]  ;;  %v4198_v0 = vld [vmem:[#allocation9] sm:$0xf]  ;;  %v2597_v32 = vld [vmem:[#allocation7 + $0x38] sm:$0xff] }
  0x40   : > { %6473 = vst [vmem:[#allocation14_spill] sm:$0xff] %v4198_v0  ;;  %v4200_v1 = vld [vmem:[#allocation9] sm:$0xf]  ;;  %v4202_v2 = vld [vmem:[#allocation9] sm:$0xf0]  ;;  %608 = vmatpush.bf16.msra.mxu0 %v2597_v32  ;;  %2615 = vmatpush.bf16.msra.mxu1 %v2597_v32  ;;  %v2596_v33 = vld [vmem:[#allocation7 + $0x30] sm:$0xff] }
  0x41   : > { %6474 = vst [vmem:[#allocation15_spill] sm:$0xff] %v4200_v1  ;;  %v4204_v3 = vld [vmem:[#allocation9] sm:$0xf0]  ;;  %v4206_v4 = vld [vmem:[#allocation9 + $0x8] sm:$0xf]  ;;  %2616 = vmatpush.bf16.msra.mxu2 %v2597_v32  ;;  %2617 = vmatpush.bf16.msra.mxu3 %v2597_v32  ;;  %v2593_v36 = vld [vmem:[#allocation7 + $0x18] sm:$0xff] }
  0x42   : > { %6475 = vst [vmem:[#allocation16_spill] sm:$0xff] %v4202_v2  ;;  %v4208_v5 = vld [vmem:[#allocation9 + $0x8] sm:$0xf]  ;;  %v4210_v6 = vld [vmem:[#allocation9 + $0x8] sm:$0xf0]  ;;  %v2594_v35 = vld [vmem:[#allocation7 + $0x20] sm:$0xff] }
  0x43   : > { %6476 = vst [vmem:[#allocation17_spill] sm:$0xff] %v4204_v3  ;;  %v4212_v7 = vld [vmem:[#allocation9 + $0x8] sm:$0xf0]  ;;  %v4214_v8 = vld [vmem:[#allocation9 + $0x10] sm:$0xf]  ;;  %v2590_v39 = vld [vmem:[#allocation7] sm:$0xff] }
  0x44   : > { %6477 = vst [vmem:[#allocation18_spill] sm:$0xff] %v4206_v4  ;;  %v4216_v9 = vld [vmem:[#allocation9 + $0x10] sm:$0xf]  ;;  %v4218_v10 = vld [vmem:[#allocation9 + $0x10] sm:$0xf0]  ;;  %609 = vmatpush.bf16.msra.mxu0 %v2596_v33  ;;  %2618 = vmatpush.bf16.msra.mxu1 %v2596_v33  ;;  %v2595_v34 = vld [vmem:[#allocation7 + $0x28] sm:$0xff] }
  0x45   : > { %6478 = vst [vmem:[#allocation19_spill] sm:$0xff] %v4208_v5  ;;  %v4220_v11 = vld [vmem:[#allocation9 + $0x10] sm:$0xf0]  ;;  %v4222_v12 = vld [vmem:[#allocation9 + $0x18] sm:$0xf]  ;;  %2619 = vmatpush.bf16.msra.mxu2 %v2596_v33  ;;  %2620 = vmatpush.bf16.msra.mxu3 %v2596_v33  ;;  %v2591_v38 = vld [vmem:[#allocation7 + $0x8] sm:$0xff] }
  0x46   : > { %6479 = vst [vmem:[#allocation20_spill] sm:$0xff] %v4210_v6  ;;  %v4224_v13 = vld [vmem:[#allocation9 + $0x18] sm:$0xf]  ;;  %v4226_v14 = vld [vmem:[#allocation9 + $0x18] sm:$0xf0]  ;;  %v2592_v37 = vld [vmem:[#allocation7 + $0x10] sm:$0xff] }
  0x47   : > { %6480 = vst [vmem:[#allocation21_spill] sm:$0xff] %v4212_v7  ;;  %v4228_v15 = vld [vmem:[#allocation9 + $0x18] sm:$0xf0]  ;;  %v4230_v16 = vld [vmem:[#allocation9 + $0x20] sm:$0xf]  ;;  %v510_v41 = vld [vmem:[%s4186_s19 + $0x8] sm:$0xff] }
  0x48   : > { %6481 = vst [vmem:[#allocation22_spill] sm:$0xff] %v4214_v8  ;;  %v4232_v17 = vld [vmem:[#allocation9 + $0x20] sm:$0xf]  ;;  %v4234_v18 = vld [vmem:[#allocation9 + $0x20] sm:$0xf0]  ;;  %610 = vmatpush.bf16.msra.mxu0 %v2595_v34  ;;  %2621 = vmatpush.bf16.msra.mxu1 %v2595_v34  ;;  %v518_v43 = vld [vmem:[%s4186_s19 + $0x48] sm:$0xff] }
  0x49   : > { %6482 = vst [vmem:[#allocation23_spill] sm:$0xff] %v4216_v9  ;;  %v4236_v19 = vld [vmem:[#allocation9 + $0x20] sm:$0xf0]  ;;  %v4238_v20 = vld [vmem:[#allocation9 + $0x28] sm:$0xf]  ;;  %2622 = vmatpush.bf16.msra.mxu2 %v2595_v34  ;;  %2623 = vmatpush.bf16.msra.mxu3 %v2595_v34  ;;  %v511_v52 = vld [vmem:[%s4186_s19 + $0x10] sm:$0xff] }
  0x4a   : > { %6483 = vst [vmem:[#allocation24_spill] sm:$0xff] %v4218_v10  ;;  %v4240_v21 = vld [vmem:[#allocation9 + $0x28] sm:$0xf]  ;;  %v4242_v22 = vld [vmem:[#allocation9 + $0x28] sm:$0xf0]  ;;  %v509_v40 = vld [vmem:[%s4186_s19] sm:$0xff] }
  0x4b   : > { %6484 = vst [vmem:[#allocation25_spill] sm:$0xff] %v4220_v11  ;;  %v4244_v23 = vld [vmem:[#allocation9 + $0x28] sm:$0xf0]  ;;  %v4246_v24 = vld [vmem:[#allocation9 + $0x30] sm:$0xf]  ;;  %v517_v42 = vld [vmem:[%s4186_s19 + $0x40] sm:$0xff]  ;;  %v541_v48 = vpack.c.bf16 %v510_v41, %v509_v40 }
  0x4c   : > { %6485 = vst [vmem:[#allocation26_spill] sm:$0xff] %v4222_v12  ;;  %v4248_v25 = vld [vmem:[#allocation9 + $0x30] sm:$0xf]  ;;  %v4250_v26 = vld [vmem:[#allocation9 + $0x30] sm:$0xf0]  ;;  %611 = vmatpush.bf16.msra.mxu0 %v2594_v35  ;;  %2624 = vmatpush.bf16.msra.mxu1 %v2594_v35  ;;  %v525_v44 = vld [vmem:[%s4186_s19 + $0x80] sm:$0xff]  ;;  %v545_v49 = vpack.c.bf16 %v518_v43, %v517_v42 }
  0x4d   : > { %6486 = vst [vmem:[#allocation27_spill] sm:$0xff] %v4224_v13  ;;  %v4252_v27 = vld [vmem:[#allocation9 + $0x30] sm:$0xf0]  ;;  %v4254_v28 = vld [vmem:[#allocation9 + $0x38] sm:$0xf]  ;;  %2625 = vmatpush.bf16.msra.mxu2 %v2594_v35  ;;  %2626 = vmatpush.bf16.msra.mxu3 %v2594_v35  ;;  %v526_v45 = vld [vmem:[%s4186_s19 + $0x88] sm:$0xff] }
  0x4e   : > { %6487 = vst [vmem:[#allocation28_spill] sm:$0xff] %v4226_v14  ;;  %v4256_v29 = vld [vmem:[#allocation9 + $0x38] sm:$0xf]  ;;  %v4258_v30 = vld [vmem:[#allocation9 + $0x38] sm:$0xf0]  ;;  %v533_v46 = vld [vmem:[%s4186_s19 + $0xc0] sm:$0xff]  ;;  %v549_v50 = vpack.c.bf16 %v526_v45, %v525_v44 }
  0x4f   : > { %6488 = vst [vmem:[#allocation29_spill] sm:$0xff] %v4228_v15  ;;  %v4260_v31 = vld [vmem:[#allocation9 + $0x38] sm:$0xf0]  ;;  %v534_v47 = vld [vmem:[%s4186_s19 + $0xc8] sm:$0xff]  ;;  %v519_v54 = vld [vmem:[%s4186_s19 + $0x50] sm:$0xff]  ;;  %s311_s29 = sld [smem:[#allocation3]] }
  0x50   : > { %6489 = vst [vmem:[#allocation30_spill] sm:$0xff] %v4230_v16  ;;  %612 = vmatpush.bf16.msra.mxu0 %v2593_v36  ;;  %2627 = vmatpush.bf16.msra.mxu1 %v2593_v36  ;;  %v553_v51 = vpack.c.bf16 %v534_v47, %v533_v46  ;;  %v512_v53 = vld [vmem:[%s4186_s19 + $0x18] sm:$0xff]  ;;  %v527_v56 = vld [vmem:[%s4186_s19 + $0x90] sm:$0xff]  ;;  %v513_v32 = vld [vmem:[%s4186_s19 + $0x20] sm:$0xff]  ;;  %s6432_s14 = sshll.u32 %s4105_s0, 8  ;;  %s4534_s17 = scalar_lea.vmem [#allocation10], %s2446_s13 }
  0x51   : > { %6490 = vst [vmem:[#allocation31_spill] sm:$0xff] %v4232_v17  ;;  %2628 = vmatpush.bf16.msra.mxu2 %v2593_v36  ;;  %2629 = vmatpush.bf16.msra.mxu3 %v2593_v36  ;;  %v520_v55 = vld [vmem:[%s4186_s19 + $0x58] sm:$0xff]  ;;  %v535_v58 = vld [vmem:[%s4186_s19 + $0xd0] sm:$0xff]  ;;  %v542_v60 = vpack.c.bf16 %v512_v53, %v511_v52  ;;  %v514_v33 = vld [vmem:[%s4186_s19 + $0x28] sm:$0xff]  ;;  %s4536_s21 = smov 0   ;;  %s4538_s22 = smov 0.5  }
  0x52   : > { %6491 = vst [vmem:[#allocation32_spill] sm:$0xff] %v4234_v18  ;;  %v528_v57 = vld [vmem:[%s4186_s19 + $0x98] sm:$0xff]  ;;  %v546_v61 = vpack.c.bf16 %v520_v55, %v519_v54  ;;  %v521_v34 = vld [vmem:[%s4186_s19 + $0x60] sm:$0xff]  ;;  %v522_v35 = vld [vmem:[%s4186_s19 + $0x68] sm:$0xff]  ;;  %v543_v40 = vpack.c.bf16 %v514_v33, %v513_v32  ;;  %s4540_s7 = smov 1.0   ;;  %s4542_s8 = smov 100.0  }
  0x53   : > { %6492 = vst [vmem:[#allocation33_spill] sm:$0xff] %v4236_v19  ;;  %v536_v59 = vld [vmem:[%s4186_s19 + $0xd8] sm:$0xff]  ;;  %v550_v62 = vpack.c.bf16 %v528_v57, %v527_v56  ;;  %v529_v36 = vld [vmem:[%s4186_s19 + $0xa0] sm:$0xff]  ;;  %v547_v41 = vpack.c.bf16 %v522_v35, %v521_v34  ;;  %v515_v44 = vld [vmem:[%s4186_s19 + $0x30] sm:$0xff]  ;;  %v345_v56 = vlaneseq  ;;  %v4640_v3 = vmov 0.0  }
  0x54   : > { %6493 = vst [vmem:[#allocation34_spill] sm:$0xff] %v4238_v20  ;;  %613 = vmatpush.bf16.msra.mxu0 %v2592_v37  ;;  %2630 = vmatpush.bf16.msra.mxu1 %v2592_v37  ;;  %v554_v63 = vpack.c.bf16 %v536_v59, %v535_v58  ;;  %v516_v45 = vld [vmem:[%s4186_s19 + $0x38] sm:$0xff]  ;;  %v523_v46 = vld [vmem:[%s4186_s19 + $0x70] sm:$0xff]  ;;  %v4300_v59 = vstv %s6432_s14  ;;  %v4315_v35 = vld [vmem:[%s6352_s4] ss:$0 sm:$0xff]  ;;  %v4642_v1 = vmov 0.0  }
  0x55   : > { %6494 = vst [vmem:[#allocation35_spill] sm:$0xff] %v4240_v21  ;;  %2631 = vmatpush.bf16.msra.mxu2 %v2592_v37  ;;  %2632 = vmatpush.bf16.msra.mxu3 %v2592_v37  ;;  %v530_v37 = vld [vmem:[%s4186_s19 + $0xa8] sm:$0xff]  ;;  %v524_v47 = vld [vmem:[%s4186_s19 + $0x78] sm:$0xff]  ;;  %v544_v52 = vpack.c.bf16 %v516_v45, %v515_v44  ;;  %v4294_v57 = vshrl.u32 %v345_v56, 7  ;;  %v4644_v7 = vmov 0.0   ;;  %v4646_v5 = vmov 0.0  }
  0x56   : > { %6495 = vst [vmem:[#allocation36_spill] sm:$0xff] %v4242_v22  ;;  %v551_v42 = vpack.c.bf16 %v530_v37, %v529_v36  ;;  %v548_v53 = vpack.c.bf16 %v524_v47, %v523_v46  ;;  %v4648_v11 = vmov 0.0   ;;  %v4650_v9 = vmov 0.0  }
  0x57   : > { %6496 = vst [vmem:[#allocation37_spill] sm:$0xff] %v4244_v23  ;;  %v354_v58 = vadd.s32 64, %v4294_v57  ;;  %v370_v32 = vadd.s32 192, %v4294_v57  ;;  %v347_v33 = vadd.s32 8, %v4294_v57  ;;  %v355_v34 = vadd.s32 72, %v4294_v57 }
  0x58   : > { %6497 = vst [vmem:[#allocation38_spill] sm:$0xff] %v4246_v24  ;;  %614 = vmatpush.bf16.msra.mxu0 %v2591_v38  ;;  %2633 = vmatpush.bf16.msra.mxu1 %v2591_v38  ;;  %v363_v47 = vadd.s32 136, %v4294_v57  ;;  %v4652_v15 = vmov 0.0   ;;  %v4654_v13 = vmov 0.0   ;;  %v4656_v19 = vmov 0.0  }
  0x59   : > { %6498 = vst [vmem:[#allocation39_spill] sm:$0xff] %v4248_v25  ;;  %2634 = vmatpush.bf16.msra.mxu2 %v2591_v38  ;;  %2635 = vmatpush.bf16.msra.mxu3 %v2591_v38  ;;  %v537_v38 = vld [vmem:[%s4186_s19 + $0xe0] sm:$0xff]  ;;  %v404_v37 = vadd.s32 %v4300_v59, %v370_v32  ;;  %v389_v44 = vadd.s32 %v4300_v59, %v355_v34  ;;  %v4658_v17 = vmov 0.0   ;;  %v4660_v23 = vmov 0.0  }
  0x5a   : > { %6499 = vst [vmem:[#allocation40_spill] sm:$0xff] %v4250_v26  ;;  %v4662_v21 = vmov 0.0   ;;  %v4666_v25 = vmov 0.0  }
  0x5b   : > { %6500 = vst [vmem:[#allocation41_spill] sm:$0xff] %v4252_v27  ;;  %v4664_v27 = vmov 0.0  }
  0x5c   : > { %6501 = vst [vmem:[#allocation42_spill] sm:$0xff] %v4254_v28  ;;  %615 = vmatpush.bf16.msra.mxu0 %v2590_v39  ;;  %2636 = vmatpush.bf16.msra.mxu1 %v2590_v39 }
  0x5d   : > { %6502 = vst [vmem:[#allocation43_spill] sm:$0xff] %v4256_v29  ;;  %2637 = vmatpush.bf16.msra.mxu2 %v2590_v39  ;;  %2638 = vmatpush.bf16.msra.mxu3 %v2590_v39  ;;  %v538_v39 = vld [vmem:[%s4186_s19 + $0xe8] sm:$0xff]  ;;  %v4670_v29 = vmov 0.0  }
  0x5e   : > { %6503 = vst [vmem:[#allocation44_spill] sm:$0xff] %v4258_v30  ;;  %v555_v43 = vpack.c.bf16 %v538_v39, %v537_v38  ;;  %v6355_v38 = vmov 0.0  }
  0x5f   : > { %6504 = vst [vmem:[#allocation45_spill] sm:$0xff] %v4260_v31  ;;  %616 = vmatmul.bf16.vlgmr.msra.gmra.mxu0 %v541_v48  ;;  %636 = vmatmul.bf16.vlgmr.msra.gmra.mxu1 %v545_v49  ;;  %v531_v48 = vld [vmem:[%s4186_s19 + $0xb0] sm:$0xff]  ;;  %v532_v49 = vld [vmem:[%s4186_s19 + $0xb8] sm:$0xff]  ;;  %v4668_v31 = vmov 0.0  }
  0x60   : > { %656 = vmatmul.bf16.vlgmr.msra.gmra.mxu2 %v549_v50  ;;  %676 = vmatmul.bf16.vlgmr.msra.gmra.mxu3 %v553_v51  ;;  %v539_v50 = vld [vmem:[%s4186_s19 + $0xf0] sm:$0xff]  ;;  %v540_v51 = vld [vmem:[%s4186_s19 + $0xf8] sm:$0xff]  ;;  %v552_v54 = vpack.c.bf16 %v532_v49, %v531_v48  ;;  %v371_v48 = vadd.s32 200, %v4294_v57  ;;  %6539 = vst [vmem:[#allocation79_spill] sm:$0xff] %v4652_v15 }
  0x61   : > { %v556_v55 = vpack.c.bf16 %v540_v51, %v539_v50  ;;  %v348_v51 = vadd.s32 16, %v4294_v57  ;;  %6540 = vst [vmem:[#allocation80_spill] sm:$0xff] %v4654_v13 }
  0x62   : > { %6541 = vst [vmem:[#allocation81_spill] sm:$0xff] %v4656_v19 }
  0x63   : > { %6542 = vst [vmem:[#allocation82_spill] sm:$0xff] %v4658_v17 }
  0x64   : > { %6543 = vst [vmem:[#allocation83_spill] sm:$0xff] %v4660_v23 }
  0x65   : > { %6544 = vst [vmem:[#allocation84_spill] sm:$0xff] %v4662_v21 }
  0x66   : > { %6545 = vst [vmem:[#allocation85_spill] sm:$0xff] %v4666_v25 }
  0x6f   : > { %621 = vmatmul.bf16.gmra.mxu0 %v542_v60  ;;  %641 = vmatmul.bf16.gmra.mxu1 %v546_v61  ;;  %v380_v60 = vadd.s32 %v4300_v59, %v4294_v57  ;;  %v388_v61 = vadd.s32 %v4300_v59, %v354_v58 }
  0x70   : > { %661 = vmatmul.bf16.gmra.mxu2 %v550_v62  ;;  %681 = vmatmul.bf16.gmra.mxu3 %v554_v63  ;;  %v4305_v62 = vstv %s311_s29  ;;  %v362_v63 = vadd.s32 128, %v4294_v57 }
  0x71   : > { %vm413_vm0 = vcmp.lt.s32.totalorder %v380_v60, %v4305_v62  ;;  %vm421_vm1 = vcmp.lt.s32.totalorder %v388_v61, %v4305_v62  ;;  %vm437_vm3 = vcmp.lt.s32.totalorder %v404_v37, %v4305_v62  ;;  %vm422_vm5 = vcmp.lt.s32.totalorder %v389_v44, %v4305_v62 }
  0x72   : > { %v396_v36 = vadd.s32 %v4300_v59, %v362_v63  ;;  %v2451_v39 = vsel %vm413_vm0, 1.0, %v6355_v38  ;;  %v2475_v58 = vsel %vm437_vm3, 1.0, %v6355_v38  ;;  %v2460_v63 = vsel %vm422_vm5, 1.0, %v6355_v38 }
  0x73   : > { %v382_v37 = vadd.s32 %v4300_v59, %v348_v51  ;;  %v357_v51 = vadd.s32 88, %v4294_v57 }
  0x74   : > { %vm429_vm2 = vcmp.lt.s32.totalorder %v396_v36, %v4305_v62 }
  0x75   : > { %vm415_vm8 = vcmp.lt.s32.totalorder %v382_v37, %v4305_v62  ;;  %v391_v37 = vadd.s32 %v4300_v59, %v357_v51  ;;  %v358_v51 = vadd.s32 96, %v4294_v57 }
  0x77   : > { %vm424_vm13 = vcmp.lt.s32.totalorder %v391_v37, %v4305_v62 }
  0x7f   : > { %626 = vmatmul.bf16.gmra.mxu0 %v543_v40  ;;  %646 = vmatmul.bf16.gmra.mxu1 %v547_v41  ;;  %v2459_v41 = vsel %vm421_vm1, 1.0, %v6355_v38 }
  0x80   : > { %666 = vmatmul.bf16.gmra.mxu2 %v551_v42  ;;  %686 = vmatmul.bf16.gmra.mxu3 %v555_v43  ;;  %v381_v43 = vadd.s32 %v4300_v59, %v347_v33 }
  0x82   : > { %vm414_vm4 = vcmp.lt.s32.totalorder %v381_v43, %v4305_v62 }
  0x83   : > { %v2452_v61 = vsel %vm414_vm4, 1.0, %v6355_v38 }
  0x8f   : > { %631 = vmatmul.bf16.gmra.mxu0 %v544_v52  ;;  %651 = vmatmul.bf16.gmra.mxu1 %v548_v53  ;;  %v356_v52 = vadd.s32 80, %v4294_v57  ;;  %v397_v53 = vadd.s32 %v4300_v59, %v363_v47  ;;  %v372_v47 = vadd.s32 208, %v4294_v57 }
  0x90   : > { %671 = vmatmul.bf16.gmra.mxu2 %v552_v54  ;;  %691 = vmatmul.bf16.gmra.mxu3 %v556_v55  ;;  %v405_v54 = vadd.s32 %v4300_v59, %v371_v48  ;;  %v2467_v55 = vsel %vm429_vm2, 1.0, %v6355_v38  ;;  %v349_v48 = vadd.s32 24, %v4294_v57 }
  0x91   : > { %vm430_vm6 = vcmp.lt.s32.totalorder %v397_v53, %v4305_v62 }
  0x92   : > { %vm438_vm7 = vcmp.lt.s32.totalorder %v405_v54, %v4305_v62 }
  0x93   : > { %v2476_v53 = vsel %vm438_vm7, 1.0, %v6355_v38 }
  0xdc   : > { %v617_v40 = vpop.f32.mrf.mxu0  ;;  %v637_v42 = vpop.f32.mrf.mxu1 }
  0xdd   : > { %v618_v45 = vadd.f32 %v4315_v35, %v617_v40  ;;  %v638_v46 = vadd.f32 %v4315_v35, %v637_v42 }
  0xdf   : > { %v4328_v49 = vmul.f32 %v2451_v39, %v618_v45  ;;  %v4330_v50 = vmul.f32 %v2459_v41, %v638_v46  ;;  %v390_v39 = vadd.s32 %v4300_v59, %v356_v52  ;;  %v364_v46 = vadd.s32 144, %v4294_v57 }
  0xe0   : > { %v2468_v52 = vsel %vm430_vm6, 1.0, %v6355_v38 }
  0xe1   : > { %6505 = vst [vmem:[#allocation46_spill] sm:$0xff] %v4328_v49  ;;  %vm423_vm9 = vcmp.lt.s32.totalorder %v390_v39, %v4305_v62  ;;  %v4638_v49 = vmov 0.0  }
  0xe2   : > { %6506 = vst [vmem:[#allocation47_spill] sm:$0xff] %v4330_v50  ;;  %v4606_v50 = vmov 0  }
  0xe3   : > { %v657_v56 = vpop.f32.mrf.mxu2  ;;  %v677_v60 = vpop.f32.mrf.mxu3 }
  0xe4   : > { %v658_v32 = vadd.f32 %v4315_v35, %v657_v56  ;;  %v678_v33 = vadd.f32 %v4315_v35, %v677_v60  ;;  %v619_v34 = vpop.f32.mrf.mxu0  ;;  %v639_v36 = vpop.f32.mrf.mxu1  ;;  %v2453_v56 = vsel %vm415_vm8, 1.0, %v6355_v38  ;;  %v398_v60 = vadd.s32 %v4300_v59, %v364_v46 }
  0xe5   : > { %v620_v40 = vadd.f32 %v4315_v35, %v619_v34  ;;  %v640_v41 = vadd.f32 %v4315_v35, %v639_v36  ;;  %v383_v36 = vadd.s32 %v4300_v59, %v349_v48  ;;  %v365_v46 = vadd.s32 152, %v4294_v57 }
  0xe6   : > { %v4350_v42 = vmul.f32 %v2467_v55, %v658_v32  ;;  %v4352_v43 = vmul.f32 %v2475_v58, %v678_v33  ;;  %v2461_v58 = vsel %vm423_vm9, 1.0, %v6355_v38  ;;  %vm431_vm10 = vcmp.lt.s32.totalorder %v398_v60, %v4305_v62 }
  0xe7   : > { %v4356_v44 = vmul.f32 %v2452_v61, %v620_v40  ;;  %v4358_v45 = vmul.f32 %v2460_v63, %v640_v41  ;;  %v406_v61 = vadd.s32 %v4300_v59, %v372_v47  ;;  %v373_v47 = vadd.s32 216, %v4294_v57 }
  0xe8   : > { %6507 = vst [vmem:[#allocation48_spill] sm:$0xff] %v4350_v42  ;;  %vm416_vm12 = vcmp.lt.s32.totalorder %v383_v36, %v4305_v62  ;;  %v350_v48 = vadd.s32 32, %v4294_v57  ;;  %v4636_v42 = vmov 0.0  }
  0xe9   : > { %6508 = vst [vmem:[#allocation49_spill] sm:$0xff] %v4352_v43  ;;  %vm439_vm11 = vcmp.lt.s32.totalorder %v406_v61, %v4305_v62  ;;  %v4604_v43 = vmov 0  }
  0xea   : > { %6509 = vst [vmem:[#allocation50_spill] sm:$0xff] %v4356_v44  ;;  %v4634_v44 = vmov 0.0  }
  0xeb   : > { %6510 = vst [vmem:[#allocation51_spill] sm:$0xff] %v4358_v45  ;;  %v659_v54 = vpop.f32.mrf.mxu2  ;;  %v679_v55 = vpop.f32.mrf.mxu3  ;;  %v4602_v45 = vmov 0  }
  0xec   : > { %v660_v63 = vadd.f32 %v4315_v35, %v659_v54  ;;  %v680_v32 = vadd.f32 %v4315_v35, %v679_v55  ;;  %v622_v33 = vpop.f32.mrf.mxu0  ;;  %v642_v34 = vpop.f32.mrf.mxu1  ;;  %6538 = vst [vmem:[#allocation78_spill] sm:$0xff] %v4634_v44 }
  0xed   : > { %v623_v39 = vadd.f32 %v4315_v35, %v622_v33  ;;  %v643_v40 = vadd.f32 %v4315_v35, %v642_v34 }
  0xee   : > { %v4378_v41 = vmul.f32 %v2468_v52, %v660_v63  ;;  %v4380_v38 = vmul.f32 %v2476_v53, %v680_v32  ;;  %v399_v52 = vadd.s32 %v4300_v59, %v365_v46  ;;  %v407_v53 = vadd.s32 %v4300_v59, %v373_v47 }
  0xef   : > { %v4384_v54 = vmul.f32 %v2453_v56, %v623_v39  ;;  %v4386_v55 = vmul.f32 %v2461_v58, %v643_v40  ;;  %v6515_v56 = vmov 0.0   ;;  %v384_v40 = vadd.s32 %v4300_v59, %v350_v48 }
  0xf0   : > { %6511 = vst [vmem:[#allocation52_spill] sm:$0xff] %v4378_v41  ;;  %v2469_v63 = vsel %vm431_vm10, 1.0, %v6515_v56  ;;  %v2477_v32 = vsel %vm439_vm11, 1.0, %v6515_v56  ;;  %v2454_v61 = vsel %vm416_vm12, 1.0, %v6515_v56  ;;  %v2462_v33 = vsel %vm424_vm13, 1.0, %v6515_v56 }
  0xf1   : > { %6512 = vst [vmem:[#allocation53_spill] sm:$0xff] %v4380_v38  ;;  %v392_v46 = vadd.s32 %v4300_v59, %v358_v51  ;;  %vm432_vm14 = vcmp.lt.s32.totalorder %v399_v52, %v4305_v62  ;;  %vm440_vm15 = vcmp.lt.s32.totalorder %v407_v53, %v4305_v62  ;;  %v366_v48 = vadd.s32 160, %v4294_v57 }
  0xf2   : > { %6513 = vst [vmem:[#allocation54_spill] sm:$0xff] %v4384_v54  ;;  %v374_v51 = vadd.s32 224, %v4294_v57  ;;  %vm417_vm0 = vcmp.lt.s32.totalorder %v384_v40, %v4305_v62  ;;  %v2470_v52 = vsel %vm432_vm14, 1.0, %v6515_v56  ;;  %v2478_v53 = vsel %vm440_vm15, 1.0, %v6515_v56 }
  0xf3   : > { %6514 = vst [vmem:[#allocation55_spill] sm:$0xff] %v4386_v55  ;;  %v662_v58 = vpop.f32.mrf.mxu2  ;;  %v682_v60 = vpop.f32.mrf.mxu3  ;;  %vm425_vm1 = vcmp.lt.s32.totalorder %v392_v46, %v4305_v62  ;;  %v4598_v55 = vmov 0   ;;  %v4600_v38 = vmov 0   ;;  %v4630_v54 = vmov 0.0  }
  0xf4   : > { %v663_v34 = vadd.f32 %v4315_v35, %v662_v58  ;;  %v683_v36 = vadd.f32 %v4315_v35, %v682_v60  ;;  %v624_v37 = vpop.f32.mrf.mxu0  ;;  %v644_v39 = vpop.f32.mrf.mxu1  ;;  %v4632_v41 = vmov 0.0  }
  0xf5   : > { %v625_v47 = vadd.f32 %v4315_v35, %v624_v37  ;;  %v645_v2 = vadd.f32 %v4315_v35, %v644_v39  ;;  %v408_v37 = vadd.s32 %v4300_v59, %v374_v51  ;;  %v375_v51 = vadd.s32 232, %v4294_v57 }
  0xf6   : > { %v4406_v0 = vmul.f32 %v2469_v63, %v663_v34  ;;  %v4408_v6 = vmul.f32 %v2477_v32, %v683_v36  ;;  %v351_v63 = vadd.s32 40, %v4294_v57  ;;  %v359_v32 = vadd.s32 104, %v4294_v57 }
  0xf7   : > { %v4412_v58 = vmul.f32 %v2454_v61, %v625_v47  ;;  %v4414_v60 = vmul.f32 %v2462_v33, %v645_v2  ;;  %v2455_v2 = vsel %vm417_vm0, 1.0, %v6515_v56  ;;  %v2463_v33 = vsel %vm425_vm1, 1.0, %v6515_v56 }
  0xf8   : > { %6516 = vst [vmem:[#allocation56_spill] sm:$0xff] %v4406_v0  ;;  %v400_v36 = vadd.s32 %v4300_v59, %v366_v48  ;;  %v385_v4 = vadd.s32 %v4300_v59, %v351_v63  ;;  %v393_v10 = vadd.s32 %v4300_v59, %v359_v32  ;;  %v367_v48 = vadd.s32 168, %v4294_v57 }
  0xf9   : > { %6517 = vst [vmem:[#allocation57_spill] sm:$0xff] %v4408_v6  ;;  %vm441_vm3 = vcmp.lt.s32.totalorder %v408_v37, %v4305_v62  ;;  %v352_v63 = vadd.s32 48, %v4294_v57  ;;  %v360_v32 = vadd.s32 112, %v4294_v57  ;;  %v4596_v6 = vmov 0  }
  0xfa   : > { %6518 = vst [vmem:[#allocation58_spill] sm:$0xff] %v4412_v58  ;;  %vm433_vm2 = vcmp.lt.s32.totalorder %v400_v36, %v4305_v62  ;;  %vm418_vm4 = vcmp.lt.s32.totalorder %v385_v4, %v4305_v62  ;;  %vm426_vm5 = vcmp.lt.s32.totalorder %v393_v10, %v4305_v62  ;;  %v4626_v58 = vmov 0.0  }
  0xfb   : > { %6519 = vst [vmem:[#allocation59_spill] sm:$0xff] %v4414_v60  ;;  %v664_v61 = vpop.f32.mrf.mxu2  ;;  %v684_v34 = vpop.f32.mrf.mxu3  ;;  %v2456_v36 = vsel %vm418_vm4, 1.0, %v6515_v56  ;;  %v2464_v4 = vsel %vm426_vm5, 1.0, %v6515_v56  ;;  %v4594_v60 = vmov 0   ;;  %v4628_v0 = vmov 0.0  }
  0xfc   : > { %v665_v39 = vadd.f32 %v4315_v35, %v664_v61  ;;  %v685_v40 = vadd.f32 %v4315_v35, %v684_v34  ;;  %v627_v46 = vpop.f32.mrf.mxu0  ;;  %v647_v47 = vpop.f32.mrf.mxu1 }
  0xfd   : > { %v628_v8 = vadd.f32 %v4315_v35, %v627_v46  ;;  %v648_v14 = vadd.f32 %v4315_v35, %v647_v47  ;;  %v386_v46 = vadd.s32 %v4300_v59, %v352_v63  ;;  %v394_v47 = vadd.s32 %v4300_v59, %v360_v32 }
  0xfe   : > { %v4434_v12 = vmul.f32 %v2470_v52, %v665_v39  ;;  %v4436_v18 = vmul.f32 %v2478_v53, %v685_v40  ;;  %v401_v52 = vadd.s32 %v4300_v59, %v367_v48  ;;  %v409_v53 = vadd.s32 %v4300_v59, %v375_v51 }
  0xff   : > { %v4440_v61 = vmul.f32 %v2455_v2, %v628_v8  ;;  %v4442_v34 = vmul.f32 %v2463_v33, %v648_v14  ;;  %v2471_v8 = vsel %vm433_vm2, 1.0, %v6515_v56  ;;  %v2479_v2 = vsel %vm441_vm3, 1.0, %v6515_v56 }
 0x100   : > { %6520 = vst [vmem:[#allocation60_spill] sm:$0xff] %v4434_v12  ;;  %vm434_vm6 = vcmp.lt.s32.totalorder %v401_v52, %v4305_v62  ;;  %vm442_vm7 = vcmp.lt.s32.totalorder %v409_v53, %v4305_v62  ;;  %v368_v63 = vadd.s32 176, %v4294_v57  ;;  %v376_v32 = vadd.s32 240, %v4294_v57 }
 0x101   : > { %6521 = vst [vmem:[#allocation61_spill] sm:$0xff] %v4436_v18  ;;  %vm419_vm8 = vcmp.lt.s32.totalorder %v386_v46, %v4305_v62  ;;  %vm427_vm9 = vcmp.lt.s32.totalorder %v394_v47, %v4305_v62  ;;  %v2472_v52 = vsel %vm434_vm6, 1.0, %v6515_v56  ;;  %v2480_v53 = vsel %vm442_vm7, 1.0, %v6515_v56 }
 0x102   : > { %6522 = vst [vmem:[#allocation62_spill] sm:$0xff] %v4440_v61  ;;  %v4592_v18 = vmov 0   ;;  %v4622_v61 = vmov 0.0   ;;  %v4624_v12 = vmov 0.0  }
 0x103   : > { %6523 = vst [vmem:[#allocation63_spill] sm:$0xff] %v4442_v34  ;;  %v667_v14 = vpop.f32.mrf.mxu2  ;;  %v687_v33 = vpop.f32.mrf.mxu3  ;;  %v4590_v34 = vmov 0  }
 0x104   : > { %v668_v10 = vadd.f32 %v4315_v35, %v667_v14  ;;  %v688_v37 = vadd.f32 %v4315_v35, %v687_v33  ;;  %v629_v39 = vpop.f32.mrf.mxu0  ;;  %v649_v40 = vpop.f32.mrf.mxu1 }
 0x105   : > { %v630_v48 = vadd.f32 %v4315_v35, %v629_v39  ;;  %v650_v51 = vadd.f32 %v4315_v35, %v649_v40  ;;  %v402_v39 = vadd.s32 %v4300_v59, %v368_v63  ;;  %v410_v40 = vadd.s32 %v4300_v59, %v376_v32 }
 0x106   : > { %v4462_v16 = vmul.f32 %v2471_v8, %v668_v10  ;;  %v4464_v22 = vmul.f32 %v2479_v2, %v688_v37  ;;  %v353_v8 = vadd.s32 56, %v4294_v57  ;;  %v361_v2 = vadd.s32 120, %v4294_v57 }
 0x107   : > { %v4468_v14 = vmul.f32 %v2456_v36, %v630_v48  ;;  %v4470_v33 = vmul.f32 %v2464_v4, %v650_v51  ;;  %v2457_v4 = vsel %vm419_vm8, 1.0, %v6515_v56  ;;  %v2465_v37 = vsel %vm427_vm9, 1.0, %v6515_v56 }
 0x108   : > { %6524 = vst [vmem:[#allocation64_spill] sm:$0xff] %v4462_v16  ;;  %v387_v20 = vadd.s32 %v4300_v59, %v353_v8  ;;  %v395_v26 = vadd.s32 %v4300_v59, %v361_v2  ;;  %vm435_vm10 = vcmp.lt.s32.totalorder %v402_v39, %v4305_v62  ;;  %vm443_vm11 = vcmp.lt.s32.totalorder %v410_v40, %v4305_v62 }
 0x109   : > { %6525 = vst [vmem:[#allocation65_spill] sm:$0xff] %v4464_v22  ;;  %v369_v8 = vadd.s32 184, %v4294_v57  ;;  %v377_v2 = vadd.s32 248, %v4294_v57  ;;  %v4588_v22 = vmov 0   ;;  %v4620_v16 = vmov 0.0  }
 0x10a   : > { %6526 = vst [vmem:[#allocation66_spill] sm:$0xff] %v4468_v14  ;;  %vm420_vm12 = vcmp.lt.s32.totalorder %v387_v20, %v4305_v62  ;;  %vm428_vm13 = vcmp.lt.s32.totalorder %v395_v26, %v4305_v62  ;;  %v4618_v14 = vmov 0.0  }
 0x10b   : > { %6527 = vst [vmem:[#allocation67_spill] sm:$0xff] %v4470_v33  ;;  %v669_v36 = vpop.f32.mrf.mxu2  ;;  %v689_v10 = vpop.f32.mrf.mxu3  ;;  %v403_v39 = vadd.s32 %v4300_v59, %v369_v8  ;;  %v411_v57 = vadd.s32 %v4300_v59, %v377_v2 }
 0x10c   : > { %v670_v46 = vadd.f32 %v4315_v35, %v669_v36  ;;  %v690_v47 = vadd.f32 %v4315_v35, %v689_v10  ;;  %v632_v48 = vpop.f32.mrf.mxu0  ;;  %v652_v51 = vpop.f32.mrf.mxu1  ;;  %v2466_v10 = vsel %vm428_vm13, 1.0, %v6515_v56 }
 0x10d   : > { %v633_v24 = vadd.f32 %v4315_v35, %v632_v48  ;;  %v653_v30 = vadd.f32 %v4315_v35, %v652_v51  ;;  %vm436_vm14 = vcmp.lt.s32.totalorder %v403_v39, %v4305_v62  ;;  %vm444_vm15 = vcmp.lt.s32.totalorder %v411_v57, %v4305_v62 }
 0x10e   : > { %v4490_v28 = vmul.f32 %v2472_v52, %v670_v46  ;;  %v4492_v33 = vmul.f32 %v2480_v53, %v690_v47  ;;  %v2473_v52 = vsel %vm435_vm10, 1.0, %v6515_v56  ;;  %v2474_v8 = vsel %vm436_vm14, 1.0, %v6515_v56 }
 0x10f   : > { %v4494_v63 = vmul.f32 %v2457_v4, %v633_v24  ;;  %v4496_v32 = vmul.f32 %v2465_v37, %v653_v30  ;;  %v2481_v24 = vsel %vm443_vm11, 1.0, %v6515_v56  ;;  %v2458_v30 = vsel %vm420_vm12, 1.0, %v6515_v56 }
 0x110   : > { %6528 = vst [vmem:[#allocation68_spill] sm:$0xff] %v4490_v28  ;;  %v2482_v2 = vsel %vm444_vm15, 1.0, %v6515_v56  ;;  %v4544_v62 = vmov 0   ;;  %v4546_v56 = vmov 0   ;;  %v4558_v39 = vmov 0  }
 0x111   : > { %6529 = vst [vmem:[#allocation69_spill] sm:$0xff] %v4492_v33  ;;  %v4560_v57 = vmov 0   ;;  %v4586_v33 = vmov 0   ;;  %v4616_v28 = vmov 0.0  }
 0x112   : > { %6530 = vst [vmem:[#allocation70_spill] sm:$0xff] %v4494_v63  ;;  %v4614_v63 = vmov 0.0  }
 0x113   : > { %6531 = vst [vmem:[#allocation71_spill] sm:$0xff] %v4496_v32  ;;  %v672_v53 = vpop.f32.mrf.mxu2  ;;  %v692_v36 = vpop.f32.mrf.mxu3  ;;  %v4584_v32 = vmov 0  }
 0x114   : > { %v673_v4 = vadd.f32 %v4315_v35, %v672_v53  ;;  %v693_v20 = vadd.f32 %v4315_v35, %v692_v36  ;;  %v634_v37 = vpop.f32.mrf.mxu0  ;;  %v654_v26 = vpop.f32.mrf.mxu1 }
 0x115   : > { %v635_v40 = vadd.f32 %v4315_v35, %v634_v37  ;;  %v655_v46 = vadd.f32 %v4315_v35, %v654_v26  ;;  %v4556_v26 = vmov 0  }
 0x116   : > { %v4514_v47 = vmul.f32 %v2473_v52, %v673_v4  ;;  %v4516_v48 = vmul.f32 %v2481_v24, %v693_v20  ;;  %v4552_v4 = vmov 0   ;;  %v4554_v20 = vmov 0  }
 0x117   : > { %v4518_v51 = vmul.f32 %v2458_v30, %v635_v40  ;;  %v4520_v53 = vmul.f32 %v2466_v10, %v655_v46  ;;  %v4550_v10 = vmov 0   ;;  %v4562_v40 = vmov 0  }
 0x118   : > { %6532 = vst [vmem:[#allocation72_spill] sm:$0xff] %v4514_v47  ;;  %v4564_v46 = vmov 0   ;;  %v4612_v47 = vmov 0.0  }
 0x119   : > { %6533 = vst [vmem:[#allocation73_spill] sm:$0xff] %v4516_v48  ;;  %v4582_v48 = vmov 0  }
 0x11a   : > { %6534 = vst [vmem:[#allocation74_spill] sm:$0xff] %v4518_v51  ;;  %v4610_v51 = vmov 0.0  }
 0x11b   : > { %6535 = vst [vmem:[#allocation75_spill] sm:$0xff] %v4520_v53  ;;  %v674_v59 = vpop.f32.mrf.mxu2  ;;  %v694_v36 = vpop.f32.mrf.mxu3  ;;  %v4580_v53 = vmov 0  }
 0x11c   : > { %v675_v37 = vadd.f32 %v4315_v35, %v674_v59  ;;  %v695_v52 = vadd.f32 %v4315_v35, %v694_v36  ;;  %v4548_v35 = vmov 0   ;;  %v4568_v59 = vmov 0  }
 0x11d   : > { %v4572_v36 = vmov 0  }
 0x11e   : > { %v4528_v24 = vmul.f32 %v2474_v8, %v675_v37  ;;  %v4530_v30 = vmul.f32 %v2482_v2, %v695_v52  ;;  %v4566_v8 = vmov 0   ;;  %v4570_v2 = vmov 0  }
 0x11f   : > { %v4574_v37 = vmov 0   ;;  %v4576_v52 = vmov 0  }
 0x120   : > { %6536 = vst [vmem:[#allocation76_spill] sm:$0xff] %v4528_v24  ;;  %v4608_v24 = vmov 0.0  }
 0x121   : > { %6537 = vst [vmem:[#allocation77_spill] sm:$0xff] %v4530_v30  ;;  %v4578_v30 = vmov 0  }
 0x122 LB: >> { %6554 = vst [vmem:[#allocation86_spill] sm:$0xff] %v3907_v24  ;;  %v6561_v44 = vld [vmem:[#allocation78_spill] sm:$0xff]  ;;  %v6568_v15 = vld [vmem:[#allocation79_spill] sm:$0xff]  ;;  %v6569_v13 = vld [vmem:[#allocation80_spill] sm:$0xff]  ;;  %s1358_s18 = smul.f32 0.9, %s3775_s8  ;;  %v4031_v29 = vphi %v4670_v29, %v6861_v29   ;;  %v4027_v31 = vphi %v4668_v31, %v6860_v31   ;;  %v4019_v27 = vphi %v4664_v27, %v6751_v27   ;;  %v3991_v9 = vphi %v4650_v9, %v6770_v9   ;;  %v3987_v11 = vphi %v4648_v11, %v6772_v11   ;;  %v3983_v5 = vphi %v4646_v5, %v6851_v5   ;;  %v3979_v7 = vphi %v4644_v7, %v5711_v7   ;;  %v3975_v1 = vphi %v4642_v1, %v5714_v1   ;;  %v3971_v3 = vphi %v4640_v3, %v6778_v3   ;;  %v3967_v49 = vphi %v4638_v49, %v5720_v49   ;;  %v3963_v42 = vphi %v4636_v42, %v5723_v42   ;;  %v3955_v41 = vphi %v4632_v41, %v5729_v41   ;;  %v3951_v54 = vphi %v4630_v54, %v6738_v54   ;;  %v3947_v0 = vphi %v4628_v0, %v5735_v0   ;;  %v3943_v58 = vphi %v4626_v58, %v5738_v58   ;;  %v3939_v12 = vphi %v4624_v12, %v5741_v12   ;;  %v3935_v61 = vphi %v4622_v61, %v6743_v61   ;;  %v3931_v16 = vphi %v4620_v16, %v6791_v16   ;;  %v3927_v14 = vphi %v4618_v14, %v5750_v14   ;;  %v3923_v28 = vphi %v4616_v28, %v5753_v28   ;;  %v3919_v63 = vphi %v4614_v63, %v5756_v63   ;;  %v3915_v47 = vphi %v4612_v47, %v5759_v47   ;;  %v3911_v51 = vphi %v4610_v51, %v5762_v51   ;;  %v3907_v24 = vphi %v4608_v24, %v5899_v24   ;;  %v3903_v50 = vphi %v4606_v50, %v6849_v50   ;;  %v3899_v43 = vphi %v4604_v43, %v6848_v43   ;;  %v3895_v45 = vphi %v4602_v45, %v6847_v45   ;;  %v3891_v38 = vphi %v4600_v38, %v6846_v38   ;;  %v3887_v55 = vphi %v4598_v55, %v6845_v55   ;;  %v3883_v6 = vphi %v4596_v6, %v6844_v6   ;;  %v3879_v60 = vphi %v4594_v60, %v6843_v60   ;;  %v3875_v18 = vphi %v4592_v18, %v6842_v18   ;;  %v3871_v34 = vphi %v4590_v34, %v6841_v34   ;;  %v3867_v22 = vphi %v4588_v22, %v6840_v22   ;;  %v3863_v33 = vphi %v4586_v33, %v6839_v33   ;;  %v3859_v32 = vphi %v4584_v32, %v6838_v32   ;;  %v3855_v48 = vphi %v4582_v48, %v6837_v48   ;;  %v3851_v53 = vphi %v4580_v53, %v6836_v53   ;;  %v3847_v30 = vphi %v4578_v30, %v6835_v30   ;;  %v3843_v52 = vphi %v4576_v52, %v6834_v52   ;;  %v3839_v37 = vphi %v4574_v37, %v6833_v37   ;;  %v3835_v36 = vphi %v4572_v36, %v6832_v36   ;;  %v3831_v2 = vphi %v4570_v2, %v6831_v2   ;;  %v3827_v59 = vphi %v4568_v59, %v6830_v59   ;;  %v3823_v8 = vphi %v4566_v8, %v6829_v8   ;;  %v3819_v46 = vphi %v4564_v46, %v6828_v46   ;;  %v3815_v40 = vphi %v4562_v40, %v6827_v40   ;;  %v3811_v57 = vphi %v4560_v57, %v6826_v57   ;;  %v3807_v39 = vphi %v4558_v39, %v6825_v39   ;;  %v3803_v26 = vphi %v4556_v26, %v6824_v26   ;;  %v3799_v20 = vphi %v4554_v20, %v6823_v20   ;;  %v3795_v4 = vphi %v4552_v4, %v6822_v4   ;;  %v3791_v10 = vphi %v4550_v10, %v6821_v10   ;;  %v3787_v35 = vphi %v4548_v35, %v6820_v35   ;;  %v3783_v56 = vphi %v4546_v56, %v6819_v56   ;;  %v3779_v62 = vphi %v4544_v62, %v6818_v62   ;;  %s3775_s8 = sphi %s4542_s8, %s6817_s8   ;;  %s3771_s7 = sphi %s4540_s7, %s6816_s7   ;;  %s3767_s22 = sphi %s4538_s22, %s6815_s22   ;;  %s3763_s21 = sphi %s4536_s21, %s6814_s21  }
 0x123   : >> { %6555 = vst [vmem:[#allocation87_spill] sm:$0xff] %v3911_v51  ;;  %v6570_v19 = vld [vmem:[#allocation81_spill] sm:$0xff]  ;;  %v6571_v17 = vld [vmem:[#allocation82_spill] sm:$0xff]  ;;  %v6572_v23 = vld [vmem:[#allocation83_spill] sm:$0xff]  ;;  %s1372_s19 = sadd.s32 1, %s3763_s21 }
 0x124   : >> { %6556 = vst [vmem:[#allocation88_spill] sm:$0xff] %v3915_v47  ;;  %v6573_v21 = vld [vmem:[#allocation84_spill] sm:$0xff]  ;;  %v6574_v25 = vld [vmem:[#allocation85_spill] sm:$0xff]  ;;  %v6575_v24 = vld [vmem:[#allocation43_spill] sm:$0xff]  ;;  %p1528_p1 = scmp.lt.s32.totalorder %s1372_s19, 75 }
 0x125   : >> { %6557 = vst [vmem:[#allocation89_spill] sm:$0xff] %v3919_v63  ;;  %v6578_v47 = vld [vmem:[#allocation41_spill] sm:$0xff] }
 0x126   : >> { %6558 = vst [vmem:[#allocation90_spill] sm:$0xff] %v3923_v28 }
 0x127   : >> { %6559 = vst [vmem:[#allocation91_spill] sm:$0xff] %v3927_v14  ;;  %v6582_v14 = vld [vmem:[#allocation33_spill] sm:$0xff] }
 0x128   : >> { %6560 = vst [vmem:[#allocation92_spill] sm:$0xff] %v3931_v16 }
 0x129   : >> { %6562 = vst [vmem:[#allocation78_spill] sm:$0xff] %v3971_v3  ;;  %v6576_v3 = vld [vmem:[#allocation45_spill] sm:$0xff] }
 0x12a   : >> { %6563 = vst [vmem:[#allocation93_spill] sm:$0xff] %v3975_v1  ;;  %v2546_v51 = vor.u32 %v6576_v3, %v6575_v24  ;;  %v6577_v1 = vld [vmem:[#allocation39_spill] sm:$0xff]  ;;  %v6588_v24 = vld [vmem:[#allocation21_spill] sm:$0xff] }
 0x12b   : >> { %6564 = vst [vmem:[#allocation94_spill] sm:$0xff] %v3979_v7  ;;  %v2542_v63 = vor.u32 %v6578_v47, %v6577_v1  ;;  %v6579_v7 = vld [vmem:[#allocation35_spill] sm:$0xff]  ;;  %v6584_v1 = vld [vmem:[#allocation29_spill] sm:$0xff] }
 0x12c   : >> { %6565 = vst [vmem:[#allocation95_spill] sm:$0xff] %v3983_v5  ;;  %949 = vmatpush.bf16.msra.mxu0 %v2546_v51  ;;  %2639 = vmatpush.bf16.msra.mxu2 %v2546_v51  ;;  %v6580_v5 = vld [vmem:[#allocation37_spill] sm:$0xff]  ;;  %v6583_v3 = vld [vmem:[#allocation27_spill] sm:$0xff] }
 0x12d   : >> { %6566 = vst [vmem:[#allocation96_spill] sm:$0xff] %v3987_v11  ;;  %1373 = vmatpush.bf16.msra.mxu1 %v2546_v51  ;;  %2647 = vmatpush.bf16.msra.mxu3 %v2546_v51  ;;  %v2538_v28 = vor.u32 %v6580_v5, %v6579_v7  ;;  %v6581_v11 = vld [vmem:[#allocation31_spill] sm:$0xff]  ;;  %v2530_v47 = vor.u32 %v6584_v1, %v6583_v3  ;;  %v6586_v5 = vld [vmem:[#allocation25_spill] sm:$0xff] }
 0x12e   : >> { %6567 = vst [vmem:[#allocation97_spill] sm:$0xff] %v3991_v9  ;;  %v2534_v9 = vor.u32 %v6582_v14, %v6581_v11  ;;  %v6585_v51 = vld [vmem:[#allocation23_spill] sm:$0xff]  ;;  %v837_v11 = vunpack.c.l.b16 %v3903_v50  ;;  %v854_v14 = vunpack.c.l.b16 %v3835_v36  ;;  %v6590_v1 = vld [vmem:[#allocation17_spill] sm:$0xff]  ;;  %v839_v50 = vunpack.c.l.b16 %v3895_v45 }
 0x12f   : >> { %v2526_v7 = vor.u32 %v6586_v5, %v6585_v51  ;;  %v6589_v3 = vld [vmem:[#allocation15_spill] sm:$0xff]  ;;  %v855_v36 = vunpack.c.l.b16 %v3831_v2  ;;  %v859_v2 = vunpack.c.l.b16 %v3815_v40  ;;  %v863_v40 = vunpack.c.l.b16 %v3799_v20 }
 0x130   : >> { %950 = vmatpush.bf16.msra.mxu0 %v2542_v63  ;;  %2640 = vmatpush.bf16.msra.mxu2 %v2542_v63  ;;  %v867_v20 = vunpack.c.l.b16 %v3783_v56  ;;  %v6593_v56 = vld [vmem:[#allocation50_spill] sm:$0xff] }
 0x131   : >> { %1374 = vmatpush.bf16.msra.mxu1 %v2542_v63  ;;  %2648 = vmatpush.bf16.msra.mxu3 %v2542_v63  ;;  %v6587_v63 = vld [vmem:[#allocation19_spill] sm:$0xff] }
 0x132   : >> { %v2522_v16 = vor.u32 %v6588_v24, %v6587_v63  ;;  %v842_v24 = vunpack.c.l.b16 %v3883_v6  ;;  %v845_v6 = vunpack.c.l.b16 %v3871_v34 }
 0x134   : >> { %951 = vmatpush.bf16.msra.mxu0 %v2538_v28  ;;  %2641 = vmatpush.bf16.msra.mxu2 %v2538_v28 }
 0x135   : >> { %1375 = vmatpush.bf16.msra.mxu1 %v2538_v28  ;;  %2649 = vmatpush.bf16.msra.mxu3 %v2538_v28  ;;  %v838_v28 = vunpack.c.l.b16 %v3899_v43  ;;  %v840_v43 = vunpack.c.l.b16 %v3891_v38  ;;  %v843_v38 = vunpack.c.l.b16 %v3879_v60 }
 0x137   : >> { %v869_v51 = vpack.c.b16 %v838_v28, %v837_v11  ;;  %v857_v11 = vunpack.c.l.b16 %v3823_v8  ;;  %v858_v28 = vunpack.c.l.b16 %v3819_v46  ;;  %v846_v46 = vunpack.c.l.b16 %v3867_v22 }
 0x138   : >> { %952 = vmatpush.bf16.msra.mxu0 %v2534_v9  ;;  %2642 = vmatpush.bf16.msra.mxu2 %v2534_v9  ;;  %v861_v8 = vunpack.c.l.b16 %v3807_v39  ;;  %v849_v22 = vunpack.c.l.b16 %v3855_v48  ;;  %v865_v39 = vunpack.c.l.b16 %v3791_v10  ;;  %v6591_v10 = vld [vmem:[#allocation46_spill] sm:$0xff] }
 0x139   : >> { %1376 = vmatpush.bf16.msra.mxu1 %v2534_v9  ;;  %2650 = vmatpush.bf16.msra.mxu3 %v2534_v9  ;;  %v853_v9 = vunpack.c.l.b16 %v3839_v37  ;;  %v856_v37 = vunpack.c.l.b16 %v3827_v59  ;;  %v879_v45 = vpack.c.b16 %v858_v28, %v857_v11  ;;  %v844_v59 = vunpack.c.l.b16 %v3875_v18 }
 0x13a   : >> { %v847_v18 = vunpack.c.l.b16 %v3863_v33  ;;  %v4928_v28 = vstv %s3767_s22 }
 0x13b   : >> { %v877_v5 = vpack.c.b16 %v854_v14, %v853_v9  ;;  %v878_v63 = vpack.c.b16 %v856_v37, %v855_v36  ;;  %v860_v14 = vunpack.c.l.b16 %v3811_v57  ;;  %v848_v57 = vunpack.c.l.b16 %v3859_v32 }
 0x13c   : >> { %953 = vmatpush.bf16.msra.mxu0 %v2530_v47  ;;  %2643 = vmatpush.bf16.msra.mxu2 %v2530_v47  ;;  %v851_v32 = vunpack.c.l.b16 %v3847_v30  ;;  %v868_v36 = vunpack.c.l.b16 %v3779_v62 }
 0x13d   : >> { %1377 = vmatpush.bf16.msra.mxu1 %v2530_v47  ;;  %2651 = vmatpush.bf16.msra.mxu3 %v2530_v47  ;;  %v2518_v47 = vor.u32 %v6590_v1, %v6589_v3  ;;  %v872_v3 = vpack.c.b16 %v844_v59, %v843_v38  ;;  %v862_v1 = vunpack.c.l.b16 %v3803_v26  ;;  %v850_v26 = vunpack.c.l.b16 %v3851_v53 }
 0x13e   : >> { %v884_v37 = vpack.c.b16 %v868_v36, %v867_v20  ;;  %v6600_v36 = vld [vmem:[#allocation58_spill] sm:$0xff] }
 0x13f   : >> { %v881_v60 = vpack.c.b16 %v862_v1, %v861_v8 }
 0x140   : >> { %954 = vmatpush.bf16.msra.mxu0 %v2526_v7  ;;  %2644 = vmatpush.bf16.msra.mxu2 %v2526_v7 }
 0x141   : >> { %1378 = vmatpush.bf16.msra.mxu1 %v2526_v7  ;;  %2652 = vmatpush.bf16.msra.mxu3 %v2526_v7  ;;  %v870_v7 = vpack.c.b16 %v840_v43, %v839_v50  ;;  %v866_v50 = vunpack.c.l.b16 %v3787_v35  ;;  %v875_v43 = vpack.c.b16 %v850_v26, %v849_v22 }
 0x143   : >> { %v883_v33 = vpack.c.b16 %v866_v50, %v865_v39 }
 0x144   : >> { %955 = vmatpush.bf16.msra.mxu0 %v2522_v16  ;;  %2645 = vmatpush.bf16.msra.mxu2 %v2522_v16 }
 0x145   : >> { %1379 = vmatpush.bf16.msra.mxu1 %v2522_v16  ;;  %2653 = vmatpush.bf16.msra.mxu3 %v2522_v16  ;;  %v841_v16 = vunpack.c.l.b16 %v3887_v55  ;;  %v880_v55 = vpack.c.b16 %v860_v14, %v859_v2 }
 0x147   : >> { %v871_v9 = vpack.c.b16 %v842_v24, %v841_v16  ;;  %v6592_v16 = vld [vmem:[#allocation48_spill] sm:$0xff] }
 0x148   : >> { %956 = vmatpush.bf16.msra.mxu0 %v2518_v47  ;;  %2646 = vmatpush.bf16.msra.mxu2 %v2518_v47 }
 0x149   : >> { %1380 = vmatpush.bf16.msra.mxu1 %v2518_v47  ;;  %2654 = vmatpush.bf16.msra.mxu3 %v2518_v47  ;;  %v873_v47 = vpack.c.b16 %v846_v46, %v845_v6  ;;  %v6594_v6 = vld [vmem:[#allocation52_spill] sm:$0xff] }
 0x14b   : >> { %957 = vmatmul.bf16.vlgmr.msra.gmra.mxu0 %v869_v51  ;;  %997 = vmatmul.bf16.vlgmr.msra.gmra.mxu2 %v877_v5  ;;  %v864_v51 = vunpack.c.l.b16 %v3795_v4  ;;  %v874_v5 = vpack.c.b16 %v848_v57, %v847_v18  ;;  %v852_v4 = vunpack.c.l.b16 %v3843_v52 }
 0x14d   : >> { %v882_v34 = vpack.c.b16 %v864_v51, %v863_v40  ;;  %v876_v48 = vpack.c.b16 %v852_v4, %v851_v32  ;;  %v6597_v40 = vld [vmem:[#allocation54_spill] sm:$0xff] }
 0x15b   : >> { %962 = vmatmul.bf16.gmra.mxu0 %v870_v7  ;;  %1002 = vmatmul.bf16.gmra.mxu2 %v878_v63 }
 0x16b   : >> { %967 = vmatmul.bf16.gmra.mxu0 %v871_v9  ;;  %1007 = vmatmul.bf16.gmra.mxu2 %v879_v45 }
 0x17b   : >> { %972 = vmatmul.bf16.gmra.mxu0 %v872_v3  ;;  %1012 = vmatmul.bf16.gmra.mxu2 %v880_v55 }
 0x18b   : >> { %977 = vmatmul.bf16.gmra.mxu0 %v873_v47  ;;  %1017 = vmatmul.bf16.gmra.mxu2 %v881_v60 }
 0x19b   : >> { %982 = vmatmul.bf16.gmra.mxu0 %v874_v5  ;;  %1022 = vmatmul.bf16.gmra.mxu2 %v882_v34 }
 0x1ab   : >> { %987 = vmatmul.bf16.gmra.mxu0 %v875_v43  ;;  %1027 = vmatmul.bf16.gmra.mxu2 %v883_v33  ;;  %v6599_v43 = vld [vmem:[#allocation56_spill] sm:$0xff] }
 0x1bb   : >> { %992 = vmatmul.bf16.gmra.mxu0 %v876_v48  ;;  %1032 = vmatmul.bf16.gmra.mxu2 %v884_v37 }
 0x1c8   : >> { %v958_v53 = vpop.f32.mrf.mxu0 }
 0x1c9   : >> { %v959_v35 = vadd.f32 %v958_v53, %v6591_v10 }
 0x1cb   : >> { %v1038_v7 = vmax.f32 %v959_v35, 0.0 }
 0x1cd   : >> { %v1070_v11 = vsub.f32 %v1038_v7, %v4031_v29 }
 0x1ce   : >> { %v998_v63 = vpop.f32.mrf.mxu2 }
 0x1cf   : >> { %v999_v24 = vadd.f32 %v998_v63, %v6592_v16  ;;  %v1103_v45 = vmul.f32 %v4928_v28, %v1070_v11  ;;  %v1183_v14 = vmul.f32 %v1070_v11, %v1070_v11  ;;  %v6634_v16 = vld [vmem:[#allocation59_spill] sm:$0xff] }
 0x1d0   : >> { %v960_v30 = vpop.f32.mrf.mxu0 }
 0x1d1   : >> { %v1054_v52 = vmax.f32 %v999_v24, 0.0  ;;  %v961_v9 = vadd.f32 %v960_v30, %v6593_v56  ;;  %v4939_v8 = vadd.f32 %v4031_v29, %v1103_v45  ;;  %v6601_v30 = vld [vmem:[#allocation60_spill] sm:$0xff] }
 0x1d3   : >> { %v1039_v62 = vmax.f32 %v961_v9, 0.0  ;;  %v4933_v38 = vsub.f32 %v1054_v52, %v3967_v49  ;;  %6595 = vst [vmem:[#allocation79_spill] sm:$0xff] %v4939_v8 }
 0x1d5   : >> { %v1071_v59 = vsub.f32 %v1039_v62, %v4027_v31  ;;  %v1119_v47 = vmul.f32 %v4928_v28, %v4933_v38 }
 0x1d6   : >> { %v1000_v2 = vpop.f32.mrf.mxu2 }
 0x1d7   : >> { %v1104_v3 = vmul.f32 %v4928_v28, %v1071_v59  ;;  %v1184_v55 = vmul.f32 %v1071_v59, %v1071_v59  ;;  %v1001_v46 = vadd.f32 %v1000_v2, %v6594_v6  ;;  %v4953_v29 = vadd.f32 %v3967_v49, %v1119_v47 }
 0x1d8   : >> { %v963_v1 = vpop.f32.mrf.mxu0 }
 0x1d9   : >> { %v4944_v60 = vadd.f32 %v4027_v31, %v1104_v3  ;;  %v1215_v18 = vadd.f32 %v1184_v55, %v1183_v14  ;;  %v1055_v57 = vmax.f32 %v1001_v46, 0.0  ;;  %v964_v51 = vadd.f32 %v963_v1, %v6597_v40  ;;  %6598 = vst [vmem:[#allocation81_spill] sm:$0xff] %v4953_v29  ;;  %v6604_v3 = vld [vmem:[#allocation62_spill] sm:$0xff] }
 0x1db   : >> { %6596 = vst [vmem:[#allocation80_spill] sm:$0xff] %v4944_v60  ;;  %v4948_v5 = vsub.f32 %v1055_v57, %v3963_v42  ;;  %v1167_v34 = vpack.c.bf16 %v4944_v60, %v4939_v8  ;;  %v1040_v22 = vmax.f32 %v964_v51, 0.0  ;;  %v6607_v51 = vld [vmem:[#allocation64_spill] sm:$0xff] }
 0x1dd   : >> { %v1120_v26 = vmul.f32 %v4928_v28, %v4948_v5  ;;  %1381 = vmatmul.bf16.vlgmr.msra.gmra.mxu1 %v1167_v34  ;;  %v1072_v31 = vsub.f32 %v1040_v22, %v6574_v25 }
 0x1de   : >> { %v1003_v39 = vpop.f32.mrf.mxu2 }
 0x1df   : >> { %v4959_v50 = vadd.f32 %v3963_v42, %v1120_v26  ;;  %v1004_v33 = vadd.f32 %v1003_v39, %v6599_v43  ;;  %v1185_v32 = vmul.f32 %v1072_v31, %v1072_v31  ;;  %v1105_v35 = vmul.f32 %v4928_v28, %v1072_v31  ;;  %v6608_v39 = vld [vmem:[#allocation66_spill] sm:$0xff] }
 0x1e0   : >> { %v965_v4 = vpop.f32.mrf.mxu0 }
 0x1e1   : >> { %v1056_v20 = vmax.f32 %v1004_v33, 0.0  ;;  %v966_v48 = vadd.f32 %v965_v4, %v6600_v36  ;;  %v1175_v49 = vpack.c.bf16 %v4959_v50, %v4953_v29  ;;  %v1216_v37 = vadd.f32 %v1215_v18, %v1185_v32 }
 0x1e2   : >> { %v4973_v9 = vadd.f32 %v6574_v25, %v1105_v35 }
 0x1e3   : >> { %v1041_v53 = vmax.f32 %v966_v48, 0.0  ;;  %1421 = vmatmul.bf16.vlgmr.msra.gmra.mxu3 %v1175_v49  ;;  %v4967_v7 = vsub.f32 %v1056_v20, %v6561_v44 }
 0x1e4   : >> { %6602 = vst [vmem:[#allocation82_spill] sm:$0xff] %v4973_v9 }
 0x1e5   : >> { %v1073_v42 = vsub.f32 %v1041_v53, %v4019_v27  ;;  %v1121_v45 = vmul.f32 %v4928_v28, %v4967_v7 }
 0x1e6   : >> { %v1005_v63 = vpop.f32.mrf.mxu2 }
 0x1e7   : >> { %v1106_v24 = vmul.f32 %v4928_v28, %v1073_v42  ;;  %v1186_v11 = vmul.f32 %v1073_v42, %v1073_v42  ;;  %v1006_v52 = vadd.f32 %v1005_v63, %v6601_v30  ;;  %v4989_v25 = vadd.f32 %v6561_v44, %v1121_v45 }
 0x1e8   : >> { %v968_v62 = vpop.f32.mrf.mxu0 }
 0x1e9   : >> { %v4978_v59 = vadd.f32 %v4019_v27, %v1106_v24  ;;  %v4980_v2 = vadd.f32 %v1216_v37, %v1186_v11  ;;  %v1057_v14 = vmax.f32 %v1006_v52, 0.0  ;;  %v969_v55 = vadd.f32 %v968_v62, %v6604_v3  ;;  %6605 = vst [vmem:[#allocation84_spill] sm:$0xff] %v4989_v25  ;;  %v6609_v37 = vld [vmem:[#allocation68_spill] sm:$0xff]  ;;  %v6612_v52 = vld [vmem:[#allocation70_spill] sm:$0xff] }
 0x1eb   : >> { %6603 = vst [vmem:[#allocation83_spill] sm:$0xff] %v4978_v59  ;;  %v4984_v46 = vsub.f32 %v1057_v14, %v3955_v41  ;;  %v1168_v1 = vpack.c.bf16 %v4978_v59, %v4973_v9  ;;  %v1042_v18 = vmax.f32 %v969_v55, 0.0 }
 0x1ed   : >> { %v1122_v47 = vmul.f32 %v4928_v28, %v4984_v46  ;;  %1386 = vmatmul.bf16.gmra.mxu1 %v1168_v1  ;;  %v4998_v26 = vsub.f32 %v1042_v18, %v6573_v21  ;;  %v6615_v18 = vld [vmem:[#allocation72_spill] sm:$0xff] }
 0x1ee   : >> { %v1008_v27 = vpop.f32.mrf.mxu2 }
 0x1ef   : >> { %v4994_v57 = vadd.f32 %v3955_v41, %v1122_v47  ;;  %v1009_v34 = vadd.f32 %v1008_v27, %v6607_v51  ;;  %v1107_v4 = vmul.f32 %v4928_v28, %v4998_v26 }
 0x1f0   : >> { %v970_v22 = vpop.f32.mrf.mxu0 }
 0x1f1   : >> { %6606 = vst [vmem:[#allocation85_spill] sm:$0xff] %v4994_v57  ;;  %v1058_v31 = vmax.f32 %v1009_v34, 0.0  ;;  %v971_v33 = vadd.f32 %v970_v22, %v6608_v39  ;;  %v1176_v44 = vpack.c.bf16 %v4994_v57, %v4989_v25  ;;  %v5015_v42 = vadd.f32 %v6573_v21, %v1107_v4  ;;  %v6641_v39 = vld [vmem:[#allocation90_spill] sm:$0xff] }
 0x1f3   : >> { %v1043_v32 = vmax.f32 %v971_v33, 0.0  ;;  %1426 = vmatmul.bf16.gmra.mxu3 %v1176_v44  ;;  %v5006_v41 = vsub.f32 %v1058_v31, %v3951_v54  ;;  %6610 = vst [vmem:[#allocation98_spill] sm:$0xff] %v5015_v42  ;;  %v6616_v33 = vld [vmem:[#allocation74_spill] sm:$0xff] }
 0x1f5   : >> { %v5009_v20 = vsub.f32 %v1043_v32, %v6572_v23  ;;  %v1123_v63 = vmul.f32 %v4928_v28, %v5006_v41 }
 0x1f6   : >> { %v1010_v48 = vpop.f32.mrf.mxu2 }
 0x1f7   : >> { %v1108_v49 = vmul.f32 %v4928_v28, %v5009_v20  ;;  %v1011_v53 = vadd.f32 %v1010_v48, %v6609_v37  ;;  %v5029_v55 = vadd.f32 %v3951_v54, %v1123_v63  ;;  %v6629_v37 = vld [vmem:[#allocation92_spill] sm:$0xff] }
 0x1f8   : >> { %v973_v35 = vpop.f32.mrf.mxu0 }
 0x1f9   : >> { %v5020_v24 = vadd.f32 %v6572_v23, %v1108_v49  ;;  %v1059_v11 = vmax.f32 %v1011_v53, 0.0  ;;  %v974_v62 = vadd.f32 %v973_v35, %v6612_v52  ;;  %6613 = vst [vmem:[#allocation100_spill] sm:$0xff] %v5029_v55  ;;  %v6617_v35 = vld [vmem:[#allocation76_spill] sm:$0xff] }
 0x1fb   : >> { %6611 = vst [vmem:[#allocation99_spill] sm:$0xff] %v5020_v24  ;;  %v5024_v45 = vsub.f32 %v1059_v11, %v3947_v0  ;;  %v1169_v14 = vpack.c.bf16 %v5020_v24, %v5015_v42  ;;  %v1044_v1 = vmax.f32 %v974_v62, 0.0 }
 0x1fd   : >> { %v1124_v21 = vmul.f32 %v4928_v28, %v5024_v45  ;;  %1391 = vmatmul.bf16.gmra.mxu1 %v1169_v14  ;;  %v5038_v22 = vsub.f32 %v1044_v1, %v6571_v17 }
 0x1fe   : >> { %v1013_v47 = vpop.f32.mrf.mxu2 }
 0x1ff   : >> { %v5034_v23 = vadd.f32 %v3947_v0, %v1124_v21  ;;  %v1014_v27 = vadd.f32 %v1013_v47, %v6615_v18  ;;  %v1109_v4 = vmul.f32 %v4928_v28, %v5038_v22  ;;  %v6620_v47 = vld [vmem:[#allocation47_spill] sm:$0xff] }
 0x200   : >> { %v975_v34 = vpop.f32.mrf.mxu0  ;;  %v6628_v18 = vld [vmem:[#allocation55_spill] sm:$0xff] }
 0x201   : >> { %6614 = vst [vmem:[#allocation101_spill] sm:$0xff] %v5034_v23  ;;  %v1060_v31 = vmax.f32 %v1014_v27, 0.0  ;;  %v976_v44 = vadd.f32 %v975_v34, %v6616_v33  ;;  %v1177_v54 = vpack.c.bf16 %v5034_v23, %v5029_v55  ;;  %v5055_v62 = vadd.f32 %v6571_v17, %v1109_v4  ;;  %v6623_v4 = vld [vmem:[#allocation49_spill] sm:$0xff] }
 0x203   : >> { %v1045_v32 = vmax.f32 %v976_v44, 0.0  ;;  %1431 = vmatmul.bf16.gmra.mxu3 %v1177_v54  ;;  %v5046_v0 = vsub.f32 %v1060_v31, %v3943_v58  ;;  %6618 = vst [vmem:[#allocation102_spill] sm:$0xff] %v5055_v62 }
 0x205   : >> { %v5049_v48 = vsub.f32 %v1045_v32, %v6570_v19  ;;  %v1125_v14 = vmul.f32 %v4928_v28, %v5046_v0 }
 0x206   : >> { %v1015_v49 = vpop.f32.mrf.mxu2 }
 0x207   : >> { %v1110_v53 = vmul.f32 %v4928_v28, %v5049_v48  ;;  %v1016_v63 = vadd.f32 %v1015_v49, %v6617_v35  ;;  %v5069_v44 = vadd.f32 %v3943_v58, %v1125_v14 }
 0x208   : >> { %v978_v11 = vpop.f32.mrf.mxu0 }
 0x209   : >> { %v5060_v21 = vadd.f32 %v6570_v19, %v1110_v53  ;;  %v1061_v1 = vmax.f32 %v1016_v63, 0.0  ;;  %v979_v27 = vadd.f32 %v978_v11, %v6620_v47  ;;  %6621 = vst [vmem:[#allocation104_spill] sm:$0xff] %v5069_v44 }
 0x20b   : >> { %6619 = vst [vmem:[#allocation103_spill] sm:$0xff] %v5060_v21  ;;  %v5064_v34 = vsub.f32 %v1061_v1, %v3939_v12  ;;  %v1170_v31 = vpack.c.bf16 %v5060_v21, %v5055_v62  ;;  %v1046_v54 = vmax.f32 %v979_v27, 0.0  ;;  %v6624_v1 = vld [vmem:[#allocation51_spill] sm:$0xff] }
 0x20d   : >> { %v1126_v17 = vmul.f32 %v4928_v28, %v5064_v34  ;;  %1396 = vmatmul.bf16.gmra.mxu1 %v1170_v31  ;;  %v5078_v63 = vsub.f32 %v1046_v54, %v6569_v13 }
 0x20e   : >> { %v1018_v32 = vpop.f32.mrf.mxu2 }
 0x20f   : >> { %v5074_v19 = vadd.f32 %v3939_v12, %v1126_v17  ;;  %v1019_v49 = vadd.f32 %v1018_v32, %v6623_v4  ;;  %v1111_v27 = vmul.f32 %v4928_v28, %v5078_v63  ;;  %v6625_v32 = vld [vmem:[#allocation53_spill] sm:$0xff] }
 0x210   : >> { %v980_v53 = vpop.f32.mrf.mxu0 }
 0x211   : >> { %6622 = vst [vmem:[#allocation105_spill] sm:$0xff] %v5074_v19  ;;  %v1062_v11 = vmax.f32 %v1019_v49, 0.0  ;;  %v981_v35 = vadd.f32 %v980_v53, %v6624_v1  ;;  %v1178_v58 = vpack.c.bf16 %v5074_v19, %v5069_v44  ;;  %v5095_v4 = vadd.f32 %v6569_v13, %v1111_v27 }
 0x213   : >> { %v1047_v14 = vmax.f32 %v981_v35, 0.0  ;;  %1436 = vmatmul.bf16.gmra.mxu3 %v1178_v58  ;;  %v5086_v12 = vsub.f32 %v1062_v11, %v3935_v61  ;;  %6626 = vst [vmem:[#allocation106_spill] sm:$0xff] %v5095_v4 }
 0x215   : >> { %v5089_v31 = vsub.f32 %v1047_v14, %v6568_v15  ;;  %v1127_v35 = vmul.f32 %v4928_v28, %v5086_v12 }
 0x216   : >> { %v1020_v17 = vpop.f32.mrf.mxu2 }
 0x217   : >> { %v1112_v54 = vmul.f32 %v4928_v28, %v5089_v31  ;;  %v1021_v49 = vadd.f32 %v1020_v17, %v6625_v32  ;;  %v5109_v17 = vadd.f32 %v3935_v61, %v1127_v35 }
 0x218   : >> { %v983_v53 = vpop.f32.mrf.mxu0 }
 0x219   : >> { %v5100_v58 = vadd.f32 %v6568_v15, %v1112_v54  ;;  %v1063_v11 = vmax.f32 %v1021_v49, 0.0  ;;  %v984_v14 = vadd.f32 %v983_v53, %v6628_v18  ;;  %6630 = vst [vmem:[#allocation92_spill] sm:$0xff] %v5109_v17  ;;  %v6632_v54 = vld [vmem:[#allocation57_spill] sm:$0xff] }
 0x21b   : >> { %6627 = vst [vmem:[#allocation107_spill] sm:$0xff] %v5100_v58  ;;  %v5104_v51 = vsub.f32 %v1063_v11, %v6629_v37  ;;  %v1171_v30 = vpack.c.bf16 %v5100_v58, %v5095_v4  ;;  %v1048_v27 = vmax.f32 %v984_v14, 0.0  ;;  %v6633_v11 = vld [vmem:[#allocation97_spill] sm:$0xff]  ;;  %v6635_v14 = vld [vmem:[#allocation91_spill] sm:$0xff] }
 0x21d   : >> { %v1128_v13 = vmul.f32 %v4928_v28, %v5104_v51  ;;  %1401 = vmatmul.bf16.gmra.mxu1 %v1171_v30  ;;  %v5118_v43 = vsub.f32 %v1048_v27, %v6633_v11  ;;  %v1271_v27 = vmul.f32 %v4944_v60, %v4944_v60 }
 0x21e   : >> { %v1023_v32 = vpop.f32.mrf.mxu2 }
 0x21f   : >> { %v5114_v15 = vadd.f32 %v6629_v37, %v1128_v13  ;;  %v1024_v49 = vadd.f32 %v1023_v32, %v6632_v54  ;;  %v1113_v30 = vmul.f32 %v4928_v28, %v5118_v43  ;;  %v6636_v13 = vld [vmem:[#allocation96_spill] sm:$0xff]  ;;  %v6637_v54 = vld [vmem:[#allocation61_spill] sm:$0xff] }
 0x220   : >> { %v985_v53 = vpop.f32.mrf.mxu0 }
 0x221   : >> { %6631 = vst [vmem:[#allocation108_spill] sm:$0xff] %v5114_v15  ;;  %v1064_v6 = vmax.f32 %v1024_v49, 0.0  ;;  %v986_v18 = vadd.f32 %v985_v53, %v6634_v16  ;;  %v1179_v61 = vpack.c.bf16 %v5114_v15, %v5109_v17  ;;  %v5141_v1 = vadd.f32 %v6633_v11, %v1113_v30 }
 0x223   : >> { %v1049_v35 = vmax.f32 %v986_v18, 0.0  ;;  %1441 = vmatmul.bf16.gmra.mxu3 %v1179_v61  ;;  %v5126_v37 = vsub.f32 %v1064_v6, %v6635_v14  ;;  %v1270_v18 = vmul.f32 %v4939_v8, %v4939_v8  ;;  %v1272_v61 = vmul.f32 %v4973_v9, %v4973_v9  ;;  %6638 = vst [vmem:[#allocation97_spill] sm:$0xff] %v5141_v1 }
 0x224   : >> { %v1187_v9 = vmul.f32 %v4998_v26, %v4998_v26 }
 0x225   : >> { %v5129_v32 = vsub.f32 %v1049_v35, %v6636_v13  ;;  %v1129_v35 = vmul.f32 %v4928_v28, %v5126_v37  ;;  %v1302_v52 = vadd.f32 %v1271_v27, %v1270_v18  ;;  %v1188_v18 = vmul.f32 %v5009_v20, %v5009_v20  ;;  %v6643_v20 = vld [vmem:[#allocation95_spill] sm:$0xff] }
 0x226   : >> { %v1025_v49 = vpop.f32.mrf.mxu2 }
 0x227   : >> { %v1114_v53 = vmul.f32 %v4928_v28, %v5129_v32  ;;  %v1026_v16 = vadd.f32 %v1025_v49, %v6637_v54  ;;  %v1273_v49 = vmul.f32 %v4978_v59, %v4978_v59  ;;  %v6640_v54 = vld [vmem:[#allocation63_spill] sm:$0xff]  ;;  %v1303_v30 = vadd.f32 %v1302_v52, %v1272_v61  ;;  %v6642_v61 = vld [vmem:[#allocation65_spill] sm:$0xff] }
 0x228   : >> { %v988_v6 = vpop.f32.mrf.mxu0  ;;  %v1275_v52 = vmul.f32 %v5020_v24, %v5020_v24 }
 0x229   : >> { %v5146_v47 = vadd.f32 %v6636_v13, %v1114_v53  ;;  %v1065_v33 = vmax.f32 %v1026_v16, 0.0  ;;  %v989_v8 = vadd.f32 %v988_v6, %v6640_v54  ;;  %v1274_v13 = vmul.f32 %v5015_v42, %v5015_v42  ;;  %v6644_v42 = vld [vmem:[#allocation67_spill] sm:$0xff] }
 0x22a   : >> { %v5161_v16 = vadd.f32 %v6635_v14, %v1129_v35  ;;  %v1218_v14 = vadd.f32 %v4980_v2, %v1187_v9 }
 0x22b   : >> { %6639 = vst [vmem:[#allocation91_spill] sm:$0xff] %v5146_v47  ;;  %v5152_v60 = vsub.f32 %v1065_v33, %v6641_v39  ;;  %v1172_v11 = vpack.c.bf16 %v5146_v47, %v5141_v1  ;;  %v1050_v53 = vmax.f32 %v989_v8, 0.0  ;;  %v1304_v33 = vadd.f32 %v1303_v30, %v1273_v49 }
 0x22c   : >> { %v1189_v8 = vmul.f32 %v5038_v22, %v5038_v22  ;;  %v1276_v49 = vmul.f32 %v5055_v62, %v5055_v62  ;;  %v1277_v22 = vmul.f32 %v5060_v21, %v5060_v21 }
 0x22d   : >> { %v1130_v27 = vmul.f32 %v4928_v28, %v5152_v60  ;;  %1406 = vmatmul.bf16.gmra.mxu1 %v1172_v11  ;;  %v1305_v35 = vadd.f32 %v1304_v33, %v1274_v13  ;;  %v1082_v30 = vsub.f32 %v1050_v53, %v6643_v20  ;;  %v1191_v53 = vmul.f32 %v5078_v63, %v5078_v63 }
 0x22e   : >> { %v1028_v6 = vpop.f32.mrf.mxu2  ;;  %v1192_v63 = vmul.f32 %v5089_v31, %v5089_v31  ;;  %v6651_v31 = vld [vmem:[#allocation88_spill] sm:$0xff] }
 0x22f   : >> { %v5170_v26 = vadd.f32 %v6641_v39, %v1130_v27  ;;  %v1029_v54 = vadd.f32 %v1028_v6, %v6642_v61  ;;  %v1219_v27 = vadd.f32 %v1218_v14, %v1188_v18  ;;  %v1190_v6 = vmul.f32 %v5049_v48, %v5049_v48  ;;  %v6646_v14 = vld [vmem:[#allocation89_spill] sm:$0xff] }
 0x230   : >> { %v990_v11 = vpop.f32.mrf.mxu0  ;;  %v1306_v2 = vadd.f32 %v1305_v35, %v1275_v52  ;;  %v6647_v35 = vld [vmem:[#allocation69_spill] sm:$0xff] }
 0x231   : >> { %v991_v59 = vadd.f32 %v990_v11, %v6644_v42  ;;  %v1180_v39 = vpack.c.bf16 %v5170_v26, %v5161_v16  ;;  %v1066_v9 = vmax.f32 %v1029_v54, 0.0  ;;  %v1220_v33 = vadd.f32 %v1219_v27, %v1189_v8  ;;  %v6645_v42 = vld [vmem:[#allocation94_spill] sm:$0xff] }
 0x232   : >> { %v1307_v61 = vadd.f32 %v1306_v2, %v1276_v49  ;;  %v1115_v11 = vmul.f32 %v4928_v28, %v1082_v30  ;;  %v1278_v8 = vmul.f32 %v5095_v4, %v5095_v4 }
 0x233   : >> { %v1051_v13 = vmax.f32 %v991_v59, 0.0  ;;  %1446 = vmatmul.bf16.gmra.mxu3 %v1180_v39  ;;  %v1221_v18 = vadd.f32 %v1220_v33, %v1190_v6  ;;  %v5191_v24 = vsub.f32 %v1066_v9, %v6646_v14 }
 0x234   : >> { %v1308_v54 = vadd.f32 %v1307_v61, %v1277_v22  ;;  %v5200_v27 = vadd.f32 %v6643_v20, %v1115_v11  ;;  %v6650_v61 = vld [vmem:[#allocation71_spill] sm:$0xff]  ;;  %v1279_v22 = vmul.f32 %v5100_v58, %v5100_v58  ;;  %v1281_v58 = vmul.f32 %v5146_v47, %v5146_v47 }
 0x235   : >> { %v1083_v62 = vsub.f32 %v1051_v13, %v6645_v42  ;;  %v1222_v39 = vadd.f32 %v1221_v18, %v1191_v53  ;;  %v1193_v13 = vmul.f32 %v5118_v43, %v5118_v43  ;;  %v1131_v33 = vmul.f32 %v4928_v28, %v5191_v24 }
 0x236   : >> { %v1030_v48 = vpop.f32.mrf.mxu2  ;;  %6648 = vst [vmem:[#allocation96_spill] sm:$0xff] %v5200_v27  ;;  %v1309_v11 = vadd.f32 %v1308_v54, %v1278_v8  ;;  %v1195_v54 = vmul.f32 %v1082_v30, %v1082_v30  ;;  %v1282_v30 = vmul.f32 %v5200_v27, %v5200_v27 }
 0x237   : >> { %v1116_v52 = vmul.f32 %v4928_v28, %v1083_v62  ;;  %v1031_v59 = vadd.f32 %v1030_v48, %v6647_v35  ;;  %v1223_v18 = vadd.f32 %v1222_v39, %v1192_v63  ;;  %v1280_v48 = vmul.f32 %v5141_v1, %v5141_v1  ;;  %v6653_v63 = vld [vmem:[#allocation73_spill] sm:$0xff] }
 0x238   : >> { %v993_v49 = vpop.f32.mrf.mxu0 }
 0x239   : >> { %v5203_v6 = vadd.f32 %v6645_v42, %v1116_v52  ;;  %v1067_v9 = vmax.f32 %v1031_v59, 0.0  ;;  %v994_v2 = vadd.f32 %v993_v49, %v6650_v61  ;;  %v1194_v52 = vmul.f32 %v5129_v32, %v5129_v32  ;;  %v6652_v59 = vld [vmem:[#allocation93_spill] sm:$0xff] }
 0x23a   : >> { %v1224_v35 = vadd.f32 %v1223_v18, %v1193_v13 }
 0x23b   : >> { %6649 = vst [vmem:[#allocation90_spill] sm:$0xff] %v5203_v6  ;;  %v5213_v53 = vsub.f32 %v1067_v9, %v6651_v31  ;;  %v1052_v20 = vmax.f32 %v994_v2, 0.0  ;;  %v1173_v42 = vpack.c.bf16 %v5203_v6, %v5200_v27  ;;  %v1310_v9 = vadd.f32 %v1309_v11, %v1279_v22  ;;  %v6654_v11 = vld [vmem:[#allocation75_spill] sm:$0xff] }
 0x23c   : >> { %v5225_v2 = vadd.f32 %v6646_v14, %v1131_v33  ;;  %v1196_v22 = vmul.f32 %v1083_v62, %v1083_v62 }
 0x23d   : >> { %v1132_v43 = vmul.f32 %v4928_v28, %v5213_v53  ;;  %v1084_v49 = vsub.f32 %v1052_v20, %v6652_v59  ;;  %1411 = vmatmul.bf16.gmra.mxu1 %v1173_v42  ;;  %v1311_v1 = vadd.f32 %v1310_v9, %v1280_v48  ;;  %v1225_v42 = vadd.f32 %v1224_v35, %v1194_v52  ;;  %v6656_v52 = vld [vmem:[#allocation87_spill] sm:$0xff] }
 0x23e   : >> { %v1033_v61 = vpop.f32.mrf.mxu2  ;;  %v1283_v35 = vmul.f32 %v5203_v6, %v5203_v6 }
 0x23f   : >> { %v5228_v39 = vadd.f32 %v6651_v31, %v1132_v43  ;;  %v1117_v8 = vmul.f32 %v4928_v28, %v1084_v49  ;;  %v1034_v32 = vadd.f32 %v1033_v61, %v6653_v63  ;;  %v1226_v61 = vadd.f32 %v1225_v42, %v1195_v54 }
 0x240   : >> { %v995_v20 = vpop.f32.mrf.mxu0  ;;  %v1197_v18 = vmul.f32 %v1084_v49, %v1084_v49  ;;  %v1312_v43 = vadd.f32 %v1311_v1, %v1281_v58  ;;  %v6658_v1 = vld [vmem:[#allocation77_spill] sm:$0xff]  ;;  %v1199_v42 = vmul.f32 %v4933_v38, %v4933_v38 }
 0x241   : >> { %v1068_v13 = vmax.f32 %v1034_v32, 0.0  ;;  %v996_v14 = vadd.f32 %v995_v20, %v6654_v11  ;;  %v5238_v33 = vadd.f32 %v6652_v59, %v1117_v8  ;;  %v1181_v31 = vpack.c.bf16 %v5228_v39, %v5225_v2  ;;  %v6657_v32 = vld [vmem:[#allocation78_spill] sm:$0xff] }
 0x242   : >> { %v1227_v62 = vadd.f32 %v1226_v61, %v1196_v22  ;;  %v1313_v63 = vadd.f32 %v1312_v43, %v1282_v30  ;;  %v1200_v61 = vmul.f32 %v4948_v5, %v4948_v5 }
 0x243   : >> { %6655 = vst [vmem:[#allocation95_spill] sm:$0xff] %v5238_v33  ;;  %v1053_v48 = vmax.f32 %v996_v14, 0.0  ;;  %1451 = vmatmul.bf16.gmra.mxu3 %v1181_v31  ;;  %v5245_v9 = vsub.f32 %v1068_v13, %v6656_v52  ;;  %v1284_v59 = vmul.f32 %v5238_v33, %v5238_v33 }
 0x244   : >> { %v1228_v11 = vadd.f32 %v1227_v62, %v1197_v18  ;;  %v1314_v22 = vadd.f32 %v1313_v63, %v1283_v35  ;;  %v6659_v62 = vld [vmem:[#allocation86_spill] sm:$0xff]  ;;  %v1286_v63 = vmul.f32 %v4953_v29, %v4953_v29 }
 0x245   : >> { %v1085_v20 = vsub.f32 %v1053_v48, %v6657_v32  ;;  %v1133_v13 = vmul.f32 %v4928_v28, %v5245_v9 }
 0x246   : >> { %v1035_v8 = vpop.f32.mrf.mxu2  ;;  %v1315_v18 = vadd.f32 %v1314_v22, %v1284_v59 }
 0x247   : >> { %v1118_v49 = vmul.f32 %v4928_v28, %v1085_v20  ;;  %v1198_v54 = vmul.f32 %v1085_v20, %v1085_v20  ;;  %v1036_v58 = vadd.f32 %v1035_v8, %v6658_v1  ;;  %v5271_v35 = vadd.f32 %v6656_v52, %v1133_v13 }
 0x248   : >> { %v1287_v8 = vmul.f32 %v4959_v50, %v4959_v50  ;;  %v1203_v52 = vmul.f32 %v5006_v41, %v5006_v41  ;;  %v1205_v41 = vmul.f32 %v5046_v0, %v5046_v0  ;;  %v1293_v0 = vmul.f32 %v5074_v19, %v5074_v19 }
 0x249   : >> { %v5257_v14 = vadd.f32 %v6657_v32, %v1118_v49  ;;  %v1229_v30 = vadd.f32 %v1228_v11, %v1198_v54  ;;  %v1069_v31 = vmax.f32 %v1036_v58, 0.0  ;;  %v1201_v11 = vmul.f32 %v4967_v7, %v4967_v7 }
 0x24a   : >> { %v1202_v49 = vmul.f32 %v4984_v46, %v4984_v46  ;;  %v1288_v7 = vmul.f32 %v4989_v25, %v4989_v25  ;;  %v1204_v46 = vmul.f32 %v5024_v45, %v5024_v45  ;;  %v1292_v45 = vmul.f32 %v5069_v44, %v5069_v44 }
 0x24b   : >> { %v1230_v48 = vadd.f32 %v1229_v30, %v1199_v42  ;;  %v1285_v43 = vmul.f32 %v5257_v14, %v5257_v14  ;;  %v1101_v20 = vsub.f32 %v1069_v31, %v6659_v62  ;;  %v1174_v38 = vpack.c.bf16 %v5257_v14, %v5238_v33 }
 0x24c   : >> { %v1289_v30 = vmul.f32 %v4994_v57, %v4994_v57 }
 0x24d   : >> { %v1231_v5 = vadd.f32 %v1230_v48, %v1200_v61  ;;  %v1316_v32 = vadd.f32 %v1315_v18, %v1285_v43  ;;  %v1134_v59 = vmul.f32 %v4928_v28, %v1101_v20  ;;  %1416 = vmatmul.bf16.gmra.mxu1 %v1174_v38  ;;  %v1290_v18 = vmul.f32 %v5029_v55, %v5029_v55 }
 0x24e   : >> { %v1206_v38 = vmul.f32 %v5064_v34, %v5064_v34  ;;  %v1294_v34 = vmul.f32 %v5109_v17, %v5109_v17 }
 0x24f   : >> { %v1232_v54 = vadd.f32 %v1231_v5, %v1201_v11  ;;  %v1317_v58 = vadd.f32 %v1316_v32, %v1286_v63  ;;  %v5279_v42 = vadd.f32 %v6659_v62, %v1134_v59  ;;  %v1291_v62 = vmul.f32 %v5034_v23, %v5034_v23 }
 0x250   : >> { %v1207_v5 = vmul.f32 %v5086_v12, %v5086_v12  ;;  %v1295_v12 = vmul.f32 %v5114_v15, %v5114_v15 }
 0x251   : >> { %6660 = vst [vmem:[#allocation78_spill] sm:$0xff] %v5279_v42  ;;  %v1233_v22 = vadd.f32 %v1232_v54, %v1202_v49  ;;  %v1318_v28 = vadd.f32 %v1317_v58, %v1287_v8  ;;  %v1182_v13 = vpack.c.bf16 %v5279_v42, %v5271_v35  ;;  %v1208_v49 = vmul.f32 %v5104_v51, %v5104_v51 }
 0x252   : >> { %v1296_v51 = vmul.f32 %v5161_v16, %v5161_v16 }
 0x253   : >> { %v1234_v31 = vadd.f32 %v1233_v22, %v1203_v52  ;;  %v1319_v61 = vadd.f32 %v1318_v28, %v1288_v7  ;;  %1456 = vmatmul.bf16.gmra.mxu3 %v1182_v13  ;;  %v1209_v7 = vmul.f32 %v5126_v37, %v5126_v37  ;;  %v1210_v28 = vmul.f32 %v5152_v60, %v5152_v60 }
 0x254   : >> { %v1212_v37 = vmul.f32 %v5213_v53, %v5213_v53  ;;  %v1213_v60 = vmul.f32 %v5245_v9, %v5245_v9  ;;  %v1299_v53 = vmul.f32 %v5228_v39, %v5228_v39  ;;  %v1300_v9 = vmul.f32 %v5271_v35, %v5271_v35 }
 0x255   : >> { %v1235_v48 = vadd.f32 %v1234_v31, %v1204_v46  ;;  %v1320_v43 = vadd.f32 %v1319_v61, %v1289_v30  ;;  %v1211_v46 = vmul.f32 %v5191_v24, %v5191_v24 }
 0x257   : >> { %v1236_v63 = vadd.f32 %v1235_v48, %v1205_v41  ;;  %v1321_v11 = vadd.f32 %v1320_v43, %v1290_v18  ;;  %v1297_v48 = vmul.f32 %v5170_v26, %v5170_v26 }
 0x259   : >> { %v1237_v32 = vadd.f32 %v1236_v63, %v1206_v38  ;;  %v1322_v59 = vadd.f32 %v1321_v11, %v1291_v62  ;;  %v1298_v38 = vmul.f32 %v5225_v2, %v5225_v2  ;;  %v1214_v11 = vmul.f32 %v1101_v20, %v1101_v20 }
 0x25a   : >> { %v1382_v8 = vpop.f32.mrf.mxu1 }
 0x25b   : >> { %v1238_v54 = vadd.f32 %v1237_v32, %v1207_v5  ;;  %v1323_v58 = vadd.f32 %v1322_v59, %v1292_v45 }
 0x25d   : >> { %v1239_v52 = vadd.f32 %v1238_v54, %v1208_v49  ;;  %v1324_v22 = vadd.f32 %v1323_v58, %v1293_v0  ;;  %v1301_v58 = vmul.f32 %v5279_v42, %v5279_v42 }
 0x25f   : >> { %v1240_v13 = vadd.f32 %v1239_v52, %v1209_v7  ;;  %v1325_v30 = vadd.f32 %v1324_v22, %v1294_v34 }
 0x261   : >> { %v1241_v31 = vadd.f32 %v1240_v13, %v1210_v28  ;;  %v1326_v61 = vadd.f32 %v1325_v30, %v1295_v12 }
 0x262   : >> { %v1384_v18 = vpop.f32.mrf.mxu1 }
 0x263   : >> { %v1242_v41 = vadd.f32 %v1241_v31, %v1211_v46  ;;  %v1327_v43 = vadd.f32 %v1326_v61, %v1296_v51 }
 0x265   : >> { %v1243_v62 = vadd.f32 %v1242_v41, %v1212_v37  ;;  %v1328_v63 = vadd.f32 %v1327_v43, %v1297_v48  ;;  %v1385_v43 = vadd.f32 %v1384_v18, %v6593_v56  ;;  %v6664_v18 = vld [vmem:[#allocation79_spill] sm:$0xff] }
 0x266   : >> { %v5327_v24 = vpop.f32.mrf.mxu3 }
 0x267   : >> { %v1244_v45 = vadd.f32 %v1243_v62, %v1213_v60  ;;  %v1329_v5 = vadd.f32 %v1328_v63, %v1298_v38  ;;  %v1383_v62 = vadd.f32 %v1382_v8, %v6591_v10  ;;  %v1463_v63 = vmax.f32 %v1385_v43, 0.0  ;;  %v6665_v10 = vld [vmem:[#allocation82_spill] sm:$0xff] }
 0x269   : >> { %v1245_v32 = vadd.f32 %v1244_v45, %v1214_v11  ;;  %v1330_v59 = vadd.f32 %v1329_v5, %v1299_v53  ;;  %v1462_v53 = vmax.f32 %v1383_v62, 0.0 }
 0x26a   : >> { %v1387_v0 = vpop.f32.mrf.mxu1 }
 0x26b   : >> { %1246 = vadd.xlane.f32.xlu0 %v1245_v32  ;;  %v1331_v49 = vadd.f32 %v1330_v59, %v1300_v9  ;;  %v1388_v38 = vadd.f32 %v1387_v0, %v6597_v40  ;;  %v6661_v59 = vld [vmem:[#allocation80_spill] sm:$0xff]  ;;  %v6667_v0 = vld [vmem:[#allocation70_spill] sm:$0xff] }
 0x26c   : >> { %v5359_v9 = vsub.f32 %v1463_v63, %v6661_v59 }
 0x26d   : >> { %v1332_v34 = vadd.f32 %v1331_v49, %v1301_v58  ;;  %v1464_v5 = vmax.f32 %v1388_v38, 0.0  ;;  %v6663_v58 = vld [vmem:[#allocation66_spill] sm:$0xff] }
 0x26e   : >> { %v5333_v54 = vpop.f32.mrf.mxu3  ;;  %6662 = vst [vmem:[#allocation94_spill] sm:$0xff] %v5359_v9  ;;  %v6669_v38 = vld [vmem:[#allocation74_spill] sm:$0xff] }
 0x26f   : >> { %v5366_v8 = vsub.f32 %v1464_v5, %v6665_v10  ;;  %v6670_v5 = vld [vmem:[#allocation98_spill] sm:$0xff] }
 0x271   : >> { %6666 = vst [vmem:[#allocation89_spill] sm:$0xff] %v5366_v8 }
 0x272   : >> { %v1389_v20 = vpop.f32.mrf.mxu1 }
 0x273   : >> { %1333 = vadd.xlane.f32.xlu0 %v1332_v34  ;;  %v1390_v11 = vadd.f32 %v1389_v20, %v6600_v36  ;;  %v5363_v34 = vsub.f32 %v1462_v53, %v6664_v18  ;;  %v1631_v53 = vmul.f32 %v5366_v8, %v5366_v8 }
 0x275   : >> { %v1465_v49 = vmax.f32 %v1390_v11, 0.0  ;;  %v1629_v11 = vmul.f32 %v5363_v34, %v5363_v34 }
 0x276   : >> { %v5337_v7 = vpop.f32.mrf.mxu3 }
 0x27a   : >> { %v1392_v52 = vpop.f32.mrf.mxu1 }
 0x27b   : >> { %v1393_v32 = vadd.f32 %v1392_v52, %v6604_v3  ;;  %v1630_v3 = vmul.f32 %v5359_v9, %v5359_v9  ;;  %v6668_v52 = vld [vmem:[#allocation83_spill] sm:$0xff]  ;;  %v6674_v9 = vld [vmem:[#allocation102_spill] sm:$0xff] }
 0x27c   : >> { %v5374_v43 = vsub.f32 %v1465_v49, %v6668_v52 }
 0x27d   : >> { %v1466_v40 = vmax.f32 %v1393_v32, 0.0  ;;  %v1661_v10 = vadd.f32 %v1630_v3, %v1629_v11 }
 0x27e   : >> { %v5339_v22 = vpop.f32.mrf.mxu3  ;;  %v1632_v49 = vmul.f32 %v5374_v43, %v5374_v43 }
 0x27f   : >> { %v1662_v18 = vadd.f32 %v1661_v10, %v1631_v53  ;;  %v6676_v53 = vld [vmem:[#allocation59_spill] sm:$0xff] }
 0x281   : >> { %v1663_v3 = vadd.f32 %v1662_v18, %v1632_v49  ;;  %v6677_v18 = vld [vmem:[#allocation63_spill] sm:$0xff] }
 0x282   : >> { %v1394_v12 = vpop.f32.mrf.mxu1 }
 0x283   : >> { %v1395_v56 = vadd.f32 %v1394_v12, %v6663_v58  ;;  %v6671_v58 = vld [vmem:[#allocation47_spill] sm:$0xff] }
 0x285   : >> { %v1467_v62 = vmax.f32 %v1395_v56, 0.0  ;;  %v6672_v56 = vld [vmem:[#allocation99_spill] sm:$0xff] }
 0x286   : >> { %v5341_v28 = vpop.f32.mrf.mxu3 }
 0x287   : >> { %v5388_v52 = vsub.f32 %v1467_v62, %v6672_v56  ;;  %v6679_v56 = vld [vmem:[#allocation67_spill] sm:$0xff] }
 0x289   : >> { %v1634_v11 = vmul.f32 %v5388_v52, %v5388_v52 }
 0x28a   : >> { %v1397_v13 = vpop.f32.mrf.mxu1 }
 0x28b   : >> { %v1398_v36 = vadd.f32 %v1397_v13, %v6667_v0  ;;  %v5382_v13 = vsub.f32 %v1466_v40, %v6670_v5  ;;  %v6675_v5 = vld [vmem:[#allocation55_spill] sm:$0xff] }
 0x28d   : >> { %v1468_v32 = vmax.f32 %v1398_v36, 0.0  ;;  %v1633_v8 = vmul.f32 %v5382_v13, %v5382_v13 }
 0x28e   : >> { %v5343_v30 = vpop.f32.mrf.mxu3 }
 0x28f   : >> { %v5394_v40 = vsub.f32 %v1468_v32, %v6674_v9 }
 0x291   : >> { %v1635_v32 = vmul.f32 %v5394_v40, %v5394_v40 }
 0x292   : >> { %v1399_v51 = vpop.f32.mrf.mxu1 }
 0x293   : >> { %v1400_v12 = vadd.f32 %v1399_v51, %v6669_v38  ;;  %v6673_v38 = vld [vmem:[#allocation51_spill] sm:$0xff] }
 0x295   : >> { %v1469_v51 = vmax.f32 %v1400_v12, 0.0 }
 0x296   : >> { %v5345_v46 = vpop.f32.mrf.mxu3 }
 0x297   : >> { %v5400_v62 = vsub.f32 %v1469_v51, %v5060_v21  ;;  %v6678_v21 = vld [vmem:[#allocation107_spill] sm:$0xff] }
 0x299   : >> { %v1636_v51 = vmul.f32 %v5400_v62, %v5400_v62 }
 0x29a   : >> { %v1402_v31 = vpop.f32.mrf.mxu1 }
 0x29b   : >> { %v1403_v0 = vadd.f32 %v1402_v31, %v6671_v58 }
 0x29d   : >> { %v1470_v36 = vmax.f32 %v1403_v0, 0.0 }
 0x29e   : >> { %v5347_v61 = vpop.f32.mrf.mxu3 }
 0x29f   : >> { %v5408_v0 = vsub.f32 %v1470_v36, %v5095_v4 }
 0x2a2   : >> { %v1404_v37 = vpop.f32.mrf.mxu1 }
 0x2a3   : >> { %v1405_v59 = vadd.f32 %v1404_v37, %v6673_v38  ;;  %v1664_v38 = vadd.f32 %v1663_v3, %v1633_v8  ;;  %v1637_v3 = vmul.f32 %v5408_v0, %v5408_v0 }
 0x2a5   : >> { %v1471_v10 = vmax.f32 %v1405_v59, 0.0  ;;  %v1665_v49 = vadd.f32 %v1664_v38, %v1634_v11 }
 0x2a6   : >> { %v5349_v41 = vpop.f32.mrf.mxu3 }
 0x2a7   : >> { %v5414_v9 = vsub.f32 %v1471_v10, %v6678_v21  ;;  %v1666_v8 = vadd.f32 %v1665_v49, %v1635_v32  ;;  %v6682_v49 = vld [vmem:[#allocation48_spill] sm:$0xff] }
 0x2a9   : >> { %v1667_v4 = vadd.f32 %v1666_v8, %v1636_v51  ;;  %v1638_v11 = vmul.f32 %v5414_v9, %v5414_v9  ;;  %v1423_v51 = vadd.f32 %v5327_v24, %v6682_v49  ;;  %v6684_v24 = vld [vmem:[#allocation56_spill] sm:$0xff]  ;;  %v6685_v49 = vld [vmem:[#allocation75_spill] sm:$0xff] }
 0x2aa   : >> { %v1407_v48 = vpop.f32.mrf.mxu1 }
 0x2ab   : >> { %v1408_v31 = vadd.f32 %v1407_v48, %v6675_v5 }
 0x2ad   : >> { %v1472_v48 = vmax.f32 %v1408_v31, 0.0 }
 0x2ae   : >> { %v5352_v60 = vpop.f32.mrf.mxu3 }
 0x2b2   : >> { %v1409_v45 = vpop.f32.mrf.mxu1 }
 0x2b3   : >> { %v1410_v58 = vadd.f32 %v1409_v45, %v6676_v53  ;;  %v6680_v53 = vld [vmem:[#allocation97_spill] sm:$0xff] }
 0x2b4   : >> { %v5420_v36 = vsub.f32 %v1472_v48, %v6680_v53 }
 0x2b5   : >> { %v1473_v59 = vmax.f32 %v1410_v58, 0.0  ;;  %v6681_v58 = vld [vmem:[#allocation71_spill] sm:$0xff] }
 0x2b6   : >> { %v5369_v20 = vpop.f32.mrf.mxu3  ;;  %v1639_v32 = vmul.f32 %v5420_v36, %v5420_v36 }
 0x2b7   : >> { %v5425_v38 = vsub.f32 %v1473_v59, %v5146_v47 }
 0x2b9   : >> { %v1640_v59 = vmul.f32 %v5425_v38, %v5425_v38 }
 0x2ba   : >> { %v1412_v63 = vpop.f32.mrf.mxu1 }
 0x2bb   : >> { %v1413_v5 = vadd.f32 %v1412_v63, %v6677_v18 }
 0x2bd   : >> { %v1474_v31 = vmax.f32 %v1413_v5, 0.0 }
 0x2be   : >> { %v5402_v12 = vpop.f32.mrf.mxu3 }
 0x2bf   : >> { %v5433_v48 = vsub.f32 %v1474_v31, %v5200_v27 }
 0x2c2   : >> { %v1414_v37 = vpop.f32.mrf.mxu1 }
 0x2c3   : >> { %v1415_v45 = vadd.f32 %v1414_v37, %v6679_v56  ;;  %v1668_v37 = vadd.f32 %v1667_v4, %v1637_v3 }
 0x2c5   : >> { %v1475_v10 = vmax.f32 %v1415_v45, 0.0  ;;  %v1669_v8 = vadd.f32 %v1668_v37, %v1638_v11  ;;  %v1428_v11 = vadd.f32 %v5337_v7, %v6684_v24 }
 0x2c6   : >> { %v5428_v56 = vpop.f32.mrf.mxu3 }
 0x2c7   : >> { %v5440_v45 = vsub.f32 %v1475_v10, %v5203_v6  ;;  %v1670_v3 = vadd.f32 %v1669_v8, %v1639_v32  ;;  %v1480_v7 = vmax.f32 %v1428_v11, 0.0 }
 0x2c9   : >> { %v1671_v37 = vadd.f32 %v1670_v3, %v1640_v59  ;;  %v1642_v10 = vmul.f32 %v5440_v45, %v5440_v45  ;;  %v6687_v59 = vld [vmem:[#allocation64_spill] sm:$0xff] }
 0x2ca   : >> { %v1417_v63 = vpop.f32.mrf.mxu1  ;;  %v1433_v3 = vadd.f32 %v5341_v28, %v6687_v59 }
 0x2cb   : >> { %v1418_v18 = vadd.f32 %v1417_v63, %v6681_v58  ;;  %v6683_v63 = vld [vmem:[#allocation52_spill] sm:$0xff]  ;;  %v1641_v58 = vmul.f32 %v5433_v48, %v5433_v48 }
 0x2cc   : >> { %v1425_v4 = vadd.f32 %v5333_v54, %v6683_v63  ;;  %v6686_v54 = vld [vmem:[#allocation60_spill] sm:$0xff] }
 0x2cd   : >> { %v1476_v5 = vmax.f32 %v1418_v18, 0.0  ;;  %v1478_v18 = vmax.f32 %v1423_v51, 0.0  ;;  %v1430_v32 = vadd.f32 %v5339_v22, %v6686_v54  ;;  %v1672_v8 = vadd.f32 %v1671_v37, %v1641_v58  ;;  %v6688_v58 = vld [vmem:[#allocation68_spill] sm:$0xff] }
 0x2ce   : >> { %v1479_v47 = vmax.f32 %v1425_v4, 0.0  ;;  %v1435_v37 = vadd.f32 %v5343_v30, %v6688_v58  ;;  %v1482_v54 = vmax.f32 %v1433_v3, 0.0 }
 0x2cf   : >> { %v5447_v31 = vsub.f32 %v1476_v5, %v5238_v33  ;;  %v5459_v51 = vsub.f32 %v1478_v18, %v4953_v29  ;;  %v1454_v33 = vpop.f32.mrf.mxu3  ;;  %v1673_v24 = vadd.f32 %v1672_v8, %v1642_v10  ;;  %v1481_v22 = vmax.f32 %v1430_v32, 0.0  ;;  %v6690_v8 = vld [vmem:[#allocation76_spill] sm:$0xff] }
 0x2d0   : >> { %v5467_v4 = vsub.f32 %v1479_v47, %v4959_v50  ;;  %v5478_v10 = vsub.f32 %v1480_v7, %v4989_v25  ;;  %v1440_v32 = vadd.f32 %v5347_v61, %v6690_v8  ;;  %v5492_v3 = vsub.f32 %v1482_v54, %v5029_v55  ;;  %v6692_v8 = vld [vmem:[#allocation53_spill] sm:$0xff] }
 0x2d1   : >> { %v1643_v5 = vmul.f32 %v5447_v31, %v5447_v31  ;;  %v1645_v28 = vmul.f32 %v5459_v51, %v5459_v51 }
 0x2d2   : >> { %v1419_v27 = vpop.f32.mrf.mxu1  ;;  %v1646_v30 = vmul.f32 %v5467_v4, %v5467_v4  ;;  %v1647_v7 = vmul.f32 %v5478_v10, %v5478_v10 }
 0x2d3   : >> { %v1420_v6 = vadd.f32 %v1419_v27, %v6685_v49  ;;  %v6689_v49 = vld [vmem:[#allocation72_spill] sm:$0xff] }
 0x2d4   : >> { %v1438_v11 = vadd.f32 %v5345_v46, %v6689_v49 }
 0x2d5   : >> { %v1477_v63 = vmax.f32 %v1420_v6, 0.0  ;;  %v1674_v6 = vadd.f32 %v1673_v24, %v1643_v5  ;;  %v5485_v5 = vsub.f32 %v1481_v22, %v4994_v57  ;;  %v6691_v24 = vld [vmem:[#allocation49_spill] sm:$0xff]  ;;  %v1445_v22 = vadd.f32 %v5352_v60, %v6692_v8 }
 0x2d6   : >> { %v1484_v46 = vmax.f32 %v1438_v11, 0.0  ;;  %v1443_v58 = vadd.f32 %v5349_v41, %v6691_v24 }
 0x2d7   : >> { %v5464_v27 = vsub.f32 %v1477_v63, %v5257_v14  ;;  %v1483_v63 = vmax.f32 %v1435_v37, 0.0  ;;  %v1457_v57 = vpop.f32.mrf.mxu3  ;;  %v1648_v37 = vmul.f32 %v5485_v5, %v5485_v5  ;;  %v1487_v55 = vmax.f32 %v1445_v22, 0.0 }
 0x2d8   : >> { %v1486_v54 = vmax.f32 %v1443_v58, 0.0 }
 0x2d9   : >> { %v1644_v18 = vmul.f32 %v5464_v27, %v5464_v27  ;;  %v5499_v11 = vsub.f32 %v1483_v63, %v5034_v23 }
 0x2db   : >> { %v1675_v47 = vadd.f32 %v1674_v6, %v1644_v18  ;;  %v1485_v18 = vmax.f32 %v1440_v32, 0.0  ;;  %v6693_v32 = vld [vmem:[#allocation57_spill] sm:$0xff]  ;;  %v1650_v63 = vmul.f32 %v5499_v11, %v5499_v11 }
 0x2dd   : >> { %v1676_v59 = vadd.f32 %v1675_v47, %v1645_v28  ;;  %v5502_v47 = vsub.f32 %v1484_v46, %v5069_v44  ;;  %v5509_v8 = vsub.f32 %v1485_v18, %v5074_v19  ;;  %v5525_v19 = vsub.f32 %v1487_v55, %v5114_v15 }
 0x2de   : >> { %v1247_v49 = vpop.xlane.xlu0 %1246 }
 0x2df   : >> { %v1677_v61 = vadd.f32 %v1676_v59, %v1646_v30  ;;  %v1248_v6 = vrot.slane %v1247_v49, 4  ;;  %v1649_v30 = vmul.f32 %v5492_v3, %v5492_v3  ;;  %v1448_v59 = vadd.f32 %v5369_v20, %v6693_v32 }
 0x2e0   : >> { %v1652_v32 = vmul.f32 %v5509_v8, %v5509_v8  ;;  %v1654_v55 = vmul.f32 %v5525_v19, %v5525_v19 }
 0x2e1   : >> { %v1678_v41 = vadd.f32 %v1677_v61, %v1647_v7  ;;  %v1249_v28 = vadd.f32 %v1248_v6, %v1247_v49  ;;  %v6694_v49 = vld [vmem:[#allocation61_spill] sm:$0xff]  ;;  %v1651_v61 = vmul.f32 %v5502_v47, %v5502_v47  ;;  %v5518_v6 = vsub.f32 %v1486_v54, %v5109_v17 }
 0x2e2   : >> { %v1450_v46 = vadd.f32 %v5402_v12, %v6694_v49  ;;  %v1488_v20 = vmax.f32 %v1448_v59, 0.0  ;;  %v1459_v59 = vpop.f32.mrf.mxu3 }
 0x2e3   : >> { %v1679_v60 = vadd.f32 %v1678_v41, %v1648_v37  ;;  %v1250_v24 = vrot.slane %v1249_v28, 2  ;;  %v6695_v37 = vld [vmem:[#allocation65_spill] sm:$0xff]  ;;  %v1653_v54 = vmul.f32 %v5518_v6, %v5518_v6 }
 0x2e4   : >> { %v1453_v18 = vadd.f32 %v5428_v56, %v6695_v37  ;;  %v1489_v12 = vmax.f32 %v1450_v46, 0.0  ;;  %v5531_v49 = vsub.f32 %v1488_v20, %v5161_v16 }
 0x2e5   : >> { %v1680_v7 = vadd.f32 %v1679_v60, %v1649_v30  ;;  %v1251_v58 = vadd.f32 %v1250_v24, %v1249_v28  ;;  %v6696_v28 = vld [vmem:[#allocation69_spill] sm:$0xff] }
 0x2e6   : >> { %v1455_v30 = vadd.f32 %v1454_v33, %v6696_v28  ;;  %v1490_v56 = vmax.f32 %v1453_v18, 0.0  ;;  %v5537_v46 = vsub.f32 %v1489_v12, %v5170_v26 }
 0x2e7   : >> { %v1681_v41 = vadd.f32 %v1680_v7, %v1650_v63  ;;  %v1252_v22 = vrot.slane %v1251_v58, 1  ;;  %v6697_v63 = vld [vmem:[#allocation73_spill] sm:$0xff] }
 0x2e8   : >> { %v1458_v7 = vadd.f32 %v1457_v57, %v6697_v63  ;;  %v1491_v33 = vmax.f32 %v1455_v30, 0.0  ;;  %v5543_v20 = vsub.f32 %v1490_v56, %v5225_v2 }
 0x2e9   : >> { %v1253_v60 = vadd.f32 %v1252_v22, %v1251_v58  ;;  %v1682_v24 = vadd.f32 %v1681_v41, %v1651_v61  ;;  %v1460_v58 = vadd.f32 %v1459_v59, %v6658_v1  ;;  %v1655_v41 = vmul.f32 %v5531_v49, %v5531_v49 }
 0x2ea   : >> { %v1492_v18 = vmax.f32 %v1458_v7, 0.0  ;;  %v1656_v22 = vmul.f32 %v5537_v46, %v5537_v46  ;;  %v1657_v1 = vmul.f32 %v5543_v20, %v5543_v20 }
 0x2eb   : >> { %2679 = vpush %v1253_v60  ;;  %v1683_v37 = vadd.f32 %v1682_v24, %v1652_v32  ;;  %v5548_v32 = vsub.f32 %v1491_v33, %v5228_v39  ;;  %v1493_v12 = vmax.f32 %v1460_v58, 0.0  ;;  %v1334_v33 = vpop.xlane.xlu0 %1333 }
 0x2ec   : >> { %v5553_v30 = vsub.f32 %v1492_v18, %v5271_v35 }
 0x2ed   : >> { %v1684_v61 = vadd.f32 %v1683_v37, %v1653_v54  ;;  %v1658_v24 = vmul.f32 %v5548_v32, %v5548_v32  ;;  %v5558_v54 = vsub.f32 %v1493_v12, %v5279_v42 }
 0x2ee   : >> { %v1659_v56 = vmul.f32 %v5553_v30, %v5553_v30 }
 0x2ef   : >> { %v1685_v57 = vadd.f32 %v1684_v61, %v1654_v55  ;;  %6698 = vst [vmem:[#allocation88_spill] sm:$0xff] %v5558_v54  ;;  %v1660_v7 = vmul.f32 %v5558_v54, %v5558_v54  ;;  %v1335_v61 = vrot.slane %v1334_v33, 4 }
 0x2f1   : >> { %v1686_v28 = vadd.f32 %v1685_v57, %v1655_v41  ;;  %v1336_v41 = vadd.f32 %v1335_v61, %v1334_v33 }
 0x2f3   : >> { %v1687_v60 = vadd.f32 %v1686_v28, %v1656_v22  ;;  %v1337_v22 = vrot.slane %v1336_v41, 2 }
 0x2f5   : >> { %v1688_v59 = vadd.f32 %v1687_v60, %v1657_v1  ;;  %v1338_v1 = vadd.f32 %v1337_v22, %v1336_v41 }
 0x2f7   : >> { %v1689_v63 = vadd.f32 %v1688_v59, %v1658_v24  ;;  %v1339_v59 = vrot.slane %v1338_v1, 1 }
 0x2f9   : >> { %v1690_v37 = vadd.f32 %v1689_v63, %v1659_v56 }
 0x2fb   : >> { %v1691_v55 = vadd.f32 %v1690_v37, %v1660_v7  ;;  %v1340_v37 = vadd.f32 %v1339_v59, %v1338_v1 }
 0x2fd   : >> { %1692 = vadd.xlane.f32.xlu1 %v1691_v55  ;;  %v4040_v55 = vmov 1.75  }
 0x31c   : >> { %s2680_s9 = spop %2679 }
 0x31d   : >> { %v1255_v58 = vstv %s2680_s9 }
 0x31e   : >> { %3317 = vrsqrt.f32 %v1255_v58  ;;  %vm1263_vm0 = vcmp.eq.f32.partialorder %v1255_v58, inf  ;;  %v1266_v56 = vand.u32 2147483648, %v1255_v58  ;;  %vm1265_vm1 = vcmp.eq.f32.partialorder %v1255_v58, 0.0 }
 0x31f   : >> { %3319 = vrcp.f32 %v4040_v55 }
 0x324   : >> { %v3318_v18 = vpop.eup %3317 }
 0x325   : >> { %v1257_v57 = vmul.f32 %v3318_v18, %v1255_v58  ;;  %v3320_v61 = vpop.eup %3319 }
 0x326   : >> { %v1362_v41 = vmul.f32 1.75, %v3320_v61  ;;  %vm1366_vm2 = vweird.f32 %v3320_v61 }
 0x327   : >> { %v1258_v12 = vmul.f32 %v3318_v18, %v1257_v57 }
 0x328   : >> { %v1363_v22 = vsub.f32 1.0, %v1362_v41 }
 0x329   : >> { %v1259_v28 = vmul.f32 0.5, %v1258_v12 }
 0x32b   : >> { %v1260_v60 = vsub.f32 1.5, %v1259_v28 }
 0x32d   : >> { %v1261_v24 = vmul.f32 %v3318_v18, %v1260_v60  ;;  %v1364_v60 = vmul.f32 %v3320_v61, %v1363_v22 }
 0x32f   : >> { %v1262_v42 = vmul.f32 %v1261_v24, %v1255_v58 }
 0x331   : >> { %v1264_v63 = vsel %vm1263_vm0, %v1255_v58, %v1262_v42 }
 0x332   : >> { %v1267_v7 = vsel %vm1265_vm1, %v1266_v56, %v1264_v63  ;;  %v1365_v63 = vadd.f32 %v3320_v61, %v1364_v60 }
 0x333   : >> { %2681 = vpush %v1267_v7 }
 0x334   : >> { %2683 = vpush %v1340_v37  ;;  %v1367_v22 = vsel %vm1366_vm2, %v3320_v61, %v1365_v63 }
 0x364   : >> { %s5564_s1 = spop %2681 }
 0x365   : >> { %s2684_s11 = spop %2683  ;;  %s5568_s13 = smul.f32 %s3767_s22, %s5564_s1 }
 0x366   : >> { %v1342_v33 = vstv %s2684_s11 }
 0x367   : >> { %3321 = vrsqrt.f32 %v1342_v33  ;;  %vm1350_vm3 = vcmp.eq.f32.partialorder %v1342_v33, inf  ;;  %v1353_v55 = vand.u32 2147483648, %v1342_v33  ;;  %vm1352_vm4 = vcmp.eq.f32.partialorder %v1342_v33, 0.0  ;;  %s1357_s29 = smul.f32 %s3771_s7, %s5568_s13 }
 0x36d   : >> { %v3322_v18 = vpop.eup %3321 }
 0x36e   : >> { %v1344_v57 = vmul.f32 %v3322_v18, %v1342_v33 }
 0x370   : >> { %v1693_v12 = vpop.xlane.xlu1 %1692  ;;  %v1345_v28 = vmul.f32 %v3322_v18, %v1344_v57 }
 0x371   : >> { %v1694_v42 = vrot.slane %v1693_v12, 4 }
 0x372   : >> { %v1346_v58 = vmul.f32 0.5, %v1345_v28 }
 0x373   : >> { %v1695_v1 = vadd.f32 %v1694_v42, %v1693_v12 }
 0x374   : >> { %v1347_v24 = vsub.f32 1.5, %v1346_v58  ;;  %v6702_v58 = vld [vmem:[#allocation94_spill] sm:$0xff] }
 0x375   : >> { %v1696_v59 = vrot.slane %v1695_v1, 2 }
 0x376   : >> { %v1348_v56 = vmul.f32 %v3322_v18, %v1347_v24 }
 0x377   : >> { %v1697_v7 = vadd.f32 %v1696_v59, %v1695_v1  ;;  %v6703_v1 = vld [vmem:[#allocation89_spill] sm:$0xff] }
 0x378   : >> { %v1349_v37 = vmul.f32 %v1348_v56, %v1342_v33 }
 0x379   : >> { %v1698_v41 = vrot.slane %v1697_v7, 1 }
 0x37a   : >> { %v1351_v57 = vsel %vm1350_vm3, %v1342_v33, %v1349_v37 }
 0x37b   : >> { %v1354_v12 = vsel %vm1352_vm4, %v1353_v55, %v1351_v57  ;;  %v1699_v28 = vadd.f32 %v1698_v41, %v1697_v7  ;;  %v6704_v57 = vld [vmem:[#allocation79_spill] sm:$0xff] }
 0x37c   : >> { %2685 = vpush %v1354_v12  ;;  %v6709_v12 = vld [vmem:[#allocation82_spill] sm:$0xff] }
 0x37d   : >> { %2687 = vpush %v1367_v22  ;;  %v6707_v22 = vld [vmem:[#allocation80_spill] sm:$0xff] }
 0x37e   : >> { %2689 = vpush %v1699_v28  ;;  %v6711_v28 = vld [vmem:[#allocation83_spill] sm:$0xff] }
 0x3ad   : >> { %s2686_s15 = spop %2685 }
 0x3ae   : >> { %s5574_s16 = sadd.f32 1e-06, %s2686_s15  ;;  %s5576_s9 = spop %2687 }
 0x3af   : >> { %s1369_s11 = smul.f32 %s3767_s22, %s5576_s9  ;;  %s2690_s14 = spop %2689 }
 0x3b0   : >> { %s1359_s2 = smul.f32 %s1358_s18, %s5574_s16  ;;  %v5581_v33 = vstv %s2690_s14 }
 0x3b1   : >> { %6699 = vst [vmem:[#allocation93_spill] sm:$0xff] %v5581_v33  ;;  %s1526_s1 = smul.f32 0.001, %s5574_s16  ;;  %s1370_s3 = smax.f32 %s1369_s11, %s4196_s10  ;;  %3323 = vrsqrt.f32 %v5581_v33 }
 0x3b2   : >> { %p1360_p4 = scmp.gt.f32.partialorder %s1357_s29, %s1359_s2  ;;  %s1804_s15 = smul.f32 0.9, %s5568_s13 }
 0x3b3   : >> { %p1527_p8 = scmp.gt.f32.partialorder %s5568_s13, %s1526_s1 }
 0x3b4   : >> { %s6949_s3 = smov (!%p1360_p4, %s1370_s3), %s3767_s22 }
 0x3b5   : >> { %p5590_p11 = pnand %p1528_p1, %p1527_p8  ;;  %s1815_s11 = smul.f32 %s5576_s9, %s6949_s3 }
 0x3b7   : >> { %s2551_s7 = scalar_select %p5590_p11, 0, 1  ;;  %v5596_v61 = vpop.eup %3323 }
 0x3b8   : >> { %6701 = vst [vmem:[#allocation87_spill] sm:$0xff] %v5596_v61  ;;  %s2547_s14 = scalar_select %p5590_p11, 0.0, %s6949_s3  ;;  %v5613_v59 = vmul.f32 %v5596_v61, %v5581_v33  ;;  %v6717_v33 = vld [vmem:[#allocation102_spill] sm:$0xff] }
 0x3b9   : >> { %s5601_s8 = sadd.s32 %s2551_s7, %s1372_s19  }
 0x3ba   : >> { %v5603_v18 = vstv %s2547_s14  ;;  %p800_p9 = scmp.lt.s32.totalorder %s5601_s8, 75  ;;  %s6814_s21 = smov %s5601_s8 }
 0x3bb   : >> { %v1533_v42 = vmul.f32 %v5603_v18, %v5363_v34  ;;  %v1534_v60 = vmul.f32 %v5603_v18, %v6702_v58  ;;  %v1535_v24 = vmul.f32 %v5603_v18, %v6703_v1  ;;  %v1536_v56 = vmul.f32 %v5603_v18, %v5374_v43  ;;  %v6713_v58 = vld [vmem:[#allocation98_spill] sm:$0xff]  ;;  %v6715_v1 = vld [vmem:[#allocation99_spill] sm:$0xff] }
 0x3bc   : >> { %v1537_v63 = vmul.f32 %v5603_v18, %v5382_v13  ;;  %v1538_v7 = vmul.f32 %v5603_v18, %v5388_v52  ;;  %v1539_v34 = vmul.f32 %v5603_v18, %v5394_v40  ;;  %v1540_v37 = vmul.f32 %v5603_v18, %v5400_v62 }
 0x3bd   : >> { %v1541_v55 = vmul.f32 %v5603_v18, %v5408_v0  ;;  %v1542_v41 = vmul.f32 %v5603_v18, %v5414_v9  ;;  %v1543_v43 = vmul.f32 %v5603_v18, %v5420_v36  ;;  %v1544_v13 = vmul.f32 %v5603_v18, %v5425_v38 }
 0x3be   : >> { %v1545_v52 = vmul.f32 %v5603_v18, %v5433_v48  ;;  %v1546_v40 = vmul.f32 %v5603_v18, %v5440_v45  ;;  %v1547_v62 = vmul.f32 %v5603_v18, %v5447_v31  ;;  %v1548_v0 = vmul.f32 %v5603_v18, %v5464_v27 }
 0x3bf   : >> { %v1549_v9 = vmul.f32 %v5603_v18, %v5459_v51  ;;  %v1550_v36 = vmul.f32 %v5603_v18, %v5467_v4  ;;  %v1551_v38 = vmul.f32 %v5603_v18, %v5478_v10  ;;  %v1552_v48 = vmul.f32 %v5603_v18, %v5485_v5 }
 0x3c0   : >> { %v1553_v45 = vmul.f32 %v5603_v18, %v5492_v3  ;;  %v1554_v31 = vmul.f32 %v5603_v18, %v5499_v11  ;;  %v1555_v27 = vmul.f32 %v5603_v18, %v5502_v47  ;;  %v1556_v51 = vmul.f32 %v5603_v18, %v5509_v8 }
 0x3c1   : >> { %v1557_v4 = vmul.f32 %v5603_v18, %v5518_v6  ;;  %v1558_v10 = vmul.f32 %v5603_v18, %v5525_v19  ;;  %v1559_v5 = vmul.f32 %v5603_v18, %v5531_v49  ;;  %v1560_v3 = vmul.f32 %v5603_v18, %v5537_v46 }
 0x3c2   : >> { %v1561_v11 = vmul.f32 %v5603_v18, %v5543_v20  ;;  %v1562_v47 = vmul.f32 %v5603_v18, %v5548_v32  ;;  %v1563_v8 = vmul.f32 %v5603_v18, %v5553_v30  ;;  %v5672_v6 = vadd.f32 %v1533_v42, %v6704_v57   ;;  %v6719_v42 = vld [vmem:[#allocation103_spill] sm:$0xff] }
 0x3c3   : >> { %v5675_v19 = vadd.f32 %v1534_v60, %v6707_v22   ;;  %v5678_v49 = vadd.f32 %v1535_v24, %v6709_v12   ;;  %v5681_v46 = vadd.f32 %v1536_v56, %v6711_v28   ;;  %v5684_v20 = vadd.f32 %v1537_v63, %v6713_v58   ;;  %v6721_v60 = vld [vmem:[#allocation106_spill] sm:$0xff]  ;;  %v6726_v63 = vld [vmem:[#allocation91_spill] sm:$0xff] }
 0x3c4   : >> { %6705 = vst [vmem:[#allocation109_spill] sm:$0xff] %v5672_v6  ;;  %v6706_v29 = vmov %v5672_v6  ;;  %v5687_v32 = vadd.f32 %v1538_v7, %v6715_v1   ;;  %v5690_v30 = vadd.f32 %v1539_v34, %v6717_v33   ;;  %v5696_v57 = vadd.f32 %v1541_v55, %v6721_v60   ;;  %v6728_v7 = vld [vmem:[#allocation96_spill] sm:$0xff]  ;;  %v6730_v33 = vld [vmem:[#allocation90_spill] sm:$0xff]  ;;  %v6731_v34 = vld [vmem:[#allocation95_spill] sm:$0xff] }
 0x3c5   : >> { %6708 = vst [vmem:[#allocation110_spill] sm:$0xff] %v5675_v19  ;;  %v5693_v19 = vadd.f32 %v1540_v37, %v6719_v42   ;;  %v6723_v24 = vmov %v6678_v21  ;;  %v5702_v56 = vadd.f32 %v1543_v43, %v6680_v53   ;;  %v5705_v22 = vadd.f32 %v1544_v13, %v6726_v63   ;;  %v6733_v55 = vld [vmem:[#allocation81_spill] sm:$0xff] }
 0x3c6   : >> { %6710 = vst [vmem:[#allocation111_spill] sm:$0xff] %v5678_v49  ;;  %v5699_v6 = vadd.f32 %v1542_v41, %v6723_v24   ;;  %v5708_v12 = vadd.f32 %v1545_v52, %v6728_v7   ;;  %v5711_v7 = vadd.f32 %v1546_v40, %v6730_v33   ;;  %v5714_v1 = vadd.f32 %v1547_v62, %v6731_v34   ;;  %v6736_v43 = vld [vmem:[#allocation85_spill] sm:$0xff]  ;;  %v6737_v52 = vld [vmem:[#allocation100_spill] sm:$0xff] }
 0x3c7   : >> { %6712 = vst [vmem:[#allocation79_spill] sm:$0xff] %v5681_v46  ;;  %v5717_v37 = vadd.f32 %v1548_v0, %v5257_v14   ;;  %v5720_v49 = vadd.f32 %v1549_v9, %v6733_v55   ;;  %v5723_v42 = vadd.f32 %v1550_v36, %v4959_v50   ;;  %v6734_v53 = vmov %v4989_v25  ;;  %v6741_v9 = vld [vmem:[#allocation105_spill] sm:$0xff] }
 0x3c8   : >> { %6714 = vst [vmem:[#allocation80_spill] sm:$0xff] %v5684_v20  ;;  %v5726_v41 = vadd.f32 %v1551_v38, %v6734_v53   ;;  %v5732_v40 = vadd.f32 %v1553_v45, %v6737_v52   ;;  %v6739_v62 = vmov %v5034_v23  ;;  %v6740_v14 = vmov %v5069_v44 }
 0x3c9   : >> { %6716 = vst [vmem:[#allocation82_spill] sm:$0xff] %v5687_v32  ;;  %v5735_v0 = vadd.f32 %v1554_v31, %v6739_v62   ;;  %v5738_v58 = vadd.f32 %v1555_v27, %v6740_v14   ;;  %v6742_v50 = vmov %v5109_v17  ;;  %v6744_v38 = vmov %v5114_v15 }
 0x3ca   : >> { %6718 = vst [vmem:[#allocation83_spill] sm:$0xff] %v5690_v30  ;;  %v6738_v54 = vmov %v5732_v40  ;;  %v5744_v36 = vadd.f32 %v1557_v4, %v6742_v50   ;;  %v5747_v28 = vadd.f32 %v1558_v10, %v6744_v38   ;;  %v5750_v14 = vadd.f32 %v1559_v5, %v5161_v16  }
 0x3cb   : >> { %6720 = vst [vmem:[#allocation86_spill] sm:$0xff] %v5693_v19  ;;  %v5756_v63 = vadd.f32 %v1561_v11, %v5225_v2   ;;  %v5759_v47 = vadd.f32 %v1562_v47, %v5228_v39   ;;  %v5766_v50 = vpack.c.bf16 %v6706_v29, %v6706_v29   ;;  %v6751_v27 = vmov %v5681_v46 }
 0x3cc   : >> { %6722 = vst [vmem:[#allocation97_spill] sm:$0xff] %v5696_v57  ;;  %v6743_v61 = vmov %v5744_v36  ;;  %v6747_v31 = vld [vmem:[#allocation110_spill] sm:$0xff]  ;;  %v5778_v38 = vpack.c.bf16 %v6751_v27, %v6751_v27   ;;  %v6755_v2 = vmov %v5687_v32  ;;  %v6758_v39 = vmov %v5690_v30 }
 0x3cd   : >> { %6724 = vst [vmem:[#allocation94_spill] sm:$0xff] %v5699_v6  ;;  %v6749_v16 = vld [vmem:[#allocation111_spill] sm:$0xff]  ;;  %v6756_v13 = vmov %v6755_v2  ;;  %v5786_v6 = vpack.c.bf16 %v6755_v2, %v6755_v2   ;;  %v6759_v29 = vmov %v6758_v39  ;;  %v5790_v60 = vpack.c.bf16 %v6758_v39, %v6758_v39   ;;  %v6803_v24 = vld [vmem:[#allocation110_spill] sm:$0xff] }
 0x3ce   : >> { %6725 = vst [vmem:[#allocation89_spill] sm:$0xff] %v5702_v56  ;;  %v5774_v45 = vpack.c.bf16 %v6749_v16, %v6749_v16   ;;  %v5818_v53 = vpack.c.bf16 %v5711_v7, %v5711_v7   ;;  %v5822_v30 = vpack.c.bf16 %v5714_v1, %v5714_v1   ;;  %v5834_v36 = vpack.c.bf16 %v5723_v42, %v5723_v42  }
 0x3cf   : >> { %6727 = vst [vmem:[#allocation98_spill] sm:$0xff] %v5705_v22  ;;  %v5850_v46 = vpack.c.bf16 %v5735_v0, %v5735_v0   ;;  %v5854_v40 = vpack.c.bf16 %v5738_v58, %v5738_v58   ;;  %v5862_v39 = vpack.c.bf16 %v6743_v61, %v6743_v61  }
 0x3d0   : >> { %6729 = vst [vmem:[#allocation99_spill] sm:$0xff] %v5708_v12  ;;  %v5741_v12 = vadd.f32 %v1556_v51, %v6741_v9   ;;  %v5762_v51 = vadd.f32 %v1563_v8, %v5271_v35   ;;  %v6761_v35 = vmov %v5693_v19  ;;  %v6770_v9 = vmov %v5702_v56 }
 0x3d1   : >> { %6732 = vst [vmem:[#allocation102_spill] sm:$0xff] %v5717_v37  ;;  %v6762_v17 = vmov %v6761_v35  ;;  %v5806_v33 = vpack.c.bf16 %v6770_v9, %v6770_v9  }
 0x3d2   : >> { %6735 = vst [vmem:[#allocation81_spill] sm:$0xff] %v5726_v41  ;;  %v5729_v41 = vadd.f32 %v1552_v48, %v6736_v43   ;;  %v5770_v43 = vpack.c.bf16 %v6747_v31, %v6747_v31   ;;  %v5794_v48 = vpack.c.bf16 %v6761_v35, %v6761_v35   ;;  %v5882_v35 = vpack.c.bf16 %v5759_v47, %v5759_v47  }
 0x3d3   : >> { %6745 = vst [vmem:[#allocation84_spill] sm:$0xff] %v5747_v28  ;;  %v5753_v28 = vadd.f32 %v1560_v3, %v5170_v26   ;;  %v6753_v26 = vmov %v5684_v20  ;;  %v6778_v3 = vmov %v5717_v37  ;;  %v5830_v37 = vpack.c.bf16 %v5720_v49, %v5720_v49  }
 0x3d4   : >> { %6746 = vst [vmem:[#allocation112_spill] sm:$0xff] %v5766_v50  ;;  %v5782_v55 = vpack.c.bf16 %v6753_v26, %v6753_v26   ;;  %v6767_v4 = vld [vmem:[#allocation94_spill] sm:$0xff]  ;;  %v5826_v52 = vpack.c.bf16 %v6778_v3, %v6778_v3   ;;  %v5842_v8 = vpack.c.bf16 %v5729_v41, %v5729_v41   ;;  %v5870_v20 = vpack.c.bf16 %v5750_v14, %v5750_v14   ;;  %v6810_v50 = vld [vmem:[#allocation93_spill] sm:$0xff] }
 0x3d5   : >> { %6748 = vst [vmem:[#allocation113_spill] sm:$0xff] %v5770_v43  ;;  %v6768_v44 = vmov %v6767_v4  ;;  %v5802_v22 = vpack.c.bf16 %v6767_v4, %v6767_v4   ;;  %v5874_v4 = vpack.c.bf16 %v5753_v28, %v5753_v28   ;;  %v6797_v19 = vmov %v5882_v35  ;;  %v6808_v43 = vld [vmem:[#allocation80_spill] sm:$0xff] }
 0x3d6   : >> { %6750 = vst [vmem:[#allocation114_spill] sm:$0xff] %v5774_v45  ;;  %v6764_v45 = vmov %v5696_v57  ;;  %v6772_v11 = vld [vmem:[#allocation98_spill] sm:$0xff]  ;;  %v5858_v57 = vpack.c.bf16 %v5741_v12, %v5741_v12   ;;  %v5886_v56 = vpack.c.bf16 %v5762_v51, %v5762_v51   ;;  %v6809_v23 = vmov %v6808_v43 }
 0x3d7   : >> { %6752 = vst [vmem:[#allocation115_spill] sm:$0xff] %v5778_v38  ;;  %v6765_v31 = vmov %v6764_v45  ;;  %v5798_v34 = vpack.c.bf16 %v6764_v45, %v6764_v45   ;;  %v5810_v32 = vpack.c.bf16 %v6772_v11, %v6772_v11   ;;  %v6774_v5 = vld [vmem:[#allocation99_spill] sm:$0xff]  ;;  %v1721_v38 = vmul.f32 %v6756_v13, %v6756_v13 }
 0x3d8   : >> { %6754 = vst [vmem:[#allocation116_spill] sm:$0xff] %v5782_v55  ;;  %v6799_v25 = vmov %v5886_v56  ;;  %v6805_v55 = vld [vmem:[#allocation78_spill] sm:$0xff]  ;;  %vm1709_vm5 = vcmp.eq.f32.partialorder %v6810_v50, inf  ;;  %vm1711_vm6 = vcmp.eq.f32.partialorder %v6810_v50, 0.0  ;;  %v1723_v45 = vmul.f32 %v6762_v17, %v6762_v17 }
 0x3d9   : >> { %6757 = vst [vmem:[#allocation117_spill] sm:$0xff] %v5786_v6  ;;  %v6782_v10 = vld [vmem:[#allocation81_spill] sm:$0xff]  ;;  %v1717_v6 = vmul.f32 %v6803_v24, %v6803_v24 }
 0x3da   : >> { %6760 = vst [vmem:[#allocation118_spill] sm:$0xff] %v5790_v60  ;;  %v5838_v2 = vpack.c.bf16 %v6782_v10, %v6782_v10   ;;  %v6791_v16 = vld [vmem:[#allocation84_spill] sm:$0xff]  ;;  %v6802_v60 = vld [vmem:[#allocation109_spill] sm:$0xff] }
 0x3db   : >> { %6763 = vst [vmem:[#allocation119_spill] sm:$0xff] %v5794_v48  ;;  %v5814_v48 = vpack.c.bf16 %v6774_v5, %v6774_v5   ;;  %v6783_v5 = vmov %v6782_v10  ;;  %v5866_v26 = vpack.c.bf16 %v6791_v16, %v6791_v16   ;;  %v5878_v10 = vpack.c.bf16 %v5756_v63, %v5756_v63  }
 0x3dc   : >> { %6766 = vst [vmem:[#allocation120_spill] sm:$0xff] %v5798_v34 }
 0x3dd   : >> { %6769 = vst [vmem:[#allocation121_spill] sm:$0xff] %v5802_v22 }
 0x3de   : >> { %6771 = vst [vmem:[#allocation122_spill] sm:$0xff] %v5806_v33  ;;  %v6804_v33 = vld [vmem:[#allocation111_spill] sm:$0xff] }
 0x3df   : >> { %6773 = vst [vmem:[#allocation123_spill] sm:$0xff] %v5810_v32  ;;  %v1718_v34 = vmul.f32 %v6804_v33, %v6804_v33 }
 0x3e0   : >> { %6775 = vst [vmem:[#allocation124_spill] sm:$0xff] %v5814_v48 }
 0x3e1   : >> { %6776 = vst [vmem:[#allocation125_spill] sm:$0xff] %v5818_v53 }
 0x3e2   : >> { %6777 = vst [vmem:[#allocation126_spill] sm:$0xff] %v5822_v30 }
 0x3e3   : >> { %6779 = vst [vmem:[#allocation127_spill] sm:$0xff] %v5826_v52  ;;  %v1720_v52 = vmul.f32 %v6808_v43, %v6808_v43 }
 0x3e4   : >> { %6780 = vst [vmem:[#allocation128_spill] sm:$0xff] %v5830_v37 }
 0x3e5   : >> { %6781 = vst [vmem:[#allocation129_spill] sm:$0xff] %v5834_v36 }
 0x3e6   : >> { %6784 = vst [vmem:[#allocation130_spill] sm:$0xff] %v5838_v2 }
 0x3e7   : >> { %6785 = vst [vmem:[#allocation131_spill] sm:$0xff] %v5842_v8  ;;  %v5846_v8 = vpack.c.bf16 %v6738_v54, %v6738_v54  }
 0x3e8   : >> { %6787 = vst [vmem:[#allocation133_spill] sm:$0xff] %v5850_v46  ;;  %v6800_v46 = vld [vmem:[#allocation87_spill] sm:$0xff] }
 0x3e9   : >> { %6786 = vst [vmem:[#allocation132_spill] sm:$0xff] %v5846_v8  ;;  %v1704_v32 = vmul.f32 %v6800_v46, %v5613_v59  ;;  %v1719_v59 = vmul.f32 %v6751_v27, %v6751_v27 }
 0x3ea   : >> { %6788 = vst [vmem:[#allocation134_spill] sm:$0xff] %v5854_v40 }
 0x3eb   : >> { %6789 = vst [vmem:[#allocation135_spill] sm:$0xff] %v5858_v57  ;;  %v1716_v57 = vmul.f32 %v6802_v60, %v6802_v60  ;;  %v1705_v22 = vmul.f32 0.5, %v1704_v32  ;;  %v1727_v60 = vmul.f32 %v6772_v11, %v6772_v11 }
 0x3ec   : >> { %6790 = vst [vmem:[#allocation136_spill] sm:$0xff] %v5862_v39 }
 0x3ed   : >> { %6792 = vst [vmem:[#allocation137_spill] sm:$0xff] %v5866_v26  ;;  %v1748_v37 = vadd.f32 %v1717_v6, %v1716_v57  ;;  %v1712_v26 = vand.u32 2147483648, %v6810_v50  ;;  %v6811_v6 = vld [vmem:[#allocation99_spill] sm:$0xff] }
 0x3ee   : >> { %6793 = vst [vmem:[#allocation138_spill] sm:$0xff] %v5870_v20  ;;  %v6801_v20 = vld [vmem:[#allocation88_spill] sm:$0xff]  ;;  %v6812_v21 = vmov %v6811_v6 }
 0x3ef   : >> { %6794 = vst [vmem:[#allocation139_spill] sm:$0xff] %v5874_v4  ;;  %v1564_v30 = vmul.f32 %v5603_v18, %v6801_v20  ;;  %v1749_v53 = vadd.f32 %v1748_v37, %v1718_v34  ;;  %v1726_v20 = vmul.f32 %v6770_v9, %v6770_v9  ;;  %v1729_v34 = vmul.f32 %v5711_v7, %v5711_v7 }
 0x3f0   : >> { %6795 = vst [vmem:[#allocation140_spill] sm:$0xff] %v5878_v10  ;;  %v1724_v10 = vmul.f32 %v6765_v31, %v6765_v31 }
 0x3f1   : >> { %6796 = vst [vmem:[#allocation141_spill] sm:$0xff] %v5882_v35  ;;  %v5899_v24 = vadd.f32 %v1564_v30, %v6805_v55   ;;  %v1750_v40 = vadd.f32 %v1749_v53, %v1719_v59  ;;  %v1730_v55 = vmul.f32 %v5714_v1, %v5714_v1  ;;  %v1731_v59 = vmul.f32 %v6778_v3, %v6778_v3 }
 0x3f2   : >> { %6798 = vst [vmem:[#allocation142_spill] sm:$0xff] %v5886_v56  ;;  %v1706_v56 = vsub.f32 1.5, %v1705_v22  ;;  %v1728_v22 = vmul.f32 %v6811_v6, %v6811_v6 }
 0x3f3   : >> { %v5905_v62 = vpack.c.bf16 %v5899_v24, %v5899_v24   ;;  %v1751_v2 = vadd.f32 %v1750_v40, %v1720_v52  ;;  %v1733_v52 = vmul.f32 %v5723_v42, %v5723_v42  ;;  %6850 = vst [vmem:[#allocation78_spill] sm:$0xff] %v6783_v5 }
 0x3f4   : >> { %v1707_v18 = vmul.f32 %v6800_v46, %v1706_v56  ;;  %v1725_v46 = vmul.f32 %v6768_v44, %v6768_v44  ;;  %6852 = vst [vmem:[#allocation79_spill] sm:$0xff] %v6768_v44 }
 0x3f5   : >> { %6806 = vst [vmem:[#allocation143_spill] sm:$0xff] %v5905_v62  ;;  %v6807_v15 = vmov %v5905_v62  ;;  %v1722_v62 = vmul.f32 %v6759_v29, %v6759_v29  ;;  %v1752_v48 = vadd.f32 %v1751_v2, %v1721_v38  ;;  %v1735_v38 = vmul.f32 %v5729_v41, %v5729_v41 }
 0x3f6   : >> { %v1708_v36 = vmul.f32 %v1707_v18, %v6810_v50  ;;  %v1732_v18 = vmul.f32 %v5720_v49, %v5720_v49  ;;  %v1736_v2 = vmul.f32 %v6738_v54, %v6738_v54  ;;  %6853 = vst [vmem:[#allocation80_spill] sm:$0xff] %v6765_v31  ;;  %v6860_v31 = vld [vmem:[#allocation110_spill] sm:$0xff] }
 0x3f7   : >> { %v1753_v4 = vadd.f32 %v1752_v48, %v1722_v62  ;;  %v1737_v62 = vmul.f32 %v5735_v0, %v5735_v0  ;;  %v1738_v48 = vmul.f32 %v5738_v58, %v5738_v58  ;;  %6854 = vst [vmem:[#allocation81_spill] sm:$0xff] %v6762_v17 }
 0x3f8   : >> { %v1710_v39 = vsel %vm1709_vm5, %v6810_v50, %v1708_v36  ;;  %v1734_v50 = vmul.f32 %v6783_v5, %v6783_v5  ;;  %v6851_v5 = vmov %v6812_v21  ;;  %6855 = vst [vmem:[#allocation82_spill] sm:$0xff] %v6759_v29  ;;  %v6858_v21 = vld [vmem:[#allocation111_spill] sm:$0xff]  ;;  %v6861_v29 = vld [vmem:[#allocation109_spill] sm:$0xff] }
 0x3f9   : >> { %v1713_v35 = vsel %vm1711_vm6, %v1712_v26, %v1710_v39  ;;  %v1754_v8 = vadd.f32 %v1753_v4, %v1723_v45  ;;  %v1739_v4 = vmul.f32 %v5741_v12, %v5741_v12  ;;  %6856 = vst [vmem:[#allocation83_spill] sm:$0xff] %v6756_v13 }
 0x3fa   : >> { %2691 = vpush %v1713_v35 }
 0x3fb   : >> { %v1755_v32 = vadd.f32 %v1754_v8, %v1724_v10  ;;  %v1740_v8 = vmul.f32 %v6743_v61, %v6743_v61  ;;  %6857 = vst [vmem:[#allocation84_spill] sm:$0xff] %v6809_v23 }
 0x3fc   : >> { %6859 = vst [vmem:[#allocation85_spill] sm:$0xff] %v6858_v21 }
 0x3fd   : >> { %v1756_v30 = vadd.f32 %v1755_v32, %v1725_v46  ;;  %v1741_v32 = vmul.f32 %v6791_v16, %v6791_v16 }
 0x3ff   : >> { %v1757_v57 = vadd.f32 %v1756_v30, %v1726_v20  ;;  %v1742_v30 = vmul.f32 %v5750_v14, %v5750_v14 }
 0x401   : >> { %v1758_v33 = vadd.f32 %v1757_v57, %v1727_v60  ;;  %v1743_v57 = vmul.f32 %v5753_v28, %v5753_v28 }
 0x403   : >> { %v1759_v37 = vadd.f32 %v1758_v33, %v1728_v22  ;;  %v1744_v22 = vmul.f32 %v5756_v63, %v5756_v63 }
 0x405   : >> { %v1760_v56 = vadd.f32 %v1759_v37, %v1729_v34  ;;  %v1745_v34 = vmul.f32 %v5759_v47, %v5759_v47 }
 0x407   : >> { %v1761_v53 = vadd.f32 %v1760_v56, %v1730_v55  ;;  %v1746_v55 = vmul.f32 %v5762_v51, %v5762_v51 }
 0x409   : >> { %v1762_v43 = vadd.f32 %v1761_v53, %v1731_v59  ;;  %v1747_v59 = vmul.f32 %v5899_v24, %v5899_v24 }
 0x40b   : >> { %v1763_v40 = vadd.f32 %v1762_v43, %v1732_v18 }
 0x40d   : >> { %v1764_v36 = vadd.f32 %v1763_v40, %v1733_v52 }
 0x40f   : >> { %v1765_v26 = vadd.f32 %v1764_v36, %v1734_v50 }
 0x411   : >> { %v1766_v39 = vadd.f32 %v1765_v26, %v1735_v38 }
 0x413   : >> { %v1767_v35 = vadd.f32 %v1766_v39, %v1736_v2 }
 0x415   : >> { %v1768_v45 = vadd.f32 %v1767_v35, %v1737_v62 }
 0x417   : >> { %v1769_v10 = vadd.f32 %v1768_v45, %v1738_v48 }
 0x419   : >> { %v1770_v46 = vadd.f32 %v1769_v10, %v1739_v4 }
 0x41b   : >> { %v1771_v20 = vadd.f32 %v1770_v46, %v1740_v8 }
 0x41d   : >> { %v1772_v60 = vadd.f32 %v1771_v20, %v1741_v32  ;;  %v6823_v20 = vld [vmem:[#allocation138_spill] sm:$0xff] }
 0x41f   : >> { %v1773_v6 = vadd.f32 %v1772_v60, %v1742_v30  ;;  %v6835_v30 = vld [vmem:[#allocation126_spill] sm:$0xff] }
 0x420   : >> { %v6843_v60 = vld [vmem:[#allocation118_spill] sm:$0xff] }
 0x421   : >> { %v1774_v33 = vadd.f32 %v1773_v6, %v1743_v57  ;;  %v6826_v57 = vld [vmem:[#allocation135_spill] sm:$0xff]  ;;  %v6844_v6 = vld [vmem:[#allocation117_spill] sm:$0xff] }
 0x423   : >> { %v1775_v37 = vadd.f32 %v1774_v33, %v1744_v22  ;;  %v6839_v33 = vld [vmem:[#allocation122_spill] sm:$0xff]  ;;  %v6840_v22 = vld [vmem:[#allocation121_spill] sm:$0xff] }
 0x425   : >> { %v1776_v56 = vadd.f32 %v1775_v37, %v1745_v34  ;;  %v6833_v37 = vld [vmem:[#allocation128_spill] sm:$0xff] }
 0x426   : >> { %v6841_v34 = vld [vmem:[#allocation120_spill] sm:$0xff] }
 0x427   : >> { %v1777_v53 = vadd.f32 %v1776_v56, %v1746_v55  ;;  %v6819_v56 = vmov %v6799_v25  ;;  %v6845_v55 = vld [vmem:[#allocation116_spill] sm:$0xff] }
 0x429   : >> { %v1778_v18 = vadd.f32 %v1777_v53, %v1747_v59  ;;  %v6830_v59 = vld [vmem:[#allocation131_spill] sm:$0xff]  ;;  %v6836_v53 = vld [vmem:[#allocation125_spill] sm:$0xff] }
 0x42b   : >> { %s2692_s2 = spop %2691  ;;  %1779 = vadd.xlane.f32.xlu1 %v1778_v18  ;;  %v6842_v18 = vld [vmem:[#allocation119_spill] sm:$0xff] }
 0x42c   : >> { %s5970_s22 = smul.f32 %s2692_s2, %s6949_s3  ;;  %s1816_s2 = smax.f32 %s1815_s11, %s4196_s10 }
 0x42e   : >> { %s5976_s18 = scalar_select %p5590_p11, %s5568_s13, %s5970_s22  }
 0x42f   : >> { %s1803_s7 = smul.f32 %s5970_s22, %s5574_s16 }
 0x430   : >> { %s6817_s8 = smov %s5976_s18 }
 0x49e   : >> { %v1780_v43 = vpop.xlane.xlu1 %1779 }
 0x49f   : >> { %v1781_v52 = vrot.slane %v1780_v43, 4 }
 0x4a1   : >> { %v1782_v40 = vadd.f32 %v1781_v52, %v1780_v43  ;;  %v6834_v52 = vld [vmem:[#allocation127_spill] sm:$0xff]  ;;  %v6848_v43 = vld [vmem:[#allocation113_spill] sm:$0xff] }
 0x4a3   : >> { %v1783_v50 = vrot.slane %v1782_v40, 2 }
 0x4a5   : >> { %v1784_v36 = vadd.f32 %v1783_v50, %v1782_v40  ;;  %v6827_v40 = vld [vmem:[#allocation134_spill] sm:$0xff]  ;;  %v6849_v50 = vld [vmem:[#allocation112_spill] sm:$0xff] }
 0x4a7   : >> { %v1785_v38 = vrot.slane %v1784_v36, 1 }
 0x4a9   : >> { %v1786_v26 = vadd.f32 %v1785_v38, %v1784_v36  ;;  %v6832_v36 = vld [vmem:[#allocation129_spill] sm:$0xff]  ;;  %v6846_v38 = vld [vmem:[#allocation115_spill] sm:$0xff] }
 0x4ab   : >> { %2693 = vpush %v1786_v26  ;;  %v6824_v26 = vld [vmem:[#allocation137_spill] sm:$0xff] }
 0x4dc   : >> { %s2694_s19 = spop %2693 }
 0x4dd   : >> { %v1788_v2 = vstv %s2694_s19 }
 0x4de   : >> { %3325 = vrsqrt.f32 %v1788_v2  ;;  %vm1796_vm7 = vcmp.eq.f32.partialorder %v1788_v2, inf  ;;  %v1799_v8 = vand.u32 2147483648, %v1788_v2  ;;  %vm1798_vm8 = vcmp.eq.f32.partialorder %v1788_v2, 0.0 }
 0x4e4   : >> { %v3326_v39 = vpop.eup %3325 }
 0x4e5   : >> { %v1790_v62 = vmul.f32 %v3326_v39, %v1788_v2 }
 0x4e7   : >> { %v1791_v35 = vmul.f32 %v3326_v39, %v1790_v62  ;;  %v6818_v62 = vmov %v6807_v15 }
 0x4e9   : >> { %v1792_v48 = vmul.f32 0.5, %v1791_v35  ;;  %v6820_v35 = vmov %v6797_v19 }
 0x4eb   : >> { %v1793_v45 = vsub.f32 1.5, %v1792_v48  ;;  %v6837_v48 = vld [vmem:[#allocation124_spill] sm:$0xff] }
 0x4ed   : >> { %v1794_v4 = vmul.f32 %v3326_v39, %v1793_v45  ;;  %v6825_v39 = vld [vmem:[#allocation136_spill] sm:$0xff]  ;;  %v6847_v45 = vld [vmem:[#allocation114_spill] sm:$0xff] }
 0x4ef   : >> { %v1795_v10 = vmul.f32 %v1794_v4, %v1788_v2  ;;  %v6822_v4 = vld [vmem:[#allocation139_spill] sm:$0xff] }
 0x4f1   : >> { %v1797_v46 = vsel %vm1796_vm7, %v1788_v2, %v1795_v10  ;;  %v6821_v10 = vld [vmem:[#allocation140_spill] sm:$0xff]  ;;  %v6831_v2 = vld [vmem:[#allocation130_spill] sm:$0xff] }
 0x4f2   : >> { %v1800_v32 = vsel %vm1798_vm8, %v1799_v8, %v1797_v46  ;;  %v6828_v46 = vld [vmem:[#allocation133_spill] sm:$0xff]  ;;  %v6829_v8 = vld [vmem:[#allocation132_spill] sm:$0xff] }
 0x4f3   : >> { %2695 = vpush %v1800_v32  ;;  %v6838_v32 = vld [vmem:[#allocation123_spill] sm:$0xff] }
 0x524   : >> { %s2696_s29 = spop %2695 }
 0x525   : >> { %s1802_s1 = sadd.f32 1e-06, %s2696_s29 }
 0x527   : >> { %s1805_s14 = smul.f32 %s1804_s15, %s1802_s1  ;;  %s6951_s16 = smov (!%p5590_p11, %s5574_s16), %s1802_s1 }
 0x528   : >> { %s798_s19 = smul.f32 0.001, %s6951_s16 }
 0x529   : >> { %p1806_p2 = scmp.gt.f32.partialorder %s1803_s7, %s1805_s14  ;;  %s6816_s7 = smov %s6951_s16 }
 0x52a   : >> { %p799_p10 = scmp.gt.f32.partialorder %s5976_s18, %s798_s19 }
 0x52b   : >> { %s6953_s2 = smov (!%p1806_p2, %s1816_s2), %s6949_s3 }
 0x52c   : >> { %s6955_s3 = smov (!%p5590_p11, %s6949_s3), %s6953_s2  ;;  %p5993_p12 = pnand %p800_p9, %p799_p10 }
 0x52d   : >> { %s6815_s22 = smov %s6955_s3  ;;  %v6862_v44 = vld [vmem:[#allocation42_spill] sm:$0xff] (%p5993_p12)  ;;  %v6863_v17 = vld [vmem:[#allocation44_spill] sm:$0xff] (%p5993_p12)  ;;  %v6878_v1 = vld [vmem:[#allocation112_spill] sm:$0xff] (%p5993_p12)  ;;  %s6940_s3 = sshll.u32 (%p5993_p12), %s4105_s0, 8 }
 0x52e   : > { %804 = sbr.rel (!%p5993_p12) target bundleno = 290 (0x122), region = 104  ;;  %v2583_v13 = vor.u32 (%p5993_p12), %v6863_v17, %v6862_v44  ;;  %v6864_v23 = vld [vmem:[#allocation38_spill] sm:$0xff] (%p5993_p12)  ;;  %v6865_v15 = vld [vmem:[#allocation40_spill] sm:$0xff] (%p5993_p12)  ;;  %v1855_v42 = vunpack.c.l.b16 (%p5993_p12), %v6878_v1  ;;  %v6880_v12 = vld [vmem:[#allocation120_spill] sm:$0xff] (%p5993_p12)  ;;  %s2132_s9 = scalar_lea.hbm (%p5993_p12), %s6354_s6, %s6940_s3 }
 0x52f   : > { %v2579_v25 = vor.u32 (%p5993_p12), %v6865_v15, %v6864_v23  ;;  %v6866_v21 = vld [vmem:[#allocation34_spill] sm:$0xff] (%p5993_p12)  ;;  %v6867_v19 = vld [vmem:[#allocation36_spill] sm:$0xff] (%p5993_p12)  ;;  %v1863_v41 = vunpack.c.l.b16 (%p5993_p12), %v6880_v12  ;;  %v6882_v28 = vld [vmem:[#allocation128_spill] sm:$0xff] (%p5993_p12)  ;;  %s2133_s21 = sshll.u32 (%p5993_p12), %s4534_s17, 4  ;;  %s2135_s8 = sshll.u32 (%p5993_p12), %s2132_s9, 4  ;;  %s2134_s21 = int_to_ptr.vmem [resolvable:$true] %s2133_s21  ;;  %s2136_s8 = int_to_ptr.hbm [resolvable:$true] %s2135_s8 }
 0x530   : > { %1967 = vmatpush.bf16.msra.mxu0 (%p5993_p12), %v2583_v13  ;;  %2655 = vmatpush.bf16.msra.mxu1 (%p5993_p12), %v2583_v13  ;;  %v2575_v29 = vor.u32 (%p5993_p12), %v6867_v19, %v6866_v21  ;;  %v6868_v0 = vld [vmem:[#allocation30_spill] sm:$0xff] (%p5993_p12)  ;;  %v6869_v54 = vld [vmem:[#allocation32_spill] sm:$0xff] (%p5993_p12)  ;;  %v1871_v16 = vunpack.c.l.b16 (%p5993_p12), %v6882_v28  ;;  %v6884_v30 = vld [vmem:[#allocation136_spill] sm:$0xff] (%p5993_p12)  ;;  %s2121_s0 = scalar_lea.sflag (%p5993_p12), [#allocation6], %s4180_s12  ;;  %s3431_s22 = sshra.s32 (%p5993_p12), %s2136_s8, 4  ;;  %s3432_s22 = int_to_ptr.hbm [resolvable:$true] %s3431_s22 }
 0x531   : > { %2656 = vmatpush.bf16.msra.mxu2 (%p5993_p12), %v2583_v13  ;;  %2657 = vmatpush.bf16.msra.mxu3 (%p5993_p12), %v2583_v13  ;;  %v2571_v61 = vor.u32 (%p5993_p12), %v6869_v54, %v6868_v0  ;;  %v6870_v31 = vld [vmem:[#allocation26_spill] sm:$0xff] (%p5993_p12)  ;;  %v6871_v15 = vld [vmem:[#allocation28_spill] sm:$0xff] (%p5993_p12)  ;;  %v1879_v60 = vunpack.c.l.b16 (%p5993_p12), %v6884_v30  ;;  %v6886_v55 = vld [vmem:[#allocation114_spill] sm:$0xff] (%p5993_p12)  ;;  %s3433_s18 = scalar_lea.hbm (%p5993_p12), %s3432_s22, 256  ;;  %s3437_s11 = scalar_lea.hbm (%p5993_p12), %s6354_s6, 512 }
 0x532   : > { %v2567_v27 = vor.u32 (%p5993_p12), %v6871_v15, %v6870_v31  ;;  %v6872_v51 = vld [vmem:[#allocation22_spill] sm:$0xff] (%p5993_p12)  ;;  %v6873_v5 = vld [vmem:[#allocation24_spill] sm:$0xff] (%p5993_p12)  ;;  %v1857_v56 = vunpack.c.l.b16 (%p5993_p12), %v6886_v55  ;;  %v6888_v18 = vld [vmem:[#allocation122_spill] sm:$0xff] (%p5993_p12)  ;;  %p3434_p13 = scmp.ne.s32.totalorder (%p5993_p12), %s3432_s22, %s3433_s18  ;;  %p3438_p7 = scmp.lt.s32.totalorder (%p5993_p12), %s3432_s22, %s6354_s6 }
 0x533   : > { %v2563_v3 = vor.u32 %v6873_v5, %v6872_v51  ;;  %v6875_v11 = vld [vmem:[#allocation20_spill] sm:$0xff]  ;;  %v6876_v19 = vld [vmem:[#allocation14_spill] sm:$0xff]  ;;  %v1865_v43 = vunpack.c.l.b16 %v6888_v18  ;;  %v6890_v50 = vld [vmem:[#allocation130_spill] sm:$0xff]  ;;  %p3439_p1 = scmp.lt.s32.totalorder %s3437_s11, %s3433_s18 }
 0x534   : > { %1968 = vmatpush.bf16.msra.mxu0 %v2579_v25  ;;  %2658 = vmatpush.bf16.msra.mxu1 %v2579_v25  ;;  %v6877_v49 = vld [vmem:[#allocation16_spill] sm:$0xff]  ;;  %v6879_v63 = vld [vmem:[#allocation113_spill] sm:$0xff]  ;;  %v1873_v36 = vunpack.c.l.b16 %v6890_v50  ;;  %v6892_v2 = vld [vmem:[#allocation138_spill] sm:$0xff]  ;;  %p3435_p0 = pnand %p3434_p13, %p4150_p3 }
 0x535   : > { %2659 = vmatpush.bf16.msra.mxu2 %v2579_v25  ;;  %2660 = vmatpush.bf16.msra.mxu3 %v2579_v25  ;;  %v6874_v25 = vld [vmem:[#allocation18_spill] sm:$0xff]  ;;  %v2555_v58 = vor.u32 %v6877_v49, %v6876_v19  ;;  %v1856_v7 = vunpack.c.l.b16 %v6879_v63  ;;  %v6887_v59 = vld [vmem:[#allocation115_spill] sm:$0xff]  ;;  %v1881_v39 = vunpack.c.l.b16 %v6892_v2  ;;  %v6894_v8 = vld [vmem:[#allocation116_spill] sm:$0xff]  ;;  %p3440_p4 = por %p3439_p1, %p3438_p7 }
 0x536   : > { %v2559_v47 = vor.u32 %v6875_v11, %v6874_v25  ;;  %v6881_v14 = vld [vmem:[#allocation121_spill] sm:$0xff]  ;;  %v1858_v53 = vunpack.c.l.b16 %v6887_v59  ;;  %v6889_v52 = vld [vmem:[#allocation123_spill] sm:$0xff]  ;;  %v1859_v46 = vunpack.c.l.b16 %v6894_v8  ;;  %v6896_v17 = vld [vmem:[#allocation124_spill] sm:$0xff]  ;;  %p3436_p5 = pneg %p3435_p0 }
 0x537   : > { %v1864_v9 = vunpack.c.l.b16 %v6881_v14  ;;  %v6883_v24 = vld [vmem:[#allocation129_spill] sm:$0xff]  ;;  %v1887_v22 = vpack.c.b16 %v1856_v7, %v1855_v42  ;;  %v1866_v40 = vunpack.c.l.b16 %v6889_v52  ;;  %v6891_v38 = vld [vmem:[#allocation131_spill] sm:$0xff]  ;;  %v1867_v13 = vunpack.c.l.b16 %v6896_v17  ;;  %v6900_v31 = vld [vmem:[#allocation140_spill] sm:$0xff] }
 0x538   : > { %1969 = vmatpush.bf16.msra.mxu0 %v2575_v29  ;;  %2661 = vmatpush.bf16.msra.mxu1 %v2575_v29  ;;  %v1872_v20 = vunpack.c.l.b16 %v6883_v24  ;;  %v6885_v57 = vld [vmem:[#allocation137_spill] sm:$0xff]  ;;  %v1874_v26 = vunpack.c.l.b16 %v6891_v38  ;;  %v6893_v62 = vld [vmem:[#allocation139_spill] sm:$0xff]  ;;  %v1888_v48 = vpack.c.b16 %v1858_v53, %v1857_v56  ;;  %v1883_v15 = vunpack.c.l.b16 %v6900_v31  ;;  %v6904_v1 = vld [vmem:[#allocation126_spill] sm:$0xff]  ;;  %p3441_p8 = pnand %p3440_p4, %p3436_p5 }
 0x539   : > { %2662 = vmatpush.bf16.msra.mxu2 %v2575_v29  ;;  %2663 = vmatpush.bf16.msra.mxu3 %v2575_v29  ;;  %v1880_v6 = vunpack.c.l.b16 %v6885_v57  ;;  %v1891_v33 = vpack.c.b16 %v1864_v9, %v1863_v41  ;;  %v1882_v35 = vunpack.c.l.b16 %v6893_v62  ;;  %v1892_v45 = vpack.c.b16 %v1866_v40, %v1865_v43  ;;  %v6895_v32 = vld [vmem:[#allocation117_spill] sm:$0xff]  ;;  %v6898_v29 = vld [vmem:[#allocation132_spill] sm:$0xff]  ;;  %v6903_v49 = vld [vmem:[#allocation119_spill] sm:$0xff] }
 0x53a   : > { %v1895_v34 = vpack.c.b16 %v1872_v20, %v1871_v16  ;;  %v1896_v4 = vpack.c.b16 %v1874_v26, %v1873_v36  ;;  %v1860_v44 = vunpack.c.l.b16 %v6895_v32  ;;  %v6897_v23 = vld [vmem:[#allocation125_spill] sm:$0xff]  ;;  %v1875_v0 = vunpack.c.l.b16 %v6898_v29  ;;  %v6905_v63 = vld [vmem:[#allocation127_spill] sm:$0xff]  ;;  %v6906_v12 = vld [vmem:[#allocation134_spill] sm:$0xff] }
 0x53b   : > { %v1899_v37 = vpack.c.b16 %v1880_v6, %v1879_v60  ;;  %v1900_v10 = vpack.c.b16 %v1882_v35, %v1881_v39  ;;  %v1868_v21 = vunpack.c.l.b16 %v6897_v23  ;;  %v6899_v54 = vld [vmem:[#allocation133_spill] sm:$0xff]  ;;  %v1869_v42 = vunpack.c.l.b16 %v6904_v1  ;;  %v6907_v14 = vld [vmem:[#allocation135_spill] sm:$0xff]  ;;  %v6908_v28 = vld [vmem:[#allocation142_spill] sm:$0xff] }
 0x53c   : > { %1970 = vmatpush.bf16.msra.mxu0 %v2571_v61  ;;  %2664 = vmatpush.bf16.msra.mxu1 %v2571_v61  ;;  %v1889_v5 = vpack.c.b16 %v1860_v44, %v1859_v46  ;;  %v1870_v7 = vunpack.c.l.b16 %v6905_v63  ;;  %v1877_v41 = vunpack.c.l.b16 %v6906_v12  ;;  %v1878_v9 = vunpack.c.l.b16 %v6907_v14  ;;  %v6909_v24 = vld [vmem:[#allocation143_spill] sm:$0xff]  ;;  %v6911_v55 = vld [vmem:[#allocation47_spill] sm:$0xff]  ;;  %v6913_v50 = vld [vmem:[#allocation49_spill] sm:$0xff] }
 0x53d   : > { %2665 = vmatpush.bf16.msra.mxu2 %v2571_v61  ;;  %2666 = vmatpush.bf16.msra.mxu3 %v2571_v61  ;;  %v1876_v61 = vunpack.c.l.b16 %v6899_v54  ;;  %v1885_v16 = vunpack.c.l.b16 %v6908_v28  ;;  %v1886_v20 = vunpack.c.l.b16 %v6909_v24  ;;  %v6912_v52 = vld [vmem:[#allocation48_spill] sm:$0xff]  ;;  %v6914_v2 = vld [vmem:[#allocation50_spill] sm:$0xff]  ;;  %v6915_v62 = vld [vmem:[#allocation51_spill] sm:$0xff] }
 0x53e   : > { %v1894_v60 = vpack.c.b16 %v1870_v7, %v1869_v42  ;;  %v1898_v57 = vpack.c.b16 %v1878_v9, %v1877_v41  ;;  %v6916_v32 = vld [vmem:[#allocation52_spill] sm:$0xff]  ;;  %v6917_v17 = vld [vmem:[#allocation53_spill] sm:$0xff]  ;;  %v6918_v29 = vld [vmem:[#allocation54_spill] sm:$0xff] }
 0x53f   : > { %v1897_v25 = vpack.c.b16 %v1876_v61, %v1875_v0  ;;  %v1902_v6 = vpack.c.b16 %v1886_v20, %v1885_v16  ;;  %v6919_v54 = vld [vmem:[#allocation55_spill] sm:$0xff]  ;;  %v6922_v1 = vld [vmem:[#allocation58_spill] sm:$0xff]  ;;  %v6924_v24 = vld [vmem:[#allocation60_spill] sm:$0xff] }
 0x540   : > { %1971 = vmatpush.bf16.msra.mxu0 %v2567_v27  ;;  %2667 = vmatpush.bf16.msra.mxu1 %v2567_v27  ;;  %v6923_v63 = vld [vmem:[#allocation59_spill] sm:$0xff] }
 0x541   : > { %2668 = vmatpush.bf16.msra.mxu2 %v2567_v27  ;;  %2669 = vmatpush.bf16.msra.mxu3 %v2567_v27  ;;  %v6901_v27 = vld [vmem:[#allocation141_spill] sm:$0xff] }
 0x542   : > { %v1884_v51 = vunpack.c.l.b16 %v6901_v27 }
 0x544   : > { %1972 = vmatpush.bf16.msra.mxu0 %v2563_v3  ;;  %2670 = vmatpush.bf16.msra.mxu1 %v2563_v3  ;;  %v1901_v11 = vpack.c.b16 %v1884_v51, %v1883_v15 }
 0x545   : > { %2671 = vmatpush.bf16.msra.mxu2 %v2563_v3  ;;  %2672 = vmatpush.bf16.msra.mxu3 %v2563_v3  ;;  %v1893_v3 = vpack.c.b16 %v1868_v21, %v1867_v13 }
 0x548   : > { %1973 = vmatpush.bf16.msra.mxu0 %v2559_v47  ;;  %2673 = vmatpush.bf16.msra.mxu1 %v2559_v47 }
 0x549   : > { %2674 = vmatpush.bf16.msra.mxu2 %v2559_v47  ;;  %2675 = vmatpush.bf16.msra.mxu3 %v2559_v47  ;;  %v6902_v47 = vld [vmem:[#allocation118_spill] sm:$0xff] }
 0x54a   : > { %v1861_v19 = vunpack.c.l.b16 %v6902_v47  ;;  %v6921_v47 = vld [vmem:[#allocation57_spill] sm:$0xff] }
 0x54c   : > { %1974 = vmatpush.bf16.msra.mxu0 %v2555_v58  ;;  %2676 = vmatpush.bf16.msra.mxu1 %v2555_v58 }
 0x54d   : > { %2677 = vmatpush.bf16.msra.mxu2 %v2555_v58  ;;  %2678 = vmatpush.bf16.msra.mxu3 %v2555_v58  ;;  %v1862_v58 = vunpack.c.l.b16 %v6903_v49 }
 0x54f   : > { %1975 = vmatmul.bf16.vlgmr.msra.gmra.mxu0 %v1887_v22  ;;  %1995 = vmatmul.bf16.vlgmr.msra.gmra.mxu1 %v1891_v33  ;;  %v1890_v30 = vpack.c.b16 %v1862_v58, %v1861_v19 }
 0x550   : > { %2015 = vmatmul.bf16.vlgmr.msra.gmra.mxu2 %v1895_v34  ;;  %2035 = vmatmul.bf16.vlgmr.msra.gmra.mxu3 %v1899_v37  ;;  %v6910_v34 = vld [vmem:[#allocation46_spill] sm:$0xff] }
 0x55f   : > { %1980 = vmatmul.bf16.gmra.mxu0 %v1888_v48  ;;  %2000 = vmatmul.bf16.gmra.mxu1 %v1892_v45 }
 0x560   : > { %2020 = vmatmul.bf16.gmra.mxu2 %v1896_v4  ;;  %2040 = vmatmul.bf16.gmra.mxu3 %v1900_v10 }
 0x56f   : > { %1985 = vmatmul.bf16.gmra.mxu0 %v1889_v5  ;;  %2005 = vmatmul.bf16.gmra.mxu1 %v1893_v3 }
 0x570   : > { %2025 = vmatmul.bf16.gmra.mxu2 %v1897_v25  ;;  %2045 = vmatmul.bf16.gmra.mxu3 %v1901_v11  ;;  %v6920_v25 = vld [vmem:[#allocation56_spill] sm:$0xff] }
 0x57f   : > { %1990 = vmatmul.bf16.gmra.mxu0 %v1890_v30  ;;  %2010 = vmatmul.bf16.gmra.mxu1 %v1894_v60  ;;  %v6925_v30 = vld [vmem:[#allocation61_spill] sm:$0xff] }
 0x580   : > { %2030 = vmatmul.bf16.gmra.mxu2 %v1898_v57  ;;  %2050 = vmatmul.bf16.gmra.mxu3 %v1902_v6 }
 0x5cc   : > { %v1976_v22 = vpop.f32.mrf.mxu0  ;;  %v1996_v33 = vpop.f32.mrf.mxu1 }
 0x5cd   : > { %v1977_v37 = vadd.f32 %v1976_v22, %v6910_v34  ;;  %v1997_v56 = vadd.f32 %v1996_v33, %v6911_v55  ;;  %v6926_v22 = vld [vmem:[#allocation62_spill] sm:$0xff]  ;;  %v6927_v34 = vld [vmem:[#allocation63_spill] sm:$0xff] }
 0x5cf   : > { %v2056_v59 = vmax.f32 %v1977_v37, 0.0  ;;  %v2064_v53 = vmax.f32 %v1997_v56, 0.0 }
 0x5d1   : > { %2088 = vst [vmem:[%s4534_s17] sm:$0xff] %v2056_v59 }
 0x5d2   : > { %2096 = vst [vmem:[%s4534_s17 + $0x40] sm:$0xff] %v2064_v53 }
 0x5d3   : > { %v2016_v18 = vpop.f32.mrf.mxu2  ;;  %v2036_v43 = vpop.f32.mrf.mxu3 }
 0x5d4   : > { %v2017_v40 = vadd.f32 %v2016_v18, %v6912_v52  ;;  %v2037_v36 = vadd.f32 %v2036_v43, %v6913_v50  ;;  %v1978_v38 = vpop.f32.mrf.mxu0  ;;  %v1998_v26 = vpop.f32.mrf.mxu1  ;;  %v6928_v52 = vld [vmem:[#allocation64_spill] sm:$0xff]  ;;  %v6929_v50 = vld [vmem:[#allocation65_spill] sm:$0xff] }
 0x5d5   : > { %v1979_v39 = vadd.f32 %v1978_v38, %v6914_v2  ;;  %v1999_v35 = vadd.f32 %v1998_v26, %v6915_v62  ;;  %v6930_v2 = vld [vmem:[#allocation66_spill] sm:$0xff]  ;;  %v6931_v62 = vld [vmem:[#allocation67_spill] sm:$0xff] }
 0x5d6   : > { %v2072_v48 = vmax.f32 %v2017_v40, 0.0  ;;  %v2080_v45 = vmax.f32 %v2037_v36, 0.0 }
 0x5d7   : > { %v2057_v4 = vmax.f32 %v1979_v39, 0.0  ;;  %v2065_v10 = vmax.f32 %v1999_v35, 0.0 }
 0x5d8   : > { %2104 = vst [vmem:[%s4534_s17 + $0x80] sm:$0xff] %v2072_v48 }
 0x5d9   : > { %2112 = vst [vmem:[%s4534_s17 + $0xc0] sm:$0xff] %v2080_v45 }
 0x5da   : > { %2089 = vst [vmem:[%s4534_s17 + $0x8] sm:$0xff] %v2057_v4 }
 0x5db   : > { %2097 = vst [vmem:[%s4534_s17 + $0x48] sm:$0xff] %v2065_v10  ;;  %v2018_v8 = vpop.f32.mrf.mxu2  ;;  %v2038_v46 = vpop.f32.mrf.mxu3 }
 0x5dc   : > { %v2019_v44 = vadd.f32 %v2018_v8, %v6916_v32  ;;  %v2039_v13 = vadd.f32 %v2038_v46, %v6917_v17  ;;  %v1981_v23 = vpop.f32.mrf.mxu0  ;;  %v2001_v21 = vpop.f32.mrf.mxu1  ;;  %v6932_v32 = vld [vmem:[#allocation68_spill] sm:$0xff]  ;;  %v6933_v17 = vld [vmem:[#allocation69_spill] sm:$0xff] }
 0x5dd   : > { %v1982_v0 = vadd.f32 %v1981_v23, %v6918_v29  ;;  %v2002_v61 = vadd.f32 %v2001_v21, %v6919_v54  ;;  %v6934_v29 = vld [vmem:[#allocation70_spill] sm:$0xff]  ;;  %v6935_v54 = vld [vmem:[#allocation71_spill] sm:$0xff] }
 0x5de   : > { %v2073_v31 = vmax.f32 %v2019_v44, 0.0  ;;  %v2081_v15 = vmax.f32 %v2039_v13, 0.0 }
 0x5df   : > { %v2058_v27 = vmax.f32 %v1982_v0, 0.0  ;;  %v2066_v51 = vmax.f32 %v2002_v61, 0.0 }
 0x5e0   : > { %2105 = vst [vmem:[%s4534_s17 + $0x88] sm:$0xff] %v2073_v31 }
 0x5e1   : > { %2113 = vst [vmem:[%s4534_s17 + $0xc8] sm:$0xff] %v2081_v15 }
 0x5e2   : > { %2090 = vst [vmem:[%s4534_s17 + $0x10] sm:$0xff] %v2058_v27 }
 0x5e3   : > { %2098 = vst [vmem:[%s4534_s17 + $0x50] sm:$0xff] %v2066_v51  ;;  %v2021_v5 = vpop.f32.mrf.mxu2  ;;  %v2041_v3 = vpop.f32.mrf.mxu3 }
 0x5e4   : > { %v2022_v11 = vadd.f32 %v2021_v5, %v6920_v25  ;;  %v2042_v19 = vadd.f32 %v2041_v3, %v6921_v47  ;;  %v1983_v49 = vpop.f32.mrf.mxu0  ;;  %v2003_v58 = vpop.f32.mrf.mxu1  ;;  %v6936_v25 = vld [vmem:[#allocation72_spill] sm:$0xff]  ;;  %v6937_v47 = vld [vmem:[#allocation73_spill] sm:$0xff] }
 0x5e5   : > { %v1984_v42 = vadd.f32 %v1983_v49, %v6922_v1  ;;  %v2004_v7 = vadd.f32 %v2003_v58, %v6923_v63  ;;  %v6938_v1 = vld [vmem:[#allocation74_spill] sm:$0xff]  ;;  %v6939_v63 = vld [vmem:[#allocation75_spill] sm:$0xff] }
 0x5e6   : > { %v2074_v12 = vmax.f32 %v2022_v11, 0.0  ;;  %v2082_v41 = vmax.f32 %v2042_v19, 0.0 }
 0x5e7   : > { %v2059_v14 = vmax.f32 %v1984_v42, 0.0  ;;  %v2067_v9 = vmax.f32 %v2004_v7, 0.0 }
 0x5e8   : > { %2106 = vst [vmem:[%s4534_s17 + $0x90] sm:$0xff] %v2074_v12 }
 0x5e9   : > { %2114 = vst [vmem:[%s4534_s17 + $0xd0] sm:$0xff] %v2082_v41 }
 0x5ea   : > { %2091 = vst [vmem:[%s4534_s17 + $0x18] sm:$0xff] %v2059_v14 }
 0x5eb   : > { %2099 = vst [vmem:[%s4534_s17 + $0x58] sm:$0xff] %v2067_v9  ;;  %v2023_v28 = vpop.f32.mrf.mxu2  ;;  %v2043_v16 = vpop.f32.mrf.mxu3 }
 0x5ec   : > { %v2024_v20 = vadd.f32 %v2023_v28, %v6924_v24  ;;  %v2044_v60 = vadd.f32 %v2043_v16, %v6925_v30  ;;  %v1986_v57 = vpop.f32.mrf.mxu0  ;;  %v2006_v6 = vpop.f32.mrf.mxu1  ;;  %v6941_v24 = vld [vmem:[#allocation76_spill] sm:$0xff]  ;;  %v6942_v30 = vld [vmem:[#allocation77_spill] sm:$0xff] }
 0x5ed   : > { %v1987_v33 = vadd.f32 %v1986_v57, %v6926_v22  ;;  %v2007_v37 = vadd.f32 %v2006_v6, %v6927_v34 }
 0x5ee   : > { %v2075_v55 = vmax.f32 %v2024_v20, 0.0  ;;  %v2083_v56 = vmax.f32 %v2044_v60, 0.0 }
 0x5ef   : > { %v2060_v59 = vmax.f32 %v1987_v33, 0.0  ;;  %v2068_v53 = vmax.f32 %v2007_v37, 0.0 }
 0x5f0   : > { %2107 = vst [vmem:[%s4534_s17 + $0x98] sm:$0xff] %v2075_v55 }
 0x5f1   : > { %2115 = vst [vmem:[%s4534_s17 + $0xd8] sm:$0xff] %v2083_v56 }
 0x5f2   : > { %2092 = vst [vmem:[%s4534_s17 + $0x20] sm:$0xff] %v2060_v59 }
 0x5f3   : > { %2100 = vst [vmem:[%s4534_s17 + $0x60] sm:$0xff] %v2068_v53  ;;  %v2026_v18 = vpop.f32.mrf.mxu2  ;;  %v2046_v43 = vpop.f32.mrf.mxu3 }
 0x5f4   : > { %v2027_v40 = vadd.f32 %v2026_v18, %v6928_v52  ;;  %v2047_v36 = vadd.f32 %v2046_v43, %v6929_v50  ;;  %v1988_v38 = vpop.f32.mrf.mxu0  ;;  %v2008_v26 = vpop.f32.mrf.mxu1 }
 0x5f5   : > { %v1989_v39 = vadd.f32 %v1988_v38, %v6930_v2  ;;  %v2009_v35 = vadd.f32 %v2008_v26, %v6931_v62 }
 0x5f6   : > { %v2076_v48 = vmax.f32 %v2027_v40, 0.0  ;;  %v2084_v45 = vmax.f32 %v2047_v36, 0.0 }
 0x5f7   : > { %v2061_v4 = vmax.f32 %v1989_v39, 0.0  ;;  %v2069_v10 = vmax.f32 %v2009_v35, 0.0 }
 0x5f8   : > { %2108 = vst [vmem:[%s4534_s17 + $0xa0] sm:$0xff] %v2076_v48 }
 0x5f9   : > { %2116 = vst [vmem:[%s4534_s17 + $0xe0] sm:$0xff] %v2084_v45 }
 0x5fa   : > { %2093 = vst [vmem:[%s4534_s17 + $0x28] sm:$0xff] %v2061_v4 }
 0x5fb   : > { %2101 = vst [vmem:[%s4534_s17 + $0x68] sm:$0xff] %v2069_v10  ;;  %v2028_v8 = vpop.f32.mrf.mxu2  ;;  %v2048_v46 = vpop.f32.mrf.mxu3 }
 0x5fc   : > { %v2029_v44 = vadd.f32 %v2028_v8, %v6932_v32  ;;  %v2049_v13 = vadd.f32 %v2048_v46, %v6933_v17  ;;  %v1991_v23 = vpop.f32.mrf.mxu0  ;;  %v2011_v21 = vpop.f32.mrf.mxu1 }
 0x5fd   : > { %v1992_v0 = vadd.f32 %v1991_v23, %v6934_v29  ;;  %v2012_v61 = vadd.f32 %v2011_v21, %v6935_v54 }
 0x5fe   : > { %v2077_v31 = vmax.f32 %v2029_v44, 0.0  ;;  %v2085_v15 = vmax.f32 %v2049_v13, 0.0 }
 0x5ff   : > { %v2062_v27 = vmax.f32 %v1992_v0, 0.0  ;;  %v2070_v51 = vmax.f32 %v2012_v61, 0.0 }
 0x600   : > { %2109 = vst [vmem:[%s4534_s17 + $0xa8] sm:$0xff] %v2077_v31 }
 0x601   : > { %2117 = vst [vmem:[%s4534_s17 + $0xe8] sm:$0xff] %v2085_v15 }
 0x602   : > { %2094 = vst [vmem:[%s4534_s17 + $0x30] sm:$0xff] %v2062_v27 }
 0x603   : > { %2102 = vst [vmem:[%s4534_s17 + $0x70] sm:$0xff] %v2070_v51  ;;  %v2031_v5 = vpop.f32.mrf.mxu2  ;;  %v2051_v3 = vpop.f32.mrf.mxu3 }
 0x604   : > { %v2032_v11 = vadd.f32 %v2031_v5, %v6936_v25  ;;  %v2052_v19 = vadd.f32 %v2051_v3, %v6937_v47  ;;  %v1993_v49 = vpop.f32.mrf.mxu0  ;;  %v2013_v58 = vpop.f32.mrf.mxu1 }
 0x605   : > { %v1994_v42 = vadd.f32 %v1993_v49, %v6938_v1  ;;  %v2014_v7 = vadd.f32 %v2013_v58, %v6939_v63 }
 0x606   : > { %v2078_v12 = vmax.f32 %v2032_v11, 0.0  ;;  %v2086_v41 = vmax.f32 %v2052_v19, 0.0 }
 0x607   : > { %v2063_v14 = vmax.f32 %v1994_v42, 0.0  ;;  %v2071_v9 = vmax.f32 %v2014_v7, 0.0 }
 0x608   : > { %2110 = vst [vmem:[%s4534_s17 + $0xb0] sm:$0xff] %v2078_v12 }
 0x609   : > { %2118 = vst [vmem:[%s4534_s17 + $0xf0] sm:$0xff] %v2086_v41 }
 0x60a   : > { %2095 = vst [vmem:[%s4534_s17 + $0x38] sm:$0xff] %v2063_v14 }
 0x60b   : > { %2103 = vst [vmem:[%s4534_s17 + $0x78] sm:$0xff] %v2071_v9  ;;  %v2033_v28 = vpop.f32.mrf.mxu2  ;;  %v2053_v16 = vpop.f32.mrf.mxu3 }
 0x60c   : > { %v2034_v20 = vadd.f32 %v2033_v28, %v6941_v24  ;;  %v2054_v60 = vadd.f32 %v2053_v16, %v6942_v30 }
 0x60e   : > { %v2079_v57 = vmax.f32 %v2034_v20, 0.0  ;;  %v2087_v6 = vmax.f32 %v2054_v60, 0.0 }
 0x610   : > { %2111 = vst [vmem:[%s4534_s17 + $0xb8] sm:$0xff] %v2079_v57 }
 0x611   : > { %2119 = vst [vmem:[%s4534_s17 + $0xf8] sm:$0xff] %v2087_v6 }
 0x612   : > { %3444 = shalt.err (!%p3441_p8)
}
 0x613   : > { %s4041_s12 = smov 128   ;;  %s4042_s17 = smov 8  }
 0x614   : > { %2707 = dma.vmem_to_hbm [thread:$0]  (%p4150_p3), %s2134_s21, 4096, %s2136_s8, %s2121_s0, %s4041_s12, %s4041_s12, %s4042_s17  }
 0x615 PF: > { %s2150_s14 = sand.u32 1, %s3747_s25   ;;  %p6943_p11 = scmp.ge.s32.totalorder %s3759_s28, 2 }
 0x616   : > { %s2151_s2 = scalar_lea.sflag [#allocation6], %s2150_s14 }
 0x617   : > { %p2721_p2 = pnand %p6943_p11, %p4119_p6 }
 0x619   : > { %p2722_p9 = pneg %p2721_p2 }
 0x61b   : > { %3742 = dma.done.wait (%p2722_p9), %s2151_s2, 4096  }
 0x61c   : > { %3744 = vsyncadd (%p2722_p9), %s2151_s2, 4294963200  ;;  %p22_p10 = scmp.ge.s32.totalorder %s4140_s20, 4   ;;  %s6944_s25 = smov %s3751_s26 }
 0x61d   : > { %s6945_s26 = smov %s3755_s27  ;;  %s6946_s27 = smov %s4156_s24 }
 0x61e   : > { %s6947_s28 = smov %s4140_s20  ;;  %24 = sbr.rel (!%p22_p10) target bundleno = 11 (0xb), region = 115 }
 0x623   :  { %2157 = vsyncpa [#allocation5], 1 }
 0x624   :  { %2159 = vsyncpa [#allocation5 + $0x1], 1 }
 0x625   :  { %2160 = vsyncpa [#allocation8], 1 }
 0x626   :  { %2161 = vsyncpa [#allocation6], 1 }
 0x627   :  { %2163 = vsyncpa [#allocation6 + $0x1], 1 }

</bundles_post_ra>
